<compile_context>
chip_gen: v5e
topology: v5e:2x2
jax: 0.10.0
libtpu: 0.0.40
codegen_flags: <defaults>
</compile_context>

<pallas_src>
import functools

import jax
import jax.numpy as jnp
from jax.experimental import pallas as pl
from jax.experimental.pallas import tpu as pltpu


def _round_up(x, m):
    return (x + m - 1) // m * m


# ----------------------------------------------------------------------------
# Pallas kernel: fused  Y = act( X @ W + shift )   (BN scale pre-folded into W)
# ----------------------------------------------------------------------------
def _fused_matmul_kernel(x_ref, w_ref, shift_ref, o_ref, *, activation):
    acc = jnp.dot(x_ref[...], w_ref[...], preferred_element_type=jnp.float32)
    y = acc + shift_ref[...]                      # f32 epilogue
    if activation == "relu":
        y = jnp.maximum(y, 0.0)
    elif activation == "tanh":
        y = jnp.tanh(y)
    o_ref[...] = y.astype(o_ref.dtype)


def fused_matmul(x, w_bf16, shift, activation, out_dtype=jnp.bfloat16, tm_max=512):
    """x: (M, K); w_bf16: (K, N) bf16 with BN scale folded in; shift: (1, N) f32."""
    M, K = x.shape
    Kw, N = w_bf16.shape
    assert K == Kw and shift.shape == (1, N)
    n_tiles = -(-M // tm_max)                      # ceil(M / tm_max)
    tm = _round_up(-(-M // n_tiles), 8)            # ~even tiles, sublane-aligned
    Mp = tm * n_tiles
    xb = x.astype(jnp.bfloat16)
    if Mp != M:
        xb = jnp.pad(xb, ((0, Mp - M), (0, 0)))
    kernel = functools.partial(_fused_matmul_kernel, activation=activation)
    out = pl.pallas_call(
        kernel,
        out_shape=jax.ShapeDtypeStruct((Mp, N), out_dtype),
        grid=(n_tiles,),
        in_specs=[
            pl.BlockSpec((tm, K), lambda i: (i, 0)),   # X tile, pipelined over M
            pl.BlockSpec((K, N), lambda i: (0, 0)),    # W resident (same block idx)
            pl.BlockSpec((1, N), lambda i: (0, 0)),    # shift resident
        ],
        out_specs=pl.BlockSpec((tm, N), lambda i: (i, 0)),
        compiler_params=pltpu.CompilerParams(
            dimension_semantics=("parallel",)),
    )(xb, w_bf16, shift)
    return out if Mp == M else out[:M]


# ----------------------------------------------------------------------------
# One-time parameter preparation (hoisted out of the jitted forward)
# ----------------------------------------------------------------------------
def bn_fold(gamma, beta, mean, var, eps=1e-5):
    scale = gamma / jnp.sqrt(var + eps)
    shift = beta - mean * scale
    return scale, shift


def _subpixel_weight_and_shift(w_t, scale, shift, pad_n_to=None):
    """Build the 4-phase sub-pixel GEMM weight for ConvTranspose2d(k=4,s=2,p=1).

    w_t: (Cin, Cout, 4, 4) PyTorch layout.  Returns W_all (4*Cin, >=4*Cout) bf16
    (BN scale folded into columns) and shift (1, >=4*Cout) f32.
    Row blocks are taps (a, b) in {0,1}^2 reading x_pad[m+a, n+b]; column blocks are
    phases [EE, EO, OE, OO] with kernel index (ky, kx) = (ky_off - 2a, kx_off - 2b).
    """
    Cin, Cout = w_t.shape[0], w_t.shape[1]
    phase_offs = [(3, 3), (3, 2), (2, 3), (2, 2)]   # EE, EO, OE, OO
    rows = []
    for a in range(2):
        for b in range(2):
            cols = [w_t[:, :, kyo - 2 * a, kxo - 2 * b] * scale[None, :]
                    for (kyo, kxo) in phase_offs]
            rows.append(jnp.concatenate(cols, axis=1))        # (Cin, 4*Cout)
    w_all = jnp.concatenate(rows, axis=0)                     # (4*Cin, 4*Cout)
    sh_all = jnp.tile(shift, 4)                               # (4*Cout,)
    if pad_n_to is not None and pad_n_to > 4 * Cout:
        w_all = jnp.pad(w_all, ((0, 0), (0, pad_n_to - 4 * Cout)))
        sh_all = jnp.pad(sh_all, (0, pad_n_to - 4 * Cout))
    return w_all.astype(jnp.bfloat16), sh_all.reshape(1, -1).astype(jnp.float32)


def prepare_params(p):
    prep = {}
    # --- fc1 (Linear 110->384) fused with tconv2 (384->192, k=4, s=1, p=0 on 1x1) + BN2
    s2, b2 = bn_fold(p["bn2_g"], p["bn2_b"], p["bn2_m"], p["bn2_v"])
    w2_mat = p["w2"].reshape(384, 192 * 16)                   # columns (co, ky, kx)
    s2r = jnp.repeat(s2, 16)
    b2r = jnp.repeat(b2, 16)
    w_comb = (p["fc1_w"] @ w2_mat) * s2r[None, :]             # (110, 3072)
    sh_comb = (p["fc1_b"] @ w2_mat) * s2r + b2r
    w_comb = jnp.pad(w_comb, ((0, 128 - 110), (0, 0)))        # K: 110 -> 128
    prep["w_s1"] = w_comb.astype(jnp.bfloat16)
    prep["sh_s1"] = sh_comb.reshape(1, -1).astype(jnp.float32)

    # --- tconv3 / tconv4 (BN folded), tconv5 (no BN, N padded to 128 for lane density)
    s3, b3 = bn_fold(p["bn3_g"], p["bn3_b"], p["bn3_m"], p["bn3_v"])
    prep["w_s3"], prep["sh_s3"] = _subpixel_weight_and_shift(p["w3"], s3, b3)
    s4, b4 = bn_fold(p["bn4_g"], p["bn4_b"], p["bn4_m"], p["bn4_v"])
    prep["w_s4"], prep["sh_s4"] = _subpixel_weight_and_shift(p["w4"], s4, b4)
    prep["w_s5"], prep["sh_s5"] = _subpixel_weight_and_shift(
        p["w5"], jnp.ones((3,), jnp.float32), jnp.zeros((3,), jnp.float32),
        pad_n_to=128)
    return prep


# ----------------------------------------------------------------------------
# Sub-pixel transposed-conv stage (k=4, stride=2, pad=1) + folded BN + activation
# ----------------------------------------------------------------------------
def tconv_stage_subpixel(x_nhwc, w_all, shift, activation, Cout,
                         out_dtype=jnp.bfloat16):
    """x_nhwc: (B, H, W, Cin).  Returns NHWC (B, 2H, 2W, Cout)."""
    B, H, W, Cin = x_nhwc.shape
    xp = jnp.pad(x_nhwc, ((0, 0), (1, 1), (1, 1), (0, 0)))    # 1-pixel zero ring
    Hp, Wp = H + 1, W + 1
    # 4-tap im2col over (H+1)x(W+1) anchor positions; tap order (a, b) matches W rows.
    taps = [xp[:, a:a + Hp, b:b + Wp, :] for a in range(2) for b in range(2)]
    X = jnp.concatenate(taps, axis=-1).reshape(B * Hp * Wp, 4 * Cin)
    Y = fused_matmul(X, w_all, shift, activation, out_dtype=out_dtype)
    Y = Y.reshape(B, Hp, Wp, -1)
    # Phase extraction + pixel shuffle: out[2m+py, 2n+px] = phase(py,px)[m, n].
    EE = Y[:, 0:H, 0:W, 0 * Cout:1 * Cout]
    EO = Y[:, 0:H, 1:Wp, 1 * Cout:2 * Cout]
    OE = Y[:, 1:Hp, 0:W, 2 * Cout:3 * Cout]
    OO = Y[:, 1:Hp, 1:Wp, 3 * Cout:4 * Cout]
    row_e = jnp.stack([EE, EO], axis=3)                       # (B, H, W, 2, C)
    row_o = jnp.stack([OE, OO], axis=3)
    out = jnp.stack([row_e, row_o], axis=2)                   # (B, H, 2, W, 2, C)
    return out.reshape(B, 2 * H, 2 * W, Cout)


# ----------------------------------------------------------------------------
# Generator forward (jitted; takes prepared params)
# ----------------------------------------------------------------------------
def netG_forward(x_nchw, prep):
    B = x_nchw.shape[0]
    x = x_nchw.reshape(B, -1)                                  # (B, 110) == view(-1, nz)
    x = jnp.pad(x, ((0, 0), (0, 128 - 110)))                   # align K to 128

    # fc1 + tconv2 + BN2 + ReLU fused into one GEMM -> (B, 192, 4, 4)
    t2 = fused_matmul(x, prep["w_s1"], prep["sh_s1"], "relu")  # (B, 3072), cols (co,ky,kx)
    t2 = t2.reshape(B, 192, 4, 4).transpose(0, 2, 3, 1)        # NHWC (B, 4, 4, 192)

    # tconv3: 192 -> 96, 4x4 -> 8x8
    t3 = tconv_stage_subpixel(t2, prep["w_s3"], prep["sh_s3"], "relu", 96)
    # tconv4: 96 -> 48, 8x8 -> 16x16
    t4 = tconv_stage_subpixel(t3, prep["w_s4"], prep["sh_s4"], "relu", 48)
    # tconv5: 48 -> 3, 16x16 -> 32x32, Tanh (no BN); final output in f32
    t5 = tconv_stage_subpixel(t4, prep["w_s5"], prep["sh_s5"], "tanh", 3,
                              out_dtype=jnp.float32)

    return t5.transpose(0, 3, 1, 2)                            # NHWC -> NCHW (B, 3, 32, 32)


# ----------------------------------------------------------------------------
# Pure-JAX f32 reference (for correctness validation only; no Pallas)
# ----------------------------------------------------------------------------
def _conv_transpose_ref(x_nchw, w, stride, pad):
    """PyTorch ConvTranspose2d semantics. w: (Cin, Cout, k, k)."""
    k = w.shape[2]
    w_conv = jnp.flip(w, axis=(2, 3)).transpose(1, 0, 2, 3)   # (Cout, Cin, k, k)
    return jax.lax.conv_general_dilated(
        x_nchw, w_conv, window_strides=(1, 1),
        padding=[(k - 1 - pad, k - 1 - pad)] * 2,
        lhs_dilation=(stride, stride),
        dimension_numbers=("NCHW", "OIHW", "NCHW"))


def _bn_ref(y, g, b, m, v, eps=1e-5):
    inv = g / jnp.sqrt(v + eps)
    return (y - m[None, :, None, None]) * inv[None, :, None, None] + b[None, :, None, None]


def netG_forward_ref(x_nchw, p):
    B = x_nchw.shape[0]
    x = x_nchw.reshape(B, -1)
    fc1 = x @ p["fc1_w"] + p["fc1_b"]
    t = fc1.reshape(B, 384, 1, 1)
    t = _conv_transpose_ref(t, p["w2"], 1, 0)
    t = jax.nn.relu(_bn_ref(t, p["bn2_g"], p["bn2_b"], p["bn2_m"], p["bn2_v"]))
    t = _conv_transpose_ref(t, p["w3"], 2, 1)
    t = jax.nn.relu(_bn_ref(t, p["bn3_g"], p["bn3_b"], p["bn3_m"], p["bn3_v"]))
    t = _conv_transpose_ref(t, p["w4"], 2, 1)
    t = jax.nn.relu(_bn_ref(t, p["bn4_g"], p["bn4_b"], p["bn4_m"], p["bn4_v"]))
    t = _conv_transpose_ref(t, p["w5"], 2, 1)
    return jnp.tanh(t)


# ----------------------------------------------------------------------------
# Deterministic parameter init (synthetic; shapes from the torch __init__)
# ----------------------------------------------------------------------------
def init_params(key):
    ks = jax.random.split(key, 16)
    p = {}
    p["fc1_w"] = 0.05 * jax.random.normal(ks[0], (110, 384), jnp.float32)
    p["fc1_b"] = 0.05 * jax.random.normal(ks[1], (384,), jnp.float32)
    p["w2"] = 0.05 * jax.random.normal(ks[2], (384, 192, 4, 4), jnp.float32)
    p["w3"] = 0.05 * jax.random.normal(ks[3], (192, 96, 4, 4), jnp.float32)
    p["w4"] = 0.05 * jax.random.normal(ks[4], (96, 48, 4, 4), jnp.float32)
    p["w5"] = 0.05 * jax.random.normal(ks[5], (48, 3, 4, 4), jnp.float32)
    for i, (name, c) in enumerate([("bn2", 192), ("bn3", 96), ("bn4", 48)]):
        p[f"{name}_g"] = 1.0 + 0.1 * jax.random.normal(ks[6 + i], (c,), jnp.float32)
        p[f"{name}_b"] = 0.1 * jax.random.normal(ks[9 + i], (c,), jnp.float32)
        p[f"{name}_m"] = jnp.zeros((c,), jnp.float32)   # running_mean
        p[f"{name}_v"] = jnp.ones((c,), jnp.float32)    # running_var
    return p


if __name__ == "__main__":
    key = jax.random.PRNGKey(0)
    pkey, xkey = jax.random.split(key)
    params = init_params(pkey)
    prep = prepare_params(params)        # one-time weight prep, outside the jit

    batch, nz = 2, 110
    x = jax.random.normal(xkey, (batch, nz, 1, 1), jnp.float32)  # NCHW latent

    fwd = jax.jit(netG_forward)
    out = fwd(x, prep)
    jax.block_until_ready(out)

    assert out.shape == (batch, 3, 32, 32)
    assert out.dtype == jnp.float32
    assert bool(jnp.all(jnp.isfinite(out)))

    # Validate against the pure-JAX f32 reference (bf16 operands -> loose tolerance).
    ref = jax.jit(netG_forward_ref)(x, params)
    jax.block_until_ready(ref)
    max_err = float(jnp.max(jnp.abs(out - ref)))
    assert max_err < 0.1, f"max abs error vs reference too large: {max_err}"

    print("KERNEL_OK")
</pallas_src>

<mosaic_0001>
module attributes {stable_mosaic.version = 11 : i64} {
  func.func @_fused_matmul_kernel(%arg0: i32, %arg1: memref<8x128xbf16, #tpu.memory_space<vmem>>, %arg2: memref<128x3072xbf16, #tpu.memory_space<vmem>>, %arg3: memref<1x3072xf32, #tpu.memory_space<vmem>>, %arg4: memref<8x3072xbf16, #tpu.memory_space<vmem>>) attributes {dimension_semantics = [#tpu.dimension_semantics<parallel>], iteration_bounds = array<i64: 1>, scalar_prefetch = 0 : i64, scratch_operands = 0 : i64, tpu.core_type = #tpu.core_type<tc>, window_params = [{transform_indices = @transform_0, window_bounds = array<i64: 8, 128>}, {pipeline_mode = #tpu.pipeline_mode<synchronous>, transform_indices = @transform_1, window_bounds = array<i64: 128, 3072>}, {pipeline_mode = #tpu.pipeline_mode<synchronous>, transform_indices = @transform_2, window_bounds = array<i64: 1, 3072>}, {transform_indices = @transform_3, window_bounds = array<i64: 8, 3072>}]} {
    %c0 = arith.constant 0 : index
    %c0_0 = arith.constant 0 : index
    %0 = vector.load %arg1[%c0, %c0_0] : memref<8x128xbf16, #tpu.memory_space<vmem>>, vector<8x128xbf16>
    %c0_1 = arith.constant 0 : index
    %c0_2 = arith.constant 0 : index
    %1 = vector.load %arg2[%c0_1, %c0_2] : memref<128x3072xbf16, #tpu.memory_space<vmem>>, vector<128x3072xbf16>
    %cst = arith.constant dense<0.000000e+00> : vector<8x3072xf32>
    %2 = tpu.matmul %0, %1, %cst {dimension_numbers = #tpu.dot_dimension_numbers<[1], [0], [0], [1], [0, 0, 1, 1], [], []>} : vector<8x128xbf16>, vector<128x3072xbf16>, vector<8x3072xf32> -> vector<8x3072xf32>
    %c0_3 = arith.constant 0 : index
    %c0_4 = arith.constant 0 : index
    %3 = vector.load %arg3[%c0_3, %c0_4] : memref<1x3072xf32, #tpu.memory_space<vmem>>, vector<1x3072xf32>
    %4 = vector.broadcast %3 : vector<1x3072xf32> to vector<8x3072xf32>
    %5 = arith.addf %2, %4 : vector<8x3072xf32>
    %cst_5 = arith.constant 0.000000e+00 : f32
    %6 = vector.broadcast %cst_5 : f32 to vector<8x3072xf32>
    %7 = arith.maximumf %5, %6 : vector<8x3072xf32>
    %8 = arith.truncf %7 : vector<8x3072xf32> to vector<8x3072xbf16>
    %c0_6 = arith.constant 0 : index
    %c0_7 = arith.constant 0 : index
    %9 = vector.load %arg4[%c0_6, %c0_7] : memref<8x3072xbf16, #tpu.memory_space<vmem>>, vector<8x3072xbf16>
    tpu.vector_store %arg4[%c0_6, %c0_7], %8 {strides = array<i32>} : memref<8x3072xbf16, #tpu.memory_space<vmem>>, vector<8x3072xbf16>,
    return
  }
  func.func @transform_0(%arg0: i32) -> (i32, i32) {
    %c0_i32 = arith.constant 0 : i32
    %c0_i32_0 = arith.constant 0 : i32
    return %arg0, %c0_i32 : i32, i32
  }
  func.func @transform_1(%arg0: i32) -> (i32, i32) {
    %c0_i32 = arith.constant 0 : i32
    %c0_i32_0 = arith.constant 0 : i32
    %c0_i32_1 = arith.constant 0 : i32
    return %c0_i32, %c0_i32_0 : i32, i32
  }
  func.func @transform_2(%arg0: i32) -> (i32, i32) {
    %c0_i32 = arith.constant 0 : i32
    %c0_i32_0 = arith.constant 0 : i32
    %c0_i32_1 = arith.constant 0 : i32
    return %c0_i32, %c0_i32_0 : i32, i32
  }
  func.func @transform_3(%arg0: i32) -> (i32, i32) {
    %c0_i32 = arith.constant 0 : i32
    %c0_i32_0 = arith.constant 0 : i32
    return %arg0, %c0_i32 : i32, i32
  }
}

module attributes {stable_mosaic.version = 11 : i64} {
  func.func @_fused_matmul_kernel(%arg0: i32, %arg1: memref<56x768xbf16, #tpu.memory_space<vmem>>, %arg2: memref<768x384xbf16, #tpu.memory_space<vmem>>, %arg3: memref<1x384xf32, #tpu.memory_space<vmem>>, %arg4: memref<56x384xbf16, #tpu.memory_space<vmem>>) attributes {dimension_semantics = [#tpu.dimension_semantics<parallel>], iteration_bounds = array<i64: 1>, scalar_prefetch = 0 : i64, scratch_operands = 0 : i64, tpu.core_type = #tpu.core_type<tc>, window_params = [{transform_indices = @transform_0, window_bounds = array<i64: 56, 768>}, {pipeline_mode = #tpu.pipeline_mode<synchronous>, transform_indices = @transform_1, window_bounds = array<i64: 768, 384>}, {pipeline_mode = #tpu.pipeline_mode<synchronous>, transform_indices = @transform_2, window_bounds = array<i64: 1, 384>}, {transform_indices = @transform_3, window_bounds = array<i64: 56, 384>}]} {
    %c0 = arith.constant 0 : index
    %c0_0 = arith.constant 0 : index
    %0 = vector.load %arg1[%c0, %c0_0] : memref<56x768xbf16, #tpu.memory_space<vmem>>, vector<56x768xbf16>
    %c0_1 = arith.constant 0 : index
    %c0_2 = arith.constant 0 : index
    %1 = vector.load %arg2[%c0_1, %c0_2] : memref<768x384xbf16, #tpu.memory_space<vmem>>, vector<768x384xbf16>
    %cst = arith.constant dense<0.000000e+00> : vector<56x384xf32>
    %2 = tpu.matmul %0, %1, %cst {dimension_numbers = #tpu.dot_dimension_numbers<[1], [0], [0], [1], [0, 0, 1, 1], [], []>} : vector<56x768xbf16>, vector<768x384xbf16>, vector<56x384xf32> -> vector<56x384xf32>
    %c0_3 = arith.constant 0 : index
    %c0_4 = arith.constant 0 : index
    %3 = vector.load %arg3[%c0_3, %c0_4] : memref<1x384xf32, #tpu.memory_space<vmem>>, vector<1x384xf32>
    %4 = vector.broadcast %3 : vector<1x384xf32> to vector<56x384xf32>
    %5 = arith.addf %2, %4 : vector<56x384xf32>
    %cst_5 = arith.constant 0.000000e+00 : f32
    %6 = vector.broadcast %cst_5 : f32 to vector<56x384xf32>
    %7 = arith.maximumf %5, %6 : vector<56x384xf32>
    %8 = arith.truncf %7 : vector<56x384xf32> to vector<56x384xbf16>
    %c0_6 = arith.constant 0 : index
    %c0_7 = arith.constant 0 : index
    %9 = vector.load %arg4[%c0_6, %c0_7] : memref<56x384xbf16, #tpu.memory_space<vmem>>, vector<56x384xbf16>
    tpu.vector_store %arg4[%c0_6, %c0_7], %8 {strides = array<i32>} : memref<56x384xbf16, #tpu.memory_space<vmem>>, vector<56x384xbf16>,
    return
  }
  func.func @transform_0(%arg0: i32) -> (i32, i32) {
    %c0_i32 = arith.constant 0 : i32
    %c0_i32_0 = arith.constant 0 : i32
    return %arg0, %c0_i32 : i32, i32
  }
  func.func @transform_1(%arg0: i32) -> (i32, i32) {
    %c0_i32 = arith.constant 0 : i32
    %c0_i32_0 = arith.constant 0 : i32
    %c0_i32_1 = arith.constant 0 : i32
    return %c0_i32, %c0_i32_0 : i32, i32
  }
  func.func @transform_2(%arg0: i32) -> (i32, i32) {
    %c0_i32 = arith.constant 0 : i32
    %c0_i32_0 = arith.constant 0 : i32
    %c0_i32_1 = arith.constant 0 : i32
    return %c0_i32, %c0_i32_0 : i32, i32
  }
  func.func @transform_3(%arg0: i32) -> (i32, i32) {
    %c0_i32 = arith.constant 0 : i32
    %c0_i32_0 = arith.constant 0 : i32
    return %arg0, %c0_i32 : i32, i32
  }
}

module attributes {stable_mosaic.version = 11 : i64} {
  func.func @_fused_matmul_kernel(%arg0: i32, %arg1: memref<168x384xbf16, #tpu.memory_space<vmem>>, %arg2: memref<384x192xbf16, #tpu.memory_space<vmem>>, %arg3: memref<1x192xf32, #tpu.memory_space<vmem>>, %arg4: memref<168x192xbf16, #tpu.memory_space<vmem>>) attributes {dimension_semantics = [#tpu.dimension_semantics<parallel>], iteration_bounds = array<i64: 1>, scalar_prefetch = 0 : i64, scratch_operands = 0 : i64, tpu.core_type = #tpu.core_type<tc>, window_params = [{transform_indices = @transform_0, window_bounds = array<i64: 168, 384>}, {pipeline_mode = #tpu.pipeline_mode<synchronous>, transform_indices = @transform_1, window_bounds = array<i64: 384, 192>}, {pipeline_mode = #tpu.pipeline_mode<synchronous>, transform_indices = @transform_2, window_bounds = array<i64: 1, 192>}, {transform_indices = @transform_3, window_bounds = array<i64: 168, 192>}]} {
    %c0 = arith.constant 0 : index
    %c0_0 = arith.constant 0 : index
    %0 = vector.load %arg1[%c0, %c0_0] : memref<168x384xbf16, #tpu.memory_space<vmem>>, vector<168x384xbf16>
    %c0_1 = arith.constant 0 : index
    %c0_2 = arith.constant 0 : index
    %1 = vector.load %arg2[%c0_1, %c0_2] : memref<384x192xbf16, #tpu.memory_space<vmem>>, vector<384x192xbf16>
    %cst = arith.constant dense<0.000000e+00> : vector<168x192xf32>
    %2 = tpu.matmul %0, %1, %cst {dimension_numbers = #tpu.dot_dimension_numbers<[1], [0], [0], [1], [0, 0, 1, 1], [], []>} : vector<168x384xbf16>, vector<384x192xbf16>, vector<168x192xf32> -> vector<168x192xf32>
    %c0_3 = arith.constant 0 : index
    %c0_4 = arith.constant 0 : index
    %3 = vector.load %arg3[%c0_3, %c0_4] : memref<1x192xf32, #tpu.memory_space<vmem>>, vector<1x192xf32>
    %4 = vector.broadcast %3 : vector<1x192xf32> to vector<168x192xf32>
    %5 = arith.addf %2, %4 : vector<168x192xf32>
    %cst_5 = arith.constant 0.000000e+00 : f32
    %6 = vector.broadcast %cst_5 : f32 to vector<168x192xf32>
    %7 = arith.maximumf %5, %6 : vector<168x192xf32>
    %8 = arith.truncf %7 : vector<168x192xf32> to vector<168x192xbf16>
    %c0_6 = arith.constant 0 : index
    %c0_7 = arith.constant 0 : index
    %9 = vector.load %arg4[%c0_6, %c0_7] : memref<168x192xbf16, #tpu.memory_space<vmem>>, vector<168x192xbf16>
    tpu.vector_store %arg4[%c0_6, %c0_7], %8 {strides = array<i32>} : memref<168x192xbf16, #tpu.memory_space<vmem>>, vector<168x192xbf16>,
    return
  }
  func.func @transform_0(%arg0: i32) -> (i32, i32) {
    %c0_i32 = arith.constant 0 : i32
    %c0_i32_0 = arith.constant 0 : i32
    return %arg0, %c0_i32 : i32, i32
  }
  func.func @transform_1(%arg0: i32) -> (i32, i32) {
    %c0_i32 = arith.constant 0 : i32
    %c0_i32_0 = arith.constant 0 : i32
    %c0_i32_1 = arith.constant 0 : i32
    return %c0_i32, %c0_i32_0 : i32, i32
  }
  func.func @transform_2(%arg0: i32) -> (i32, i32) {
    %c0_i32 = arith.constant 0 : i32
    %c0_i32_0 = arith.constant 0 : i32
    %c0_i32_1 = arith.constant 0 : i32
    return %c0_i32, %c0_i32_0 : i32, i32
  }
  func.func @transform_3(%arg0: i32) -> (i32, i32) {
    %c0_i32 = arith.constant 0 : i32
    %c0_i32_0 = arith.constant 0 : i32
    return %arg0, %c0_i32 : i32, i32
  }
}

module attributes {stable_mosaic.version = 11 : i64} {
  func.func @_fused_matmul_kernel(%arg0: i32, %arg1: memref<296x192xbf16, #tpu.memory_space<vmem>>, %arg2: memref<192x128xbf16, #tpu.memory_space<vmem>>, %arg3: memref<1x128xf32, #tpu.memory_space<vmem>>, %arg4: memref<296x128xf32, #tpu.memory_space<vmem>>) attributes {dimension_semantics = [#tpu.dimension_semantics<parallel>], iteration_bounds = array<i64: 2>, scalar_prefetch = 0 : i64, scratch_operands = 0 : i64, tpu.core_type = #tpu.core_type<tc>, window_params = [{transform_indices = @transform_0, window_bounds = array<i64: 296, 192>}, {pipeline_mode = #tpu.pipeline_mode<synchronous>, transform_indices = @transform_1, window_bounds = array<i64: 192, 128>}, {pipeline_mode = #tpu.pipeline_mode<synchronous>, transform_indices = @transform_2, window_bounds = array<i64: 1, 128>}, {transform_indices = @transform_3, window_bounds = array<i64: 296, 128>}]} {
    %c0 = arith.constant 0 : index
    %c0_0 = arith.constant 0 : index
    %0 = vector.load %arg1[%c0, %c0_0] : memref<296x192xbf16, #tpu.memory_space<vmem>>, vector<296x192xbf16>
    %c0_1 = arith.constant 0 : index
    %c0_2 = arith.constant 0 : index
    %1 = vector.load %arg2[%c0_1, %c0_2] : memref<192x128xbf16, #tpu.memory_space<vmem>>, vector<192x128xbf16>
    %cst = arith.constant dense<0.000000e+00> : vector<296x128xf32>
    %2 = tpu.matmul %0, %1, %cst {dimension_numbers = #tpu.dot_dimension_numbers<[1], [0], [0], [1], [0, 0, 1, 1], [], []>} : vector<296x192xbf16>, vector<192x128xbf16>, vector<296x128xf32> -> vector<296x128xf32>
    %c0_3 = arith.constant 0 : index
    %c0_4 = arith.constant 0 : index
    %3 = vector.load %arg3[%c0_3, %c0_4] : memref<1x128xf32, #tpu.memory_space<vmem>>, vector<1x128xf32>
    %4 = vector.broadcast %3 : vector<1x128xf32> to vector<296x128xf32>
    %5 = arith.addf %2, %4 : vector<296x128xf32>
    %6 = math.tanh %5 : vector<296x128xf32>
    %c0_5 = arith.constant 0 : index
    %c0_6 = arith.constant 0 : index
    %7 = vector.load %arg4[%c0_5, %c0_6] : memref<296x128xf32, #tpu.memory_space<vmem>>, vector<296x128xf32>
    tpu.vector_store %arg4[%c0_5, %c0_6], %6 {strides = array<i32>} : memref<296x128xf32, #tpu.memory_space<vmem>>, vector<296x128xf32>,
    return
  }
  func.func @transform_0(%arg0: i32) -> (i32, i32) {
    %c0_i32 = arith.constant 0 : i32
    %c0_i32_0 = arith.constant 0 : i32
    return %arg0, %c0_i32 : i32, i32
  }
  func.func @transform_1(%arg0: i32) -> (i32, i32) {
    %c0_i32 = arith.constant 0 : i32
    %c0_i32_0 = arith.constant 0 : i32
    %c0_i32_1 = arith.constant 0 : i32
    return %c0_i32, %c0_i32_0 : i32, i32
  }
  func.func @transform_2(%arg0: i32) -> (i32, i32) {
    %c0_i32 = arith.constant 0 : i32
    %c0_i32_0 = arith.constant 0 : i32
    %c0_i32_1 = arith.constant 0 : i32
    return %c0_i32, %c0_i32_0 : i32, i32
  }
  func.func @transform_3(%arg0: i32) -> (i32, i32) {
    %c0_i32 = arith.constant 0 : i32
    %c0_i32_0 = arith.constant 0 : i32
    return %arg0, %c0_i32 : i32, i32
  }
}

</mosaic_0001>

<bundles_post_ra>
// kernel: netG_forward.4
= control target key start
LH: loop header
LB: loop body
LE: loop exit
PB: predicated region body
PF: predicated region fallthrough
CT: control target
= control target key end

     0   :  { %8 = vsyncpa [#allocation3], 0  ;;  %s2744_s0 = inlined_call_operand.vmem [shape: bf16[8,128], index: 0, kind: input, shape index: {}]   ;;  %s2745_s1 = inlined_call_operand.hbm [shape: bf16[128,3072], index: 1, kind: input, shape index: {}]   ;;  %s2746_s2 = inlined_call_operand.hbm [shape: f32[1,3072], index: 2, kind: input, shape index: {}]   ;;  %s2747_s3 = inlined_call_operand.vmem [shape: bf16[8,3072], index: 3, kind: output, shape index: {}]  }
   0x1   :  { %s16_s14 = sshll.u32 %s2745_s1, 4  ;;  %s17_s14 = int_to_ptr.hbm [resolvable:$true] %s16_s14 }
   0x2   :  { %9 = vsyncpa [#allocation5], 0  ;;  %s2634_s15 = smov [#allocation2]   ;;  %s30_s19 = sshll.u32 %s2746_s2, 4  ;;  %s31_s19 = int_to_ptr.hbm [resolvable:$true] %s30_s19 }
   0x3   :  { %s18_s16 = sshll.u32 %s2634_s15, 4  ;;  %s2635_s20 = smov 1536   ;;  %s19_s16 = int_to_ptr.vmem [resolvable:$true] %s18_s16 }
   0x4   :  { %s2636_s21 = smov 96   ;;  %s2637_s22 = smov [#allocation4]  }
   0x5   :  { %24 = dma.hbm_to_vmem [thread:$0]  %s17_s14, 24576, %s19_s16, [#allocation3], %s2635_s20, %s2635_s20, %s2636_s21  }
   0x6   :  { %s32_s23 = sshll.u32 %s2637_s22, 4  ;;  %s33_s23 = int_to_ptr.vmem [resolvable:$true] %s32_s23 }
   0x7   :  { %35 = dma.hbm_to_vmem [thread:$0]  %s31_s19, 384, %s33_s23, [#allocation5]  }
   0x8   :  { %2630 = dma.done.wait [#allocation3], 24576  }
   0x9   :  { %2631 = vsyncadd [#allocation3], 4294942720 }
   0xa   :  { %2632 = dma.done.wait [#allocation5], 384  }
   0xb   :  { %2633 = vsyncadd [#allocation5], 4294966912  ;;  %v2291_v0 = vld [vmem:[#allocation2 + $0x540] sm:$0xf]  ;;  %v2553_v2 = vld [vmem:[#allocation2 + $0x544] sm:$0xf] }
   0xc   :  { %v2565_v1 = vld [vmem:[#allocation2 + $0x59c] sm:$0xf0]  ;;  %v2293_v4 = vld [vmem:[#allocation2 + $0x5a0] sm:$0xf0]  ;;  %v2299_v5 = vld [vmem:[#allocation2 + $0x548] sm:$0xf] }
   0xd   :  { %v2292_v3 = vor.u32 %v2565_v1, %v2291_v0  ;;  %v2566_v6 = vld [vmem:[#allocation2 + $0x5a4] sm:$0xf0]  ;;  %v2296_v7 = vor.u32 %v2553_v2, %v2293_v4  ;;  %v2554_v9 = vld [vmem:[#allocation2 + $0x54c] sm:$0xf]  ;;  %v2195_v11 = vld [vmem:[#allocation2 + $0x480] sm:$0xf] }
   0xe   :  { %v2300_v8 = vor.u32 %v2566_v6, %v2299_v5  ;;  %v2301_v10 = vld [vmem:[#allocation2 + $0x5a8] sm:$0xf0]  ;;  %v2541_v13 = vld [vmem:[#allocation2 + $0x4dc] sm:$0xf0]  ;;  %v2529_v14 = vld [vmem:[#allocation2 + $0x484] sm:$0xf] }
   0xf   :  { %1251 = vmatpush.bf16.msra.mxu0 %v2292_v3  ;;  %v2304_v12 = vor.u32 %v2554_v9, %v2301_v10  ;;  %v2197_v15 = vld [vmem:[#allocation2 + $0x4e0] sm:$0xf0]  ;;  %1264 = vmatpush.bf16.msra.mxu1 %v2296_v7  ;;  %v2196_v16 = vor.u32 %v2541_v13, %v2195_v11  ;;  %v2203_v18 = vld [vmem:[#allocation2 + $0x488] sm:$0xf]  ;;  %v2530_v20 = vld [vmem:[#allocation2 + $0x48c] sm:$0xf] }
  0x10   :  { %1277 = vmatpush.bf16.msra.mxu2 %v2300_v8  ;;  %v2200_v17 = vor.u32 %v2529_v14, %v2197_v15  ;;  %v2542_v19 = vld [vmem:[#allocation2 + $0x4e4] sm:$0xf0]  ;;  %v2205_v22 = vld [vmem:[#allocation2 + $0x4e8] sm:$0xf0]  ;;  %v2099_v23 = vld [vmem:[#allocation2 + $0x3c0] sm:$0xf] }
  0x11   :  { %1290 = vmatpush.bf16.msra.mxu3 %v2304_v12  ;;  %v2204_v21 = vor.u32 %v2542_v19, %v2203_v18  ;;  %v2517_v24 = vld [vmem:[#allocation2 + $0x41c] sm:$0xf0]  ;;  %v2208_v25 = vor.u32 %v2530_v20, %v2205_v22  ;;  %v2505_v26 = vld [vmem:[#allocation2 + $0x3c4] sm:$0xf]  ;;  %v2107_v28 = vld [vmem:[#allocation2 + $0x3c8] sm:$0xf] }
  0x12   :  { %v2101_v27 = vld [vmem:[#allocation2 + $0x420] sm:$0xf0]  ;;  %v2100_v29 = vor.u32 %v2517_v24, %v2099_v23  ;;  %v2518_v30 = vld [vmem:[#allocation2 + $0x424] sm:$0xf0]  ;;  %v2506_v31 = vld [vmem:[#allocation2 + $0x3cc] sm:$0xf] }
  0x13   :  { %1252 = vmatpush.bf16.msra.mxu0 %v2196_v16  ;;  %v2109_v32 = vld [vmem:[#allocation2 + $0x428] sm:$0xf0]  ;;  %1265 = vmatpush.bf16.msra.mxu1 %v2200_v17  ;;  %v2104_v33 = vor.u32 %v2505_v26, %v2101_v27  ;;  %v2108_v34 = vor.u32 %v2518_v30, %v2107_v28  ;;  %v2003_v35 = vld [vmem:[#allocation2 + $0x300] sm:$0xf]  ;;  %v2481_v37 = vld [vmem:[#allocation2 + $0x304] sm:$0xf] }
  0x14   :  { %1278 = vmatpush.bf16.msra.mxu2 %v2204_v21  ;;  %v2493_v36 = vld [vmem:[#allocation2 + $0x35c] sm:$0xf0]  ;;  %v2112_v38 = vor.u32 %v2506_v31, %v2109_v32  ;;  %v2005_v39 = vld [vmem:[#allocation2 + $0x360] sm:$0xf0]  ;;  %v2011_v40 = vld [vmem:[#allocation2 + $0x308] sm:$0xf] }
  0x15   :  { %1291 = vmatpush.bf16.msra.mxu3 %v2208_v25  ;;  %v2494_v41 = vld [vmem:[#allocation2 + $0x364] sm:$0xf0]  ;;  %v2482_v42 = vld [vmem:[#allocation2 + $0x30c] sm:$0xf]  ;;  %v2004_v44 = vor.u32 %v2493_v36, %v2003_v35  ;;  %v2008_v45 = vor.u32 %v2481_v37, %v2005_v39  ;;  %v1907_v47 = vld [vmem:[#allocation2 + $0x240] sm:$0xf] }
  0x16   :  { %v2013_v43 = vld [vmem:[#allocation2 + $0x368] sm:$0xf0]  ;;  %v2012_v46 = vor.u32 %v2494_v41, %v2011_v40  ;;  %v2469_v48 = vld [vmem:[#allocation2 + $0x29c] sm:$0xf0]  ;;  %v2457_v49 = vld [vmem:[#allocation2 + $0x244] sm:$0xf] }
  0x17   :  { %1253 = vmatpush.bf16.msra.mxu0 %v2100_v29  ;;  %1266 = vmatpush.bf16.msra.mxu1 %v2104_v33  ;;  %v2016_v50 = vor.u32 %v2482_v42, %v2013_v43  ;;  %v1909_v51 = vld [vmem:[#allocation2 + $0x2a0] sm:$0xf0]  ;;  %v1915_v52 = vld [vmem:[#allocation2 + $0x248] sm:$0xf]  ;;  %v2458_v54 = vld [vmem:[#allocation2 + $0x24c] sm:$0xf]  ;;  %v1908_v56 = vor.u32 %v2469_v48, %v1907_v47 }
  0x18   :  { %1279 = vmatpush.bf16.msra.mxu2 %v2108_v34  ;;  %v2470_v53 = vld [vmem:[#allocation2 + $0x2a4] sm:$0xf0]  ;;  %v1917_v55 = vld [vmem:[#allocation2 + $0x2a8] sm:$0xf0]  ;;  %v1912_v57 = vor.u32 %v2457_v49, %v1909_v51  ;;  %v1811_v59 = vld [vmem:[#allocation2 + $0x180] sm:$0xf] }
  0x19   :  { %1292 = vmatpush.bf16.msra.mxu3 %v2112_v38  ;;  %v1916_v58 = vor.u32 %v2470_v53, %v1915_v52  ;;  %v2445_v60 = vld [vmem:[#allocation2 + $0x1dc] sm:$0xf0]  ;;  %v2433_v61 = vld [vmem:[#allocation2 + $0x184] sm:$0xf]  ;;  %v1920_v62 = vor.u32 %v2458_v54, %v1917_v55  ;;  %v1819_v0 = vld [vmem:[#allocation2 + $0x188] sm:$0xf] }
  0x1a   :  { %v1813_v63 = vld [vmem:[#allocation2 + $0x1e0] sm:$0xf0]  ;;  %v2446_v1 = vld [vmem:[#allocation2 + $0x1e4] sm:$0xf0]  ;;  %v2434_v2 = vld [vmem:[#allocation2 + $0x18c] sm:$0xf]  ;;  %v1812_v4 = vor.u32 %v2445_v60, %v1811_v59 }
  0x1b   :  { %1254 = vmatpush.bf16.msra.mxu0 %v2004_v44  ;;  %1267 = vmatpush.bf16.msra.mxu1 %v2008_v45  ;;  %v1821_v3 = vld [vmem:[#allocation2 + $0x1e8] sm:$0xf0]  ;;  %v1816_v5 = vor.u32 %v2433_v61, %v1813_v63  ;;  %v1820_v6 = vor.u32 %v2446_v1, %v1819_v0  ;;  %v1715_v7 = vld [vmem:[#allocation2 + $0xc0] sm:$0xf]  ;;  %v2409_v9 = vld [vmem:[#allocation2 + $0xc4] sm:$0xf] }
  0x1c   :  { %1280 = vmatpush.bf16.msra.mxu2 %v2012_v46  ;;  %v2421_v8 = vld [vmem:[#allocation2 + $0x11c] sm:$0xf0]  ;;  %v1824_v10 = vor.u32 %v2434_v2, %v1821_v3  ;;  %v1717_v11 = vld [vmem:[#allocation2 + $0x120] sm:$0xf0]  ;;  %v1723_v12 = vld [vmem:[#allocation2 + $0xc8] sm:$0xf] }
  0x1d   :  { %1293 = vmatpush.bf16.msra.mxu3 %v2016_v50  ;;  %v2422_v13 = vld [vmem:[#allocation2 + $0x124] sm:$0xf0]  ;;  %v2410_v14 = vld [vmem:[#allocation2 + $0xcc] sm:$0xf]  ;;  %v1716_v16 = vor.u32 %v2421_v8, %v1715_v7  ;;  %v1619_v17 = vld [vmem:[#allocation2] sm:$0xf]  ;;  %v1720_v19 = vor.u32 %v2409_v9, %v1717_v11 }
  0x1e   :  { %v1725_v15 = vld [vmem:[#allocation2 + $0x128] sm:$0xf0]  ;;  %v2397_v18 = vld [vmem:[#allocation2 + $0x5c] sm:$0xf0]  ;;  %v1724_v20 = vor.u32 %v2422_v13, %v1723_v12  ;;  %v2385_v21 = vld [vmem:[#allocation2 + $0x4] sm:$0xf] }
  0x1f   :  { %1255 = vmatpush.bf16.msra.mxu0 %v1908_v56  ;;  %1268 = vmatpush.bf16.msra.mxu1 %v1912_v57  ;;  %v1621_v22 = vld [vmem:[#allocation2 + $0x60] sm:$0xf0]  ;;  %v1627_v23 = vld [vmem:[#allocation2 + $0x8] sm:$0xf]  ;;  %v1728_v24 = vor.u32 %v2410_v14, %v1725_v15  ;;  %v2386_v26 = vld [vmem:[#allocation2 + $0xc] sm:$0xf]  ;;  %v1620_v31 = vor.u32 %v2397_v18, %v1619_v17 }
  0x20   :  { %1281 = vmatpush.bf16.msra.mxu2 %v1916_v58  ;;  %v2398_v25 = vld [vmem:[#allocation2 + $0x64] sm:$0xf0]  ;;  %v1629_v27 = vld [vmem:[#allocation2 + $0x68] sm:$0xf0]  ;;  %v2307_v28 = vld [vmem:[#allocation2 + $0x550] sm:$0xf]  ;;  %v1624_v35 = vor.u32 %v2385_v21, %v1621_v22 }
  0x21   :  { %1294 = vmatpush.bf16.msra.mxu3 %v1920_v62  ;;  %v2567_v29 = vld [vmem:[#allocation2 + $0x5ac] sm:$0xf0]  ;;  %v2555_v30 = vld [vmem:[#allocation2 + $0x554] sm:$0xf]  ;;  %v2315_v33 = vld [vmem:[#allocation2 + $0x558] sm:$0xf]  ;;  %v1628_v36 = vor.u32 %v2398_v25, %v1627_v23  ;;  %v1632_v39 = vor.u32 %v2386_v26, %v1629_v27 }
  0x22   :  { %v2309_v32 = vld [vmem:[#allocation2 + $0x5b0] sm:$0xf0]  ;;  %v2568_v34 = vld [vmem:[#allocation2 + $0x5b4] sm:$0xf0]  ;;  %v2556_v37 = vld [vmem:[#allocation2 + $0x55c] sm:$0xf]  ;;  %v2308_v40 = vor.u32 %v2567_v29, %v2307_v28 }
  0x23   :  { %1256 = vmatpush.bf16.msra.mxu0 %v1812_v4  ;;  %1269 = vmatpush.bf16.msra.mxu1 %v1816_v5  ;;  %v2317_v38 = vld [vmem:[#allocation2 + $0x5b8] sm:$0xf0]  ;;  %v2312_v41 = vor.u32 %v2555_v30, %v2309_v32  ;;  %v2316_v42 = vor.u32 %v2568_v34, %v2315_v33  ;;  %v2211_v43 = vld [vmem:[#allocation2 + $0x490] sm:$0xf]  ;;  %v2531_v45 = vld [vmem:[#allocation2 + $0x494] sm:$0xf] }
  0x24   :  { %1282 = vmatpush.bf16.msra.mxu2 %v1820_v6  ;;  %v2543_v44 = vld [vmem:[#allocation2 + $0x4ec] sm:$0xf0]  ;;  %v2320_v46 = vor.u32 %v2556_v37, %v2317_v38  ;;  %v2213_v47 = vld [vmem:[#allocation2 + $0x4f0] sm:$0xf0]  ;;  %v2219_v48 = vld [vmem:[#allocation2 + $0x498] sm:$0xf] }
  0x25   :  { %1295 = vmatpush.bf16.msra.mxu3 %v1824_v10  ;;  %v2544_v49 = vld [vmem:[#allocation2 + $0x4f4] sm:$0xf0]  ;;  %v2532_v50 = vld [vmem:[#allocation2 + $0x49c] sm:$0xf]  ;;  %v2212_v52 = vor.u32 %v2543_v44, %v2211_v43  ;;  %v2216_v53 = vor.u32 %v2531_v45, %v2213_v47  ;;  %v2115_v55 = vld [vmem:[#allocation2 + $0x3d0] sm:$0xf] }
  0x26   :  { %v2221_v51 = vld [vmem:[#allocation2 + $0x4f8] sm:$0xf0]  ;;  %v2220_v54 = vor.u32 %v2544_v49, %v2219_v48  ;;  %v2519_v56 = vld [vmem:[#allocation2 + $0x42c] sm:$0xf0]  ;;  %v2507_v57 = vld [vmem:[#allocation2 + $0x3d4] sm:$0xf] }
  0x27   :  { %1257 = vmatpush.bf16.msra.mxu0 %v1716_v16  ;;  %1270 = vmatpush.bf16.msra.mxu1 %v1720_v19  ;;  %v2224_v58 = vor.u32 %v2532_v50, %v2221_v51  ;;  %v2117_v59 = vld [vmem:[#allocation2 + $0x430] sm:$0xf0]  ;;  %v2123_v60 = vld [vmem:[#allocation2 + $0x3d8] sm:$0xf]  ;;  %v2508_v62 = vld [vmem:[#allocation2 + $0x3dc] sm:$0xf]  ;;  %v2116_v0 = vor.u32 %v2519_v56, %v2115_v55 }
  0x28   :  { %1283 = vmatpush.bf16.msra.mxu2 %v1724_v20  ;;  %v2520_v61 = vld [vmem:[#allocation2 + $0x434] sm:$0xf0]  ;;  %v2125_v63 = vld [vmem:[#allocation2 + $0x438] sm:$0xf0]  ;;  %v2667_v1 = vld [vmem:[%s2744_s0] sm:$0xf]  ;;  %v2120_v2 = vor.u32 %v2507_v57, %v2117_v59 }
  0x29   :  { %1296 = vmatpush.bf16.msra.mxu3 %v1728_v24  ;;  %v2124_v3 = vor.u32 %v2520_v61, %v2123_v60  ;;  %v2019_v4 = vld [vmem:[#allocation2 + $0x310] sm:$0xf]  ;;  %v2483_v6 = vld [vmem:[#allocation2 + $0x314] sm:$0xf]  ;;  %v2128_v7 = vor.u32 %v2508_v62, %v2125_v63  ;;  %v2027_v9 = vld [vmem:[#allocation2 + $0x318] sm:$0xf] }
  0x2a   :  { %v2495_v5 = vld [vmem:[#allocation2 + $0x36c] sm:$0xf0]  ;;  %v2021_v8 = vld [vmem:[#allocation2 + $0x370] sm:$0xf0]  ;;  %v2496_v10 = vld [vmem:[#allocation2 + $0x374] sm:$0xf0] }
  0x2b   :  { %1258 = vmatpush.bf16.msra.mxu0 %v1620_v31  ;;  %1271 = vmatpush.bf16.msra.mxu1 %v1624_v35  ;;  %v2484_v11 = vld [vmem:[#allocation2 + $0x31c] sm:$0xf]  ;;  %v2020_v13 = vor.u32 %v2495_v5, %v2019_v4  ;;  %v2024_v14 = vor.u32 %v2483_v6, %v2021_v8  ;;  %v2028_v15 = vor.u32 %v2496_v10, %v2027_v9  ;;  %v1923_v16 = vld [vmem:[#allocation2 + $0x250] sm:$0xf]  ;;  %v2459_v18 = vld [vmem:[#allocation2 + $0x254] sm:$0xf] }
  0x2c   :  { %1284 = vmatpush.bf16.msra.mxu2 %v1628_v36  ;;  %v2029_v12 = vld [vmem:[#allocation2 + $0x378] sm:$0xf0]  ;;  %v2471_v17 = vld [vmem:[#allocation2 + $0x2ac] sm:$0xf0]  ;;  %v1925_v20 = vld [vmem:[#allocation2 + $0x2b0] sm:$0xf0] }
  0x2d   :  { %1297 = vmatpush.bf16.msra.mxu3 %v1632_v39  ;;  %v2032_v19 = vor.u32 %v2484_v11, %v2029_v12  ;;  %v1931_v21 = vld [vmem:[#allocation2 + $0x258] sm:$0xf]  ;;  %v2460_v23 = vld [vmem:[#allocation2 + $0x25c] sm:$0xf]  ;;  %v1924_v25 = vor.u32 %v2471_v17, %v1923_v16  ;;  %v1928_v26 = vor.u32 %v2459_v18, %v1925_v20  ;;  %v1827_v28 = vld [vmem:[#allocation2 + $0x190] sm:$0xf] }
  0x2e   :  { %1259 = vmatmul.bf16.vlgmr.msra.gmra.mxu0 %v2667_v1  ;;  %1272 = vmatmul.bf16.vlgmr.msra.gmra.mxu1 %v2667_v1  ;;  %v2472_v22 = vld [vmem:[#allocation2 + $0x2b4] sm:$0xf0]  ;;  %v1933_v24 = vld [vmem:[#allocation2 + $0x2b8] sm:$0xf0]  ;;  %v2447_v29 = vld [vmem:[#allocation2 + $0x1ec] sm:$0xf0] }
  0x2f   :  { %1303 = vmatpush.bf16.msrb.mxu0 %v2308_v40  ;;  %1316 = vmatpush.bf16.msrb.mxu1 %v2312_v41  ;;  %v1932_v27 = vor.u32 %v2472_v22, %v1931_v21  ;;  %v2435_v30 = vld [vmem:[#allocation2 + $0x194] sm:$0xf]  ;;  %v1936_v31 = vor.u32 %v2460_v23, %v1933_v24  ;;  %v1835_v33 = vld [vmem:[#allocation2 + $0x198] sm:$0xf]  ;;  %v2436_v35 = vld [vmem:[#allocation2 + $0x19c] sm:$0xf]  ;;  %v1828_v37 = vor.u32 %v2447_v29, %v1827_v28 }
  0x30   :  { %1329 = vmatpush.bf16.msrb.mxu2 %v2316_v42  ;;  %1298 = vmatmul.bf16.vlgmr.msra.gmra.mxu3 %v2667_v1  ;;  %v1829_v32 = vld [vmem:[#allocation2 + $0x1f0] sm:$0xf0]  ;;  %v2448_v34 = vld [vmem:[#allocation2 + $0x1f4] sm:$0xf0]  ;;  %v1837_v36 = vld [vmem:[#allocation2 + $0x1f8] sm:$0xf0] }
  0x31   :  { %1342 = vmatpush.bf16.msrb.mxu3 %v2320_v46  ;;  %1285 = vmatmul.bf16.vlgmr.msra.gmra.mxu2 %v2667_v1  ;;  %v1832_v38 = vor.u32 %v2435_v30, %v1829_v32  ;;  %v1836_v39 = vor.u32 %v2448_v34, %v1835_v33  ;;  %v1731_v40 = vld [vmem:[#allocation2 + $0xd0] sm:$0xf]  ;;  %v2411_v42 = vld [vmem:[#allocation2 + $0xd4] sm:$0xf]  ;;  %v1840_v43 = vor.u32 %v2436_v35, %v1837_v36  ;;  %v1739_v45 = vld [vmem:[#allocation2 + $0xd8] sm:$0xf] }
  0x32   :  { %v2423_v41 = vld [vmem:[#allocation2 + $0x12c] sm:$0xf0]  ;;  %v1733_v44 = vld [vmem:[#allocation2 + $0x130] sm:$0xf0]  ;;  %v2424_v46 = vld [vmem:[#allocation2 + $0x134] sm:$0xf0] }
  0x33   :  { %1304 = vmatpush.bf16.msrb.mxu0 %v2212_v52  ;;  %1317 = vmatpush.bf16.msrb.mxu1 %v2216_v53  ;;  %v2412_v47 = vld [vmem:[#allocation2 + $0xdc] sm:$0xf]  ;;  %v1732_v49 = vor.u32 %v2423_v41, %v1731_v40  ;;  %v1635_v50 = vld [vmem:[#allocation2 + $0x10] sm:$0xf]  ;;  %v1736_v52 = vor.u32 %v2411_v42, %v1733_v44  ;;  %v1740_v53 = vor.u32 %v2424_v46, %v1739_v45  ;;  %v1637_v55 = vld [vmem:[#allocation2 + $0x70] sm:$0xf0] }
  0x34   :  { %1330 = vmatpush.bf16.msrb.mxu2 %v2220_v54  ;;  %v1741_v48 = vld [vmem:[#allocation2 + $0x138] sm:$0xf0]  ;;  %v2399_v51 = vld [vmem:[#allocation2 + $0x6c] sm:$0xf0]  ;;  %v2387_v54 = vld [vmem:[#allocation2 + $0x14] sm:$0xf] }
  0x35   :  { %1343 = vmatpush.bf16.msrb.mxu3 %v2224_v58  ;;  %v1643_v56 = vld [vmem:[#allocation2 + $0x18] sm:$0xf]  ;;  %v1744_v57 = vor.u32 %v2412_v47, %v1741_v48  ;;  %v2388_v59 = vld [vmem:[#allocation2 + $0x1c] sm:$0xf]  ;;  %v2323_v61 = vld [vmem:[#allocation2 + $0x560] sm:$0xf]  ;;  %v1640_v5 = vor.u32 %v2387_v54, %v1637_v55 }
  0x36   :  { %v2400_v58 = vld [vmem:[#allocation2 + $0x74] sm:$0xf0]  ;;  %v1645_v60 = vld [vmem:[#allocation2 + $0x78] sm:$0xf0]  ;;  %v2569_v62 = vld [vmem:[#allocation2 + $0x5bc] sm:$0xf0] }
  0x37   :  { %1305 = vmatpush.bf16.msrb.mxu0 %v2116_v0  ;;  %1318 = vmatpush.bf16.msrb.mxu1 %v2120_v2  ;;  %v2557_v63 = vld [vmem:[#allocation2 + $0x564] sm:$0xf]  ;;  %v1636_v0 = vor.u32 %v2399_v51, %v1635_v50  ;;  %v2570_v4 = vld [vmem:[#allocation2 + $0x5c4] sm:$0xf0]  ;;  %v1644_v6 = vor.u32 %v2400_v58, %v1643_v56  ;;  %v2333_v8 = vld [vmem:[#allocation2 + $0x5c8] sm:$0xf0]  ;;  %v1648_v9 = vor.u32 %v2388_v59, %v1645_v60 }
  0x38   :  { %1331 = vmatpush.bf16.msrb.mxu2 %v2124_v3  ;;  %v2325_v2 = vld [vmem:[#allocation2 + $0x5c0] sm:$0xf0]  ;;  %v2331_v3 = vld [vmem:[#allocation2 + $0x568] sm:$0xf]  ;;  %v2324_v10 = vor.u32 %v2569_v62, %v2323_v61  ;;  %v2534_v20 = vld [vmem:[#allocation2 + $0x4ac] sm:$0xf] }
  0x39   :  { %1344 = vmatpush.bf16.msrb.mxu3 %v2128_v7  ;;  %v2558_v7 = vld [vmem:[#allocation2 + $0x56c] sm:$0xf]  ;;  %v2328_v11 = vor.u32 %v2557_v63, %v2325_v2  ;;  %v2332_v12 = vor.u32 %v2570_v4, %v2331_v3  ;;  %v2229_v17 = vld [vmem:[#allocation2 + $0x500] sm:$0xf0]  ;;  %v2235_v18 = vld [vmem:[#allocation2 + $0x4a8] sm:$0xf] }
  0x3a   :  { %v2336_v16 = vor.u32 %v2558_v7, %v2333_v8  ;;  %v2237_v21 = vld [vmem:[#allocation2 + $0x508] sm:$0xf0]  ;;  %v2133_v29 = vld [vmem:[#allocation2 + $0x440] sm:$0xf0]  ;;  %v2139_v30 = vld [vmem:[#allocation2 + $0x3e8] sm:$0xf] }
  0x3b   :  { %1306 = vmatpush.bf16.msrb.mxu0 %v2020_v13  ;;  %1319 = vmatpush.bf16.msrb.mxu1 %v2024_v14  ;;  %v2227_v13 = vld [vmem:[#allocation2 + $0x4a0] sm:$0xf]  ;;  %v2240_v28 = vor.u32 %v2534_v20, %v2237_v21  ;;  %v2510_v32 = vld [vmem:[#allocation2 + $0x3ec] sm:$0xf]  ;;  %v2037_v41 = vld [vmem:[#allocation2 + $0x380] sm:$0xf0] }
  0x3c   :  { %1332 = vmatpush.bf16.msrb.mxu2 %v2028_v15  ;;  %v2545_v14 = vld [vmem:[#allocation2 + $0x4fc] sm:$0xf0]  ;;  %v2533_v15 = vld [vmem:[#allocation2 + $0x4a4] sm:$0xf]  ;;  %v2141_v33 = vld [vmem:[#allocation2 + $0x448] sm:$0xf0] }
  0x3d   :  { %1345 = vmatpush.bf16.msrb.mxu3 %v2032_v19  ;;  %v2546_v19 = vld [vmem:[#allocation2 + $0x504] sm:$0xf0]  ;;  %v2228_v22 = vor.u32 %v2545_v14, %v2227_v13  ;;  %v2232_v23 = vor.u32 %v2533_v15, %v2229_v17  ;;  %v2144_v40 = vor.u32 %v2510_v32, %v2141_v33  ;;  %v2486_v44 = vld [vmem:[#allocation2 + $0x32c] sm:$0xf]  ;;  %v2473_v50 = vld [vmem:[#allocation2 + $0x2bc] sm:$0xf0] }
  0x3e   :  { %v2236_v24 = vor.u32 %v2546_v19, %v2235_v18  ;;  %v2043_v42 = vld [vmem:[#allocation2 + $0x328] sm:$0xf]  ;;  %v2045_v45 = vld [vmem:[#allocation2 + $0x388] sm:$0xf0]  ;;  %v2461_v51 = vld [vmem:[#allocation2 + $0x264] sm:$0xf] }
  0x3f   :  { %1307 = vmatpush.bf16.msrb.mxu0 %v1924_v25  ;;  %1320 = vmatpush.bf16.msrb.mxu1 %v1928_v26  ;;  %v2131_v25 = vld [vmem:[#allocation2 + $0x3e0] sm:$0xf]  ;;  %v1947_v54 = vld [vmem:[#allocation2 + $0x268] sm:$0xf]  ;;  %v2462_v56 = vld [vmem:[#allocation2 + $0x26c] sm:$0xf] }
  0x40   :  { %1333 = vmatpush.bf16.msrb.mxu2 %v1932_v27  ;;  %v2521_v26 = vld [vmem:[#allocation2 + $0x43c] sm:$0xf0]  ;;  %v2509_v27 = vld [vmem:[#allocation2 + $0x3e4] sm:$0xf]  ;;  %v2474_v55 = vld [vmem:[#allocation2 + $0x2c4] sm:$0xf0] }
  0x41   :  { %1346 = vmatpush.bf16.msrb.mxu3 %v1936_v31  ;;  %v2522_v31 = vld [vmem:[#allocation2 + $0x444] sm:$0xf0]  ;;  %v2132_v34 = vor.u32 %v2521_v26, %v2131_v25  ;;  %v2136_v35 = vor.u32 %v2509_v27, %v2133_v29  ;;  %v1948_v60 = vor.u32 %v2474_v55, %v1947_v54  ;;  %v1843_v61 = vld [vmem:[#allocation2 + $0x1a0] sm:$0xf]  ;;  %v2437_v63 = vld [vmem:[#allocation2 + $0x1a4] sm:$0xf] }
  0x42   :  { %v2140_v36 = vor.u32 %v2522_v31, %v2139_v30  ;;  %v2449_v62 = vld [vmem:[#allocation2 + $0x1fc] sm:$0xf0]  ;;  %v1845_v2 = vld [vmem:[#allocation2 + $0x200] sm:$0xf0]  ;;  %v1851_v3 = vld [vmem:[#allocation2 + $0x1a8] sm:$0xf] }
  0x43   :  { %1308 = vmatpush.bf16.msrb.mxu0 %v1828_v37  ;;  %1321 = vmatpush.bf16.msrb.mxu1 %v1832_v38  ;;  %v2035_v37 = vld [vmem:[#allocation2 + $0x320] sm:$0xf]  ;;  %v2450_v4 = vld [vmem:[#allocation2 + $0x204] sm:$0xf0]  ;;  %v1844_v7 = vor.u32 %v2449_v62, %v1843_v61  ;;  %v1848_v8 = vor.u32 %v2437_v63, %v1845_v2  ;;  %v1749_v14 = vld [vmem:[#allocation2 + $0x140] sm:$0xf0] }
  0x44   :  { %1334 = vmatpush.bf16.msrb.mxu2 %v1836_v39  ;;  %v2497_v38 = vld [vmem:[#allocation2 + $0x37c] sm:$0xf0]  ;;  %v2485_v39 = vld [vmem:[#allocation2 + $0x324] sm:$0xf]  ;;  %v1755_v15 = vld [vmem:[#allocation2 + $0xe8] sm:$0xf] }
  0x45   :  { %1347 = vmatpush.bf16.msrb.mxu3 %v1840_v43  ;;  %v2498_v43 = vld [vmem:[#allocation2 + $0x384] sm:$0xf0]  ;;  %v2036_v46 = vor.u32 %v2497_v38, %v2035_v37  ;;  %v2040_v47 = vor.u32 %v2485_v39, %v2037_v41  ;;  %v2414_v17 = vld [vmem:[#allocation2 + $0xec] sm:$0xf]  ;;  %v1651_v20 = vld [vmem:[#allocation2 + $0x20] sm:$0xf] }
  0x46   :  { %v2044_v48 = vor.u32 %v2498_v43, %v2043_v42  ;;  %v1757_v18 = vld [vmem:[#allocation2 + $0x148] sm:$0xf0]  ;;  %v2401_v21 = vld [vmem:[#allocation2 + $0x7c] sm:$0xf0]  ;;  %v1653_v25 = vld [vmem:[#allocation2 + $0x80] sm:$0xf0] }
  0x47   :  { %1309 = vmatpush.bf16.msrb.mxu0 %v1732_v49  ;;  %1322 = vmatpush.bf16.msrb.mxu1 %v1736_v52  ;;  %v1939_v49 = vld [vmem:[#allocation2 + $0x260] sm:$0xf]  ;;  %v2048_v52 = vor.u32 %v2486_v44, %v2045_v45  ;;  %v1659_v26 = vld [vmem:[#allocation2 + $0x28] sm:$0xf]  ;;  %v1760_v27 = vor.u32 %v2414_v17, %v1757_v18  ;;  %v2390_v29 = vld [vmem:[#allocation2 + $0x2c] sm:$0xf] }
  0x48   :  { %1335 = vmatpush.bf16.msrb.mxu2 %v1740_v53  ;;  %v1941_v53 = vld [vmem:[#allocation2 + $0x2c0] sm:$0xf0]  ;;  %v1940_v58 = vor.u32 %v2473_v50, %v1939_v49  ;;  %v1661_v30 = vld [vmem:[#allocation2 + $0x88] sm:$0xf0]  ;;  %v2339_v31 = vld [vmem:[#allocation2 + $0x570] sm:$0xf] }
  0x49   :  { %1348 = vmatpush.bf16.msrb.mxu3 %v1744_v57  ;;  %v1949_v57 = vld [vmem:[#allocation2 + $0x2c8] sm:$0xf0]  ;;  %v1944_v59 = vor.u32 %v2461_v51, %v1941_v53  ;;  %v2571_v32 = vld [vmem:[#allocation2 + $0x5cc] sm:$0xf0]  ;;  %v2559_v33 = vld [vmem:[#allocation2 + $0x574] sm:$0xf]  ;;  %v1664_v42 = vor.u32 %v2390_v29, %v1661_v30 }
  0x4a   :  { %v2572_v37 = vld [vmem:[#allocation2 + $0x5d4] sm:$0xf0]  ;;  %v2349_v41 = vld [vmem:[#allocation2 + $0x5d8] sm:$0xf0]  ;;  %v2340_v43 = vor.u32 %v2571_v32, %v2339_v31  ;;  %v2245_v50 = vld [vmem:[#allocation2 + $0x510] sm:$0xf0] }
  0x4b   :  { %1310 = vmatpush.bf16.msrb.mxu0 %v1636_v0  ;;  %1323 = vmatpush.bf16.msrb.mxu1 %v1640_v5  ;;  %v1952_v0 = vor.u32 %v2462_v56, %v1949_v57  ;;  %v2438_v5 = vld [vmem:[#allocation2 + $0x1ac] sm:$0xf]  ;;  %v2251_v51 = vld [vmem:[#allocation2 + $0x4b8] sm:$0xf]  ;;  %v2536_v53 = vld [vmem:[#allocation2 + $0x4bc] sm:$0xf] }
  0x4c   :  { %1336 = vmatpush.bf16.msrb.mxu2 %v1644_v6  ;;  %v1853_v6 = vld [vmem:[#allocation2 + $0x208] sm:$0xf0]  ;;  %v2253_v54 = vld [vmem:[#allocation2 + $0x518] sm:$0xf0]  ;;  %v2149_v62 = vld [vmem:[#allocation2 + $0x450] sm:$0xf0] }
  0x4d   :  { %1349 = vmatpush.bf16.msrb.mxu3 %v1648_v9  ;;  %v1852_v9 = vor.u32 %v2450_v4, %v1851_v3  ;;  %v1856_v13 = vor.u32 %v2438_v5, %v1853_v6  ;;  %v2256_v61 = vor.u32 %v2536_v53, %v2253_v54  ;;  %v2155_v63 = vld [vmem:[#allocation2 + $0x3f8] sm:$0xf]  ;;  %v2512_v2 = vld [vmem:[#allocation2 + $0x3fc] sm:$0xf]  ;;  %v1859_v31 = vld [vmem:[#allocation2 + $0x1b0] sm:$0xf] }
  0x4e   :  { %1311 = vmatmul.bf16.vlgmr.msrb.gmra.mxu0 %v2667_v1  ;;  %1324 = vmatmul.bf16.vlgmr.msrb.gmra.mxu1 %v2667_v1  ;;  %v2157_v3 = vld [vmem:[#allocation2 + $0x458] sm:$0xf0]  ;;  %v2451_v32 = vld [vmem:[#allocation2 + $0x20c] sm:$0xf0] }
  0x4f   :  { %1355 = vmatpush.bf16.msra.mxu0 %v2324_v10  ;;  %1368 = vmatpush.bf16.msra.mxu1 %v2328_v11  ;;  %v1747_v10 = vld [vmem:[#allocation2 + $0xe0] sm:$0xf]  ;;  %v1667_v53 = vld [vmem:[#allocation2 + $0x30] sm:$0xf] }
  0x50   :  { %1381 = vmatpush.bf16.msra.mxu2 %v2332_v12  ;;  %1350 = vmatmul.bf16.vlgmr.msrb.gmra.mxu3 %v2667_v1  ;;  %v2425_v11 = vld [vmem:[#allocation2 + $0x13c] sm:$0xf0]  ;;  %v2413_v12 = vld [vmem:[#allocation2 + $0xe4] sm:$0xf]  ;;  %v2403_v54 = vld [vmem:[#allocation2 + $0x8c] sm:$0xf0] }
  0x51   :  { %1394 = vmatpush.bf16.msra.mxu3 %v2336_v16  ;;  %1337 = vmatmul.bf16.vlgmr.msrb.gmra.mxu2 %v2667_v1  ;;  %v2426_v16 = vld [vmem:[#allocation2 + $0x144] sm:$0xf0]  ;;  %v1748_v19 = vor.u32 %v2425_v11, %v1747_v10  ;;  %v2160_v10 = vor.u32 %v2512_v2, %v2157_v3  ;;  %v2053_v11 = vld [vmem:[#allocation2 + $0x390] sm:$0xf0]  ;;  %v2573_v2 = vld [vmem:[#allocation2 + $0x5dc] sm:$0xf0] }
  0x52   :  { %v2561_v3 = vld [vmem:[#allocation2 + $0x584] sm:$0xf] }
  0x53   :  { %1356 = vmatpush.bf16.msra.mxu0 %v2228_v22  ;;  %1369 = vmatpush.bf16.msra.mxu1 %v2232_v23  ;;  %v1752_v22 = vor.u32 %v2413_v12, %v1749_v14  ;;  %v1756_v23 = vor.u32 %v2426_v16, %v1755_v15  ;;  %v2059_v12 = vld [vmem:[#allocation2 + $0x338] sm:$0xf]  ;;  %v2488_v14 = vld [vmem:[#allocation2 + $0x33c] sm:$0xf] }
  0x54   :  { %1382 = vmatpush.bf16.msra.mxu2 %v2236_v24  ;;  %v2389_v24 = vld [vmem:[#allocation2 + $0x24] sm:$0xf]  ;;  %v2061_v15 = vld [vmem:[#allocation2 + $0x398] sm:$0xf0] }
  0x55   :  { %1395 = vmatpush.bf16.msra.mxu3 %v2240_v28  ;;  %v2402_v28 = vld [vmem:[#allocation2 + $0x84] sm:$0xf0]  ;;  %v1656_v38 = vor.u32 %v2389_v24, %v1653_v25  ;;  %v1963_v24 = vld [vmem:[#allocation2 + $0x278] sm:$0xf] }
  0x56   :  { %v1660_v39 = vor.u32 %v2402_v28, %v1659_v26  ;;  %v2476_v25 = vld [vmem:[#allocation2 + $0x2d4] sm:$0xf0]  ;;  %v2464_v26 = vld [vmem:[#allocation2 + $0x27c] sm:$0xf] }
  0x57   :  { %1357 = vmatpush.bf16.msra.mxu0 %v2132_v34  ;;  %1370 = vmatpush.bf16.msra.mxu1 %v2136_v35  ;;  %v1652_v34 = vor.u32 %v2401_v21, %v1651_v20  ;;  %v2341_v35 = vld [vmem:[#allocation2 + $0x5d0] sm:$0xf0]  ;;  %v2475_v20 = vld [vmem:[#allocation2 + $0x2cc] sm:$0xf0]  ;;  %v1964_v30 = vor.u32 %v2476_v25, %v1963_v24  ;;  %v2269_v24 = vld [vmem:[#allocation2 + $0x528] sm:$0xf0] }
  0x58   :  { %1383 = vmatpush.bf16.msra.mxu2 %v2140_v36  ;;  %v2347_v36 = vld [vmem:[#allocation2 + $0x578] sm:$0xf]  ;;  %v2344_v44 = vor.u32 %v2559_v33, %v2341_v35  ;;  %v2463_v21 = vld [vmem:[#allocation2 + $0x274] sm:$0xf] }
  0x59   :  { %1396 = vmatpush.bf16.msra.mxu3 %v2144_v40  ;;  %v2560_v40 = vld [vmem:[#allocation2 + $0x57c] sm:$0xf]  ;;  %v2348_v45 = vor.u32 %v2572_v37, %v2347_v36  ;;  %v2439_v33 = vld [vmem:[#allocation2 + $0x1b4] sm:$0xf]  ;;  %v1867_v36 = vld [vmem:[#allocation2 + $0x1b8] sm:$0xf] }
  0x5a   :  { %v2352_v49 = vor.u32 %v2560_v40, %v2349_v41  ;;  %v1861_v35 = vld [vmem:[#allocation2 + $0x210] sm:$0xf0]  ;;  %v2452_v37 = vld [vmem:[#allocation2 + $0x214] sm:$0xf0]  ;;  %v1860_v40 = vor.u32 %v2451_v32, %v1859_v31  ;;  %v2165_v32 = vld [vmem:[#allocation2 + $0x460] sm:$0xf0] }
  0x5b   :  { %1358 = vmatpush.bf16.msra.mxu0 %v2036_v46  ;;  %1371 = vmatpush.bf16.msra.mxu1 %v2040_v47  ;;  %v2243_v46 = vld [vmem:[#allocation2 + $0x4b0] sm:$0xf]  ;;  %v1864_v41 = vor.u32 %v2439_v33, %v1861_v35  ;;  %v2171_v33 = vld [vmem:[#allocation2 + $0x408] sm:$0xf]  ;;  %v2514_v35 = vld [vmem:[#allocation2 + $0x40c] sm:$0xf] }
  0x5c   :  { %1384 = vmatpush.bf16.msra.mxu2 %v2044_v48  ;;  %v2547_v47 = vld [vmem:[#allocation2 + $0x50c] sm:$0xf0]  ;;  %v2535_v48 = vld [vmem:[#allocation2 + $0x4b4] sm:$0xf] }
  0x5d   :  { %1397 = vmatpush.bf16.msra.mxu3 %v2048_v52  ;;  %v2548_v52 = vld [vmem:[#allocation2 + $0x514] sm:$0xf0]  ;;  %v2244_v55 = vor.u32 %v2547_v47, %v2243_v46  ;;  %v2248_v56 = vor.u32 %v2535_v48, %v2245_v50  ;;  %v1765_v47 = vld [vmem:[#allocation2 + $0x150] sm:$0xf0]  ;;  %v2416_v50 = vld [vmem:[#allocation2 + $0xfc] sm:$0xf] }
  0x5e   :  { %v2252_v57 = vor.u32 %v2548_v52, %v2251_v51  ;;  %v1771_v48 = vld [vmem:[#allocation2 + $0xf8] sm:$0xf]  ;;  %v1773_v51 = vld [vmem:[#allocation2 + $0x158] sm:$0xf0] }
  0x5f   :  { %1359 = vmatpush.bf16.msra.mxu0 %v1940_v58  ;;  %1372 = vmatpush.bf16.msra.mxu1 %v1944_v59  ;;  %v2147_v58 = vld [vmem:[#allocation2 + $0x3f0] sm:$0xf] }
  0x60   :  { %1385 = vmatpush.bf16.msra.mxu2 %v1948_v60  ;;  %v2523_v59 = vld [vmem:[#allocation2 + $0x44c] sm:$0xf0]  ;;  %v2511_v60 = vld [vmem:[#allocation2 + $0x3f4] sm:$0xf] }
  0x61   :  { %1398 = vmatpush.bf16.msra.mxu3 %v1952_v0  ;;  %v2524_v0 = vld [vmem:[#allocation2 + $0x454] sm:$0xf0]  ;;  %v2148_v4 = vor.u32 %v2523_v59, %v2147_v58  ;;  %v2152_v5 = vor.u32 %v2511_v60, %v2149_v62  ;;  %v1669_v58 = vld [vmem:[#allocation2 + $0x90] sm:$0xf0]  ;;  %v1776_v60 = vor.u32 %v2416_v50, %v1773_v51  ;;  %v2392_v62 = vld [vmem:[#allocation2 + $0x3c] sm:$0xf] }
  0x62   :  { %v2156_v6 = vor.u32 %v2524_v0, %v2155_v63  ;;  %v1675_v59 = vld [vmem:[#allocation2 + $0x38] sm:$0xf]  ;;  %v1677_v63 = vld [vmem:[#allocation2 + $0x98] sm:$0xf0]  ;;  %v2355_v0 = vld [vmem:[#allocation2 + $0x580] sm:$0xf] }
  0x63   :  { %1360 = vmatpush.bf16.msra.mxu0 %v1844_v7  ;;  %1373 = vmatpush.bf16.msra.mxu1 %v1848_v8  ;;  %v2051_v7 = vld [vmem:[#allocation2 + $0x330] sm:$0xf]  ;;  %v1971_v51 = vld [vmem:[#allocation2 + $0x280] sm:$0xf] }
  0x64   :  { %1386 = vmatpush.bf16.msra.mxu2 %v1852_v9  ;;  %v2499_v8 = vld [vmem:[#allocation2 + $0x38c] sm:$0xf0]  ;;  %v2487_v9 = vld [vmem:[#allocation2 + $0x334] sm:$0xf] }
  0x65   :  { %1399 = vmatpush.bf16.msra.mxu3 %v1856_v13  ;;  %v2500_v13 = vld [vmem:[#allocation2 + $0x394] sm:$0xf0]  ;;  %v2052_v16 = vor.u32 %v2499_v8, %v2051_v7  ;;  %v2056_v17 = vor.u32 %v2487_v9, %v2053_v11  ;;  %v2574_v7 = vld [vmem:[#allocation2 + $0x5e4] sm:$0xf0]  ;;  %v2365_v11 = vld [vmem:[#allocation2 + $0x5e8] sm:$0xf0] }
  0x66   :  { %v2060_v18 = vor.u32 %v2500_v13, %v2059_v12  ;;  %v1680_v12 = vor.u32 %v2392_v62, %v1677_v63  ;;  %v2356_v13 = vor.u32 %v2573_v2, %v2355_v0  ;;  %v1875_v63 = vld [vmem:[#allocation2 + $0x1c0] sm:$0xf]  ;;  %v2441_v2 = vld [vmem:[#allocation2 + $0x1c4] sm:$0xf] }
  0x67   :  { %1361 = vmatpush.bf16.msra.mxu0 %v1748_v19  ;;  %1374 = vmatpush.bf16.msra.mxu1 %v1752_v22  ;;  %v1955_v19 = vld [vmem:[#allocation2 + $0x270] sm:$0xf]  ;;  %v2064_v22 = vor.u32 %v2488_v14, %v2061_v15  ;;  %v2453_v0 = vld [vmem:[#allocation2 + $0x21c] sm:$0xf0] }
  0x68   :  { %1387 = vmatpush.bf16.msra.mxu2 %v1756_v23  ;;  %v1957_v23 = vld [vmem:[#allocation2 + $0x2d0] sm:$0xf0]  ;;  %v1956_v28 = vor.u32 %v2475_v20, %v1955_v19  ;;  %v2261_v20 = vld [vmem:[#allocation2 + $0x520] sm:$0xf0] }
  0x69   :  { %1400 = vmatpush.bf16.msra.mxu3 %v1760_v27  ;;  %v1965_v27 = vld [vmem:[#allocation2 + $0x2d8] sm:$0xf0]  ;;  %v1960_v29 = vor.u32 %v2463_v21, %v1957_v23  ;;  %v2267_v21 = vld [vmem:[#allocation2 + $0x4c8] sm:$0xf]  ;;  %v2538_v23 = vld [vmem:[#allocation2 + $0x4cc] sm:$0xf] }
  0x6a   :  { %v2272_v31 = vor.u32 %v2538_v23, %v2269_v24  ;;  %v2405_v23 = vld [vmem:[#allocation2 + $0x9c] sm:$0xf0] }
  0x6b   :  { %1362 = vmatpush.bf16.msra.mxu0 %v1652_v34  ;;  %1375 = vmatpush.bf16.msra.mxu1 %v1656_v38  ;;  %v1968_v34 = vor.u32 %v2464_v26, %v1965_v27  ;;  %v2440_v38 = vld [vmem:[#allocation2 + $0x1bc] sm:$0xf] }
  0x6c   :  { %1388 = vmatpush.bf16.msra.mxu2 %v1660_v39  ;;  %v1869_v39 = vld [vmem:[#allocation2 + $0x218] sm:$0xf0] }
  0x6d   :  { %1401 = vmatpush.bf16.msra.mxu3 %v1664_v42  ;;  %v1868_v42 = vor.u32 %v2452_v37, %v1867_v36  ;;  %v1872_v46 = vor.u32 %v2440_v38, %v1869_v39  ;;  %v2173_v36 = vld [vmem:[#allocation2 + $0x468] sm:$0xf0] }
  0x6e   :  { %1363 = vmatmul.bf16.vlgmr.msra.gmra.mxu0 %v2667_v1  ;;  %1376 = vmatmul.bf16.vlgmr.msra.gmra.mxu1 %v2667_v1 }
  0x6f   :  { %1407 = vmatpush.bf16.msrb.mxu0 %v2340_v43  ;;  %1420 = vmatpush.bf16.msrb.mxu1 %v2344_v44  ;;  %v1763_v43 = vld [vmem:[#allocation2 + $0xf0] sm:$0xf] }
  0x70   :  { %1433 = vmatpush.bf16.msrb.mxu2 %v2348_v45  ;;  %1402 = vmatmul.bf16.vlgmr.msra.gmra.mxu3 %v2667_v1  ;;  %v2427_v44 = vld [vmem:[#allocation2 + $0x14c] sm:$0xf0]  ;;  %v2415_v45 = vld [vmem:[#allocation2 + $0xf4] sm:$0xf] }
  0x71   :  { %1446 = vmatpush.bf16.msrb.mxu3 %v2352_v49  ;;  %1389 = vmatmul.bf16.vlgmr.msra.gmra.mxu2 %v2667_v1  ;;  %v2428_v49 = vld [vmem:[#allocation2 + $0x154] sm:$0xf0]  ;;  %v1764_v52 = vor.u32 %v2427_v44, %v1763_v43  ;;  %v2176_v43 = vor.u32 %v2514_v35, %v2173_v36  ;;  %v2069_v44 = vld [vmem:[#allocation2 + $0x3a0] sm:$0xf0]  ;;  %v2563_v35 = vld [vmem:[#allocation2 + $0x594] sm:$0xf] }
  0x73   :  { %1408 = vmatpush.bf16.msrb.mxu0 %v2244_v55  ;;  %1421 = vmatpush.bf16.msrb.mxu1 %v2248_v56  ;;  %v1768_v55 = vor.u32 %v2415_v45, %v1765_v47  ;;  %v1772_v56 = vor.u32 %v2428_v49, %v1771_v48  ;;  %v2075_v45 = vld [vmem:[#allocation2 + $0x348] sm:$0xf]  ;;  %v2490_v47 = vld [vmem:[#allocation2 + $0x34c] sm:$0xf] }
  0x74   :  { %1434 = vmatpush.bf16.msrb.mxu2 %v2252_v57  ;;  %v2391_v57 = vld [vmem:[#allocation2 + $0x34] sm:$0xf]  ;;  %v2077_v48 = vld [vmem:[#allocation2 + $0x3a8] sm:$0xf0] }
  0x75   :  { %1447 = vmatpush.bf16.msrb.mxu3 %v2256_v61  ;;  %v2404_v61 = vld [vmem:[#allocation2 + $0x94] sm:$0xf0]  ;;  %v1672_v8 = vor.u32 %v2391_v57, %v1669_v58  ;;  %v2478_v57 = vld [vmem:[#allocation2 + $0x2e4] sm:$0xf0]  ;;  %v2466_v58 = vld [vmem:[#allocation2 + $0x28c] sm:$0xf] }
  0x76   :  { %v1676_v9 = vor.u32 %v2404_v61, %v1675_v59  ;;  %v1981_v59 = vld [vmem:[#allocation2 + $0x2e8] sm:$0xf0] }
  0x77   :  { %1409 = vmatpush.bf16.msrb.mxu0 %v2148_v4  ;;  %1422 = vmatpush.bf16.msrb.mxu1 %v2152_v5  ;;  %v1668_v4 = vor.u32 %v2403_v54, %v1667_v53  ;;  %v2357_v5 = vld [vmem:[#allocation2 + $0x5e0] sm:$0xf0]  ;;  %v2080_v54 = vor.u32 %v2490_v47, %v2077_v48  ;;  %v2275_v48 = vld [vmem:[#allocation2 + $0x4d0] sm:$0xf] }
  0x78   :  { %1435 = vmatpush.bf16.msrb.mxu2 %v2156_v6  ;;  %v2363_v6 = vld [vmem:[#allocation2 + $0x588] sm:$0xf]  ;;  %v2360_v14 = vor.u32 %v2561_v3, %v2357_v5  ;;  %v2465_v53 = vld [vmem:[#allocation2 + $0x284] sm:$0xf]  ;;  %v1984_v3 = vor.u32 %v2466_v58, %v1981_v59  ;;  %v2179_v59 = vld [vmem:[#allocation2 + $0x410] sm:$0xf] }
  0x79   :  { %1448 = vmatpush.bf16.msrb.mxu3 %v2160_v10  ;;  %v2562_v10 = vld [vmem:[#allocation2 + $0x58c] sm:$0xf]  ;;  %v2364_v15 = vor.u32 %v2574_v7, %v2363_v6  ;;  %v1883_v5 = vld [vmem:[#allocation2 + $0x1c8] sm:$0xf] }
  0x7a   :  { %v2368_v19 = vor.u32 %v2562_v10, %v2365_v11  ;;  %v2454_v6 = vld [vmem:[#allocation2 + $0x224] sm:$0xf0]  ;;  %v2442_v7 = vld [vmem:[#allocation2 + $0x1cc] sm:$0xf] }
  0x7b   :  { %1410 = vmatpush.bf16.msrb.mxu0 %v2052_v16  ;;  %1423 = vmatpush.bf16.msrb.mxu1 %v2056_v17  ;;  %v2259_v16 = vld [vmem:[#allocation2 + $0x4c0] sm:$0xf]  ;;  %v1884_v11 = vor.u32 %v2454_v6, %v1883_v5  ;;  %v2189_v5 = vld [vmem:[#allocation2 + $0x478] sm:$0xf0] }
  0x7c   :  { %1436 = vmatpush.bf16.msrb.mxu2 %v2060_v18  ;;  %v2549_v17 = vld [vmem:[#allocation2 + $0x51c] sm:$0xf0]  ;;  %v2537_v18 = vld [vmem:[#allocation2 + $0x4c4] sm:$0xf] }
  0x7d   :  { %1449 = vmatpush.bf16.msrb.mxu3 %v2064_v22  ;;  %v2550_v22 = vld [vmem:[#allocation2 + $0x524] sm:$0xf0]  ;;  %v2260_v25 = vor.u32 %v2549_v17, %v2259_v16  ;;  %v2264_v26 = vor.u32 %v2537_v18, %v2261_v20  ;;  %v1781_v16 = vld [vmem:[#allocation2 + $0x160] sm:$0xf0]  ;;  %v1789_v20 = vld [vmem:[#allocation2 + $0x168] sm:$0xf0] }
  0x7e   :  { %v2268_v27 = vor.u32 %v2550_v22, %v2267_v21  ;;  %v1787_v17 = vld [vmem:[#allocation2 + $0x108] sm:$0xf]  ;;  %v1683_v22 = vld [vmem:[#allocation2 + $0x40] sm:$0xf] }
  0x7f   :  { %1411 = vmatpush.bf16.msrb.mxu0 %v1956_v28  ;;  %1424 = vmatpush.bf16.msrb.mxu1 %v1960_v29  ;;  %v2163_v28 = vld [vmem:[#allocation2 + $0x400] sm:$0xf]  ;;  %v2430_v18 = vld [vmem:[#allocation2 + $0x164] sm:$0xf0]  ;;  %v1684_v36 = vor.u32 %v2405_v23, %v1683_v22 }
  0x80   :  { %1437 = vmatpush.bf16.msrb.mxu2 %v1964_v30  ;;  %v2525_v29 = vld [vmem:[#allocation2 + $0x45c] sm:$0xf0]  ;;  %v2513_v30 = vld [vmem:[#allocation2 + $0x404] sm:$0xf] }
  0x81   :  { %1450 = vmatpush.bf16.msrb.mxu3 %v1968_v34  ;;  %v2526_v34 = vld [vmem:[#allocation2 + $0x464] sm:$0xf0]  ;;  %v2164_v37 = vor.u32 %v2525_v29, %v2163_v28  ;;  %v2168_v38 = vor.u32 %v2513_v30, %v2165_v32  ;;  %v1693_v32 = vld [vmem:[#allocation2 + $0xa8] sm:$0xf0] }
  0x82   :  { %v2172_v39 = vor.u32 %v2526_v34, %v2171_v33  ;;  %v1691_v28 = vld [vmem:[#allocation2 + $0x48] sm:$0xf]  ;;  %v2371_v33 = vld [vmem:[#allocation2 + $0x590] sm:$0xf] }
  0x83   :  { %1412 = vmatpush.bf16.msrb.mxu0 %v1860_v40  ;;  %1425 = vmatpush.bf16.msrb.mxu1 %v1864_v41  ;;  %v2067_v40 = vld [vmem:[#allocation2 + $0x340] sm:$0xf]  ;;  %v2406_v30 = vld [vmem:[#allocation2 + $0xa4] sm:$0xf0]  ;;  %v2575_v34 = vld [vmem:[#allocation2 + $0x5ec] sm:$0xf0] }
  0x84   :  { %1438 = vmatpush.bf16.msrb.mxu2 %v1868_v42  ;;  %v2501_v41 = vld [vmem:[#allocation2 + $0x39c] sm:$0xf0]  ;;  %v2489_v42 = vld [vmem:[#allocation2 + $0x344] sm:$0xf] }
  0x85   :  { %1451 = vmatpush.bf16.msrb.mxu3 %v1872_v46  ;;  %v2502_v46 = vld [vmem:[#allocation2 + $0x3a4] sm:$0xf0]  ;;  %v2068_v49 = vor.u32 %v2501_v41, %v2067_v40  ;;  %v2072_v50 = vor.u32 %v2489_v42, %v2069_v44  ;;  %v1692_v41 = vor.u32 %v2406_v30, %v1691_v28  ;;  %v2564_v42 = vld [vmem:[#allocation2 + $0x59c] sm:$0xf]  ;;  %v1995_v28 = vld [vmem:[#allocation2 + $0x298] sm:$0xf] }
  0x87   :  { %1413 = vmatpush.bf16.msrb.mxu0 %v1764_v52  ;;  %1426 = vmatpush.bf16.msrb.mxu1 %v1768_v55  ;;  %v2477_v52 = vld [vmem:[#allocation2 + $0x2dc] sm:$0xf0]  ;;  %v1973_v55 = vld [vmem:[#allocation2 + $0x2e0] sm:$0xf0] }
  0x88   :  { %1439 = vmatpush.bf16.msrb.mxu2 %v1772_v56  ;;  %v1979_v56 = vld [vmem:[#allocation2 + $0x288] sm:$0xf]  ;;  %v1976_v61 = vor.u32 %v2465_v53, %v1973_v55  ;;  %v2552_v53 = vld [vmem:[#allocation2 + $0x534] sm:$0xf0]  ;;  %v2285_v55 = vld [vmem:[#allocation2 + $0x538] sm:$0xf0] }
  0x89   :  { %1452 = vmatpush.bf16.msrb.mxu3 %v1776_v60  ;;  %v1972_v60 = vor.u32 %v2477_v52, %v1971_v51  ;;  %v1980_v62 = vor.u32 %v2478_v57, %v1979_v56  ;;  %v2277_v51 = vld [vmem:[#allocation2 + $0x530] sm:$0xf0]  ;;  %v2283_v52 = vld [vmem:[#allocation2 + $0x4d8] sm:$0xf] }
  0x8a   :  { %v2284_v58 = vor.u32 %v2552_v53, %v2283_v52 }
  0x8b   :  { %1414 = vmatpush.bf16.msrb.mxu0 %v1668_v4  ;;  %1427 = vmatpush.bf16.msrb.mxu1 %v1672_v8  ;;  %v1877_v4 = vld [vmem:[#allocation2 + $0x220] sm:$0xf0]  ;;  %v1885_v8 = vld [vmem:[#allocation2 + $0x228] sm:$0xf0] }
  0x8c   :  { %1440 = vmatpush.bf16.msrb.mxu2 %v1676_v9  ;;  %v1876_v9 = vor.u32 %v2453_v0, %v1875_v63  ;;  %v1880_v10 = vor.u32 %v2441_v2, %v1877_v4  ;;  %v2688_v63 = vld [vmem:[%s2744_s0] sm:$0xf]  ;;  %v2181_v0 = vld [vmem:[#allocation2 + $0x470] sm:$0xf0]  ;;  %v2187_v2 = vld [vmem:[#allocation2 + $0x418] sm:$0xf] }
  0x8d   :  { %1453 = vmatpush.bf16.msrb.mxu3 %v1680_v12  ;;  %v1779_v12 = vld [vmem:[#allocation2 + $0x100] sm:$0xf]  ;;  %v2516_v4 = vld [vmem:[#allocation2 + $0x41c] sm:$0xf] }
  0x8e   :  { %1415 = vmatmul.bf16.vlgmr.msrb.gmra.mxu0 %v2667_v1  ;;  %1428 = vmatmul.bf16.vlgmr.msrb.gmra.mxu1 %v2667_v1 }
  0x8f   :  { %1459 = vmatpush.bf16.msra.mxu0 %v2356_v13  ;;  %1472 = vmatpush.bf16.msra.mxu1 %v2360_v14  ;;  %v2429_v13 = vld [vmem:[#allocation2 + $0x15c] sm:$0xf0]  ;;  %v2417_v14 = vld [vmem:[#allocation2 + $0x104] sm:$0xf] }
  0x90   :  { %1485 = vmatpush.bf16.msra.mxu2 %v2364_v15  ;;  %1454 = vmatmul.bf16.vlgmr.msrb.gmra.mxu3 %v2667_v1  ;;  %v1888_v15 = vor.u32 %v2442_v7, %v1885_v8  ;;  %v1780_v21 = vor.u32 %v2429_v13, %v1779_v12  ;;  %v1784_v24 = vor.u32 %v2417_v14, %v1781_v16  ;;  %v2083_v7 = vld [vmem:[#allocation2 + $0x350] sm:$0xf]  ;;  %v2085_v12 = vld [vmem:[#allocation2 + $0x3b0] sm:$0xf0]  ;;  %v2091_v14 = vld [vmem:[#allocation2 + $0x358] sm:$0xf] }
  0x91   :  { %1498 = vmatpush.bf16.msra.mxu3 %v2368_v19  ;;  %1441 = vmatmul.bf16.vlgmr.msrb.gmra.mxu2 %v2667_v1  ;;  %v2076_v1 = vor.u32 %v2502_v46, %v2075_v45  ;;  %v2418_v19 = vld [vmem:[#allocation2 + $0x10c] sm:$0xf]  ;;  %v2372_v45 = vor.u32 %v2575_v34, %v2371_v33  ;;  %v2192_v13 = vor.u32 %v2516_v4, %v2189_v5  ;;  %v2694_v16 = vld [vmem:[#allocation4] sm:$0xff]  ;;  %v1891_v34 = vld [vmem:[#allocation2 + $0x1d0] sm:$0xf] }
  0x92   :  { %v1792_v29 = vor.u32 %v2418_v19, %v1789_v20  ;;  %v1987_v20 = vld [vmem:[#allocation2 + $0x290] sm:$0xf]  ;;  %v244_v30 = vperm.slane %v2694_v16, 1  ;;  %v2420_v4 = vld [vmem:[#allocation2 + $0x11c] sm:$0xf] }
  0x93   :  { %1460 = vmatpush.bf16.msra.mxu0 %v2260_v25  ;;  %1473 = vmatpush.bf16.msra.mxu1 %v2264_v26  ;;  %v1788_v25 = vor.u32 %v2430_v18, %v1787_v17  ;;  %v2393_v26 = vld [vmem:[#allocation2 + $0x44] sm:$0xf]  ;;  %v2492_v17 = vld [vmem:[#allocation2 + $0x35c] sm:$0xf] }
  0x94   :  { %1486 = vmatpush.bf16.msra.mxu2 %v2268_v27  ;;  %v1685_v27 = vld [vmem:[#allocation2 + $0xa0] sm:$0xf0]  ;;  %v2093_v18 = vld [vmem:[#allocation2 + $0x3b8] sm:$0xf0] }
  0x95   :  { %1499 = vmatpush.bf16.msra.mxu3 %v2272_v31  ;;  %v2394_v31 = vld [vmem:[#allocation2 + $0x4c] sm:$0xf]  ;;  %v1688_v40 = vor.u32 %v2393_v26, %v1685_v27  ;;  %v243_v26 = vperm.slane %v2694_v16, 0  ;;  %v2096_v27 = vor.u32 %v2492_v17, %v2093_v18  ;;  %v1805_v5 = vld [vmem:[#allocation2 + $0x178] sm:$0xf0] }
  0x96   :  { %v1696_v44 = vor.u32 %v2394_v31, %v1693_v32  ;;  %v2468_v31 = vld [vmem:[#allocation2 + $0x29c] sm:$0xf]  ;;  %v1808_v18 = vor.u32 %v2420_v4, %v1805_v5 }
  0x97   :  { %1461 = vmatpush.bf16.msra.mxu0 %v2164_v37  ;;  %1474 = vmatpush.bf16.msra.mxu1 %v2168_v38  ;;  %v2373_v37 = vld [vmem:[#allocation2 + $0x5f0] sm:$0xf0]  ;;  %v2379_v38 = vld [vmem:[#allocation2 + $0x598] sm:$0xf]  ;;  %v1997_v32 = vld [vmem:[#allocation2 + $0x2f8] sm:$0xf0] }
  0x98   :  { %1487 = vmatpush.bf16.msra.mxu2 %v2172_v39  ;;  %v2576_v39 = vld [vmem:[#allocation2 + $0x5f4] sm:$0xf0]  ;;  %v2376_v46 = vor.u32 %v2563_v35, %v2373_v37 }
  0x99   :  { %1500 = vmatpush.bf16.msra.mxu3 %v2176_v43  ;;  %v2381_v43 = vld [vmem:[#allocation2 + $0x5f8] sm:$0xf0]  ;;  %v2380_v47 = vor.u32 %v2576_v39, %v2379_v38  ;;  %v2455_v38 = vld [vmem:[#allocation2 + $0x22c] sm:$0xf0]  ;;  %v2443_v39 = vld [vmem:[#allocation2 + $0x1d4] sm:$0xf] }
  0x9b   :  { %1462 = vmatpush.bf16.msra.mxu0 %v2068_v49  ;;  %1475 = vmatpush.bf16.msra.mxu1 %v2072_v50  ;;  %v2551_v49 = vld [vmem:[#allocation2 + $0x52c] sm:$0xf0]  ;;  %v2539_v50 = vld [vmem:[#allocation2 + $0x4d4] sm:$0xf] }
  0x9c   :  { %1488 = vmatpush.bf16.msra.mxu2 %v2076_v1  ;;  %v2384_v1 = vor.u32 %v2564_v42, %v2381_v43  ;;  %v2276_v56 = vor.u32 %v2551_v49, %v2275_v48  ;;  %v2280_v57 = vor.u32 %v2539_v50, %v2277_v51  ;;  %v2000_v43 = vor.u32 %v2468_v31, %v1997_v32  ;;  %v2444_v48 = vld [vmem:[#allocation2 + $0x1dc] sm:$0xf] }
  0x9d   :  { %1501 = vmatpush.bf16.msra.mxu3 %v2080_v54  ;;  %v2540_v54 = vld [vmem:[#allocation2 + $0x4dc] sm:$0xf]  ;;  %v1892_v51 = vor.u32 %v2455_v38, %v1891_v34  ;;  %v247_v31 = vperm.slane %v2694_v16, 4  ;;  %v248_v32 = vperm.slane %v2694_v16, 5 }
  0x9e   :  { %v1901_v49 = vld [vmem:[#allocation2 + $0x238] sm:$0xf0] }
  0x9f   :  { %1463 = vmatpush.bf16.msra.mxu0 %v1972_v60  ;;  %1476 = vmatpush.bf16.msra.mxu1 %v1976_v61  ;;  %v2527_v60 = vld [vmem:[#allocation2 + $0x46c] sm:$0xf0]  ;;  %v2515_v61 = vld [vmem:[#allocation2 + $0x414] sm:$0xf] }
  0xa0   :  { %1489 = vmatpush.bf16.msra.mxu2 %v1980_v62  ;;  %v2288_v62 = vor.u32 %v2540_v54, %v2285_v55  ;;  %v2180_v6 = vor.u32 %v2527_v60, %v2179_v59  ;;  %v2184_v8 = vor.u32 %v2515_v61, %v2181_v0  ;;  %v1795_v55 = vld [vmem:[#allocation2 + $0x110] sm:$0xf]  ;;  %v1904_v59 = vor.u32 %v2444_v48, %v1901_v49  ;;  %v1797_v60 = vld [vmem:[#allocation2 + $0x170] sm:$0xf0]  ;;  %v1803_v61 = vld [vmem:[#allocation2 + $0x118] sm:$0xf] }
  0xa1   :  { %1502 = vmatpush.bf16.msra.mxu3 %v1984_v3  ;;  %v2528_v3 = vld [vmem:[#allocation2 + $0x474] sm:$0xf0] }
  0xa3   :  { %1464 = vmatpush.bf16.msra.mxu0 %v1876_v9  ;;  %1477 = vmatpush.bf16.msra.mxu1 %v1880_v10  ;;  %v2188_v9 = vor.u32 %v2528_v3, %v2187_v2  ;;  %v2503_v10 = vld [vmem:[#allocation2 + $0x3ac] sm:$0xf0] }
  0xa4   :  { %1490 = vmatpush.bf16.msra.mxu2 %v1884_v11  ;;  %v2491_v11 = vld [vmem:[#allocation2 + $0x354] sm:$0xf]  ;;  %v2084_v19 = vor.u32 %v2503_v10, %v2083_v7 }
  0xa5   :  { %1503 = vmatpush.bf16.msra.mxu3 %v1888_v15  ;;  %v2504_v15 = vld [vmem:[#allocation2 + $0x3b4] sm:$0xf0]  ;;  %v2088_v22 = vor.u32 %v2491_v11, %v2085_v12 }
  0xa6   :  { %v2092_v23 = vor.u32 %v2504_v15, %v2091_v14  ;;  %v2395_v14 = vld [vmem:[#allocation2 + $0x54] sm:$0xf] }
  0xa7   :  { %1465 = vmatpush.bf16.msra.mxu0 %v1780_v21  ;;  %1478 = vmatpush.bf16.msra.mxu1 %v1784_v24  ;;  %v2479_v21 = vld [vmem:[#allocation2 + $0x2ec] sm:$0xf0]  ;;  %v2467_v24 = vld [vmem:[#allocation2 + $0x294] sm:$0xf] }
  0xa8   :  { %1491 = vmatpush.bf16.msra.mxu2 %v1788_v25  ;;  %v1989_v25 = vld [vmem:[#allocation2 + $0x2f0] sm:$0xf0]  ;;  %v1988_v33 = vor.u32 %v2479_v21, %v1987_v20  ;;  %v1707_v20 = vld [vmem:[#allocation2 + $0x58] sm:$0xf] }
  0xa9   :  { %1504 = vmatpush.bf16.msra.mxu3 %v1792_v29  ;;  %v2480_v29 = vld [vmem:[#allocation2 + $0x2f4] sm:$0xf0] }
  0xaa   :  { %v1996_v37 = vor.u32 %v2480_v29, %v1995_v28  ;;  %v2408_v21 = vld [vmem:[#allocation2 + $0xb4] sm:$0xf0] }
  0xab   :  { %1466 = vmatpush.bf16.msra.mxu0 %v1684_v36  ;;  %1479 = vmatpush.bf16.msra.mxu1 %v1688_v40  ;;  %v1260_v35 = vpop.f32.mrf.mxu0  ;;  %v1992_v36 = vor.u32 %v2467_v24, %v1989_v25  ;;  %v1893_v40 = vld [vmem:[#allocation2 + $0x230] sm:$0xf0]  ;;  %v1273_v42 = vpop.f32.mrf.mxu1 }
  0xac   :  { %1492 = vmatpush.bf16.msra.mxu2 %v1692_v41  ;;  %v1261_v41 = vadd.f32 %v1260_v35, %v243_v26  ;;  %v1896_v53 = vor.u32 %v2443_v39, %v1893_v40  ;;  %v250_v39 = vperm.slane %v2694_v16, 7 }
  0xad   :  { %1505 = vmatpush.bf16.msra.mxu3 %v1696_v44  ;;  %v1899_v44 = vld [vmem:[#allocation2 + $0x1d8] sm:$0xf] }
  0xae   :  { %1467 = vmatmul.bf16.vlgmr.msra.gmra.mxu0 %v2688_v63  ;;  %1480 = vmatmul.bf16.vlgmr.msra.gmra.mxu1 %v2688_v63  ;;  %v1563_v50 = vmax.f32 %v1261_v41, 0.0 }
  0xaf   :  { %1511 = vmatpush.bf16.msrb.mxu0 %v2372_v45  ;;  %1524 = vmatpush.bf16.msrb.mxu1 %v2376_v46  ;;  %v2456_v45 = vld [vmem:[#allocation2 + $0x234] sm:$0xf0]  ;;  %v1274_v46 = vadd.f32 %v1273_v42, %v244_v30 }
  0xb0   :  { %1537 = vmatpush.bf16.msrb.mxu2 %v2380_v47  ;;  %1506 = vmatmul.bf16.vlgmr.msra.gmra.mxu3 %v2688_v63  ;;  %v245_v47 = vperm.slane %v2694_v16, 2  ;;  %v1900_v54 = vor.u32 %v2456_v45, %v1899_v44 }
  0xb1   :  { %1550 = vmatpush.bf16.msrb.mxu3 %v2384_v1  ;;  %1493 = vmatmul.bf16.vlgmr.msra.gmra.mxu2 %v2688_v63  ;;  %v246_v1 = vperm.slane %v2694_v16, 3  ;;  %v1564_v52 = vmax.f32 %v1274_v46, 0.0 }
  0xb3   :  { %1512 = vmatpush.bf16.msrb.mxu0 %v2276_v56  ;;  %1525 = vmatpush.bf16.msrb.mxu1 %v2280_v57  ;;  %v2431_v56 = vld [vmem:[#allocation2 + $0x16c] sm:$0xf0]  ;;  %v2419_v57 = vld [vmem:[#allocation2 + $0x114] sm:$0xf]  ;;  %v1587_v0 = vpack.c.bf16 %v1564_v52, %v1563_v50  ;;  %v1299_v3 = vpop.f32.mrf.mxu3  ;;  %v1262_v10 = vpop.f32.mrf.mxu0 }
  0xb4   :  { %1538 = vmatpush.bf16.msrb.mxu2 %v2284_v58  ;;  %v1286_v58 = vpop.f32.mrf.mxu2  ;;  %v1796_v7 = vor.u32 %v2431_v56, %v1795_v55  ;;  %v1800_v11 = vor.u32 %v2419_v57, %v1797_v60  ;;  %v1275_v17 = vpop.f32.mrf.mxu1 }
  0xb5   :  { %1551 = vmatpush.bf16.msrb.mxu3 %v2288_v62  ;;  %v2432_v62 = vld [vmem:[#allocation2 + $0x174] sm:$0xf0]  ;;  %v1287_v2 = vadd.f32 %v1286_v58, %v245_v47  ;;  %1599 = vst [vmem:[%s2747_s3] sm:$0xff] %v1587_v0 }
  0xb6   :  { %v1804_v12 = vor.u32 %v2432_v62, %v1803_v61 }
  0xb7   :  { %1513 = vmatpush.bf16.msrb.mxu0 %v2180_v6  ;;  %1526 = vmatpush.bf16.msrb.mxu1 %v2184_v8  ;;  %v1300_v6 = vadd.f32 %v1299_v3, %v246_v1  ;;  %v1699_v8 = vld [vmem:[#allocation2 + $0x50] sm:$0xf]  ;;  %v238_v1 = vld [vmem:[#allocation4 + $0x8] sm:$0xff] }
  0xb8   :  { %1539 = vmatpush.bf16.msrb.mxu2 %v2188_v9  ;;  %v1565_v9 = vmax.f32 %v1287_v2, 0.0  ;;  %v252_v52 = vperm.slane %v238_v1, 1  ;;  %v253_v57 = vperm.slane %v238_v1, 2 }
  0xb9   :  { %1552 = vmatpush.bf16.msrb.mxu3 %v2192_v13  ;;  %v2407_v13 = vld [vmem:[#allocation2 + $0xac] sm:$0xf0]  ;;  %v1566_v15 = vmax.f32 %v1300_v6, 0.0 }
  0xba   :  { %v1700_v25 = vor.u32 %v2407_v13, %v1699_v8 }
  0xbb   :  { %1514 = vmatpush.bf16.msrb.mxu0 %v2084_v19  ;;  %1527 = vmatpush.bf16.msrb.mxu1 %v2088_v22  ;;  %v1701_v19 = vld [vmem:[#allocation2 + $0xb0] sm:$0xf0]  ;;  %v2396_v22 = vld [vmem:[#allocation2 + $0x5c] sm:$0xf]  ;;  %v1588_v24 = vpack.c.bf16 %v1566_v15, %v1565_v9  ;;  %v1301_v30 = vpop.f32.mrf.mxu3 }
  0xbc   :  { %1540 = vmatpush.bf16.msrb.mxu2 %v2092_v23  ;;  %v1709_v23 = vld [vmem:[#allocation2 + $0xb8] sm:$0xf0]  ;;  %v1704_v26 = vor.u32 %v2395_v14, %v1701_v19  ;;  %v1288_v28 = vpop.f32.mrf.mxu2 }
  0xbd   :  { %1553 = vmatpush.bf16.msrb.mxu3 %v2096_v27  ;;  %v1708_v27 = vor.u32 %v2408_v21, %v1707_v20  ;;  %1600 = vst [vmem:[%s2747_s3 + $0x8] sm:$0xff] %v1588_v24  ;;  %v1712_v29 = vor.u32 %v2396_v22, %v1709_v23  ;;  %v258_v20 = vperm.slane %v238_v1, 7 }
  0xbf   :  { %1515 = vmatpush.bf16.msrb.mxu0 %v1988_v33  ;;  %1528 = vmatpush.bf16.msrb.mxu1 %v1992_v36 }
  0xc0   :  { %1541 = vmatpush.bf16.msrb.mxu2 %v1996_v37  ;;  %v249_v37 = vperm.slane %v2694_v16, 6 }
  0xc1   :  { %1554 = vmatpush.bf16.msrb.mxu3 %v2000_v43 }
  0xc3   :  { %1516 = vmatpush.bf16.msrb.mxu0 %v1892_v51  ;;  %1529 = vmatpush.bf16.msrb.mxu1 %v1896_v53  ;;  %v251_v51 = vperm.slane %v238_v1, 0 }
  0xc4   :  { %1542 = vmatpush.bf16.msrb.mxu2 %v1900_v54 }
  0xc5   :  { %1555 = vmatpush.bf16.msrb.mxu3 %v1904_v59  ;;  %v254_v59 = vperm.slane %v238_v1, 3 }
  0xc7   :  { %1517 = vmatpush.bf16.msrb.mxu0 %v1796_v7  ;;  %1530 = vmatpush.bf16.msrb.mxu1 %v1800_v11  ;;  %v255_v11 = vperm.slane %v238_v1, 4 }
  0xc8   :  { %1543 = vmatpush.bf16.msrb.mxu2 %v1804_v12  ;;  %v256_v12 = vperm.slane %v238_v1, 5 }
  0xc9   :  { %1556 = vmatpush.bf16.msrb.mxu3 %v1808_v18  ;;  %v257_v18 = vperm.slane %v238_v1, 6 }
  0xcb   :  { %1518 = vmatpush.bf16.msrb.mxu0 %v1700_v25  ;;  %1531 = vmatpush.bf16.msrb.mxu1 %v1704_v26  ;;  %v1312_v33 = vpop.f32.mrf.mxu0  ;;  %v1325_v35 = vpop.f32.mrf.mxu1 }
  0xcc   :  { %1544 = vmatpush.bf16.msrb.mxu2 %v1708_v27  ;;  %v1313_v34 = vadd.f32 %v1312_v33, %v247_v31  ;;  %v1326_v36 = vadd.f32 %v1325_v35, %v248_v32 }
  0xcd   :  { %1557 = vmatpush.bf16.msrb.mxu3 %v1712_v29 }
  0xce   :  { %1519 = vmatmul.bf16.vlgmr.msrb.gmra.mxu0 %v2688_v63  ;;  %1532 = vmatmul.bf16.vlgmr.msrb.gmra.mxu1 %v2688_v63  ;;  %v1567_v38 = vmax.f32 %v1313_v34, 0.0  ;;  %v1568_v40 = vmax.f32 %v1326_v36, 0.0  ;;  %v239_v34 = vld [vmem:[#allocation4 + $0x10] sm:$0xff] }
  0xcf   :  { %1545 = vmatmul.bf16.vlgmr.msrb.gmra.mxu2 %v2688_v63  ;;  %v259_v35 = vperm.slane %v239_v34, 0  ;;  %v260_v36 = vperm.slane %v239_v34, 1 }
  0xd0   :  { %1558 = vmatmul.bf16.vlgmr.msrb.gmra.mxu3 %v2688_v63  ;;  %v1589_v42 = vpack.c.bf16 %v1568_v40, %v1567_v38 }
  0xd2   :  { %1601 = vst [vmem:[%s2747_s3 + $0x10] sm:$0xff] %v1589_v42 }
  0xd3   :  { %v1351_v44 = vpop.f32.mrf.mxu3  ;;  %v1314_v46 = vpop.f32.mrf.mxu0 }
  0xd4   :  { %v1338_v41 = vpop.f32.mrf.mxu2  ;;  %v1352_v45 = vadd.f32 %v1351_v44, %v250_v39  ;;  %v1327_v48 = vpop.f32.mrf.mxu1 }
  0xd5   :  { %v1339_v43 = vadd.f32 %v1338_v41, %v249_v37  ;;  %v261_v41 = vperm.slane %v239_v34, 2 }
  0xd6   :  { %v1570_v47 = vmax.f32 %v1352_v45, 0.0 }
  0xd7   :  { %v1569_v63 = vmax.f32 %v1339_v43, 0.0  ;;  %v262_v43 = vperm.slane %v239_v34, 3 }
  0xd9   :  { %v1590_v49 = vpack.c.bf16 %v1570_v47, %v1569_v63 }
  0xdb   :  { %1602 = vst [vmem:[%s2747_s3 + $0x18] sm:$0xff] %v1590_v49  ;;  %v1353_v50 = vpop.f32.mrf.mxu3 }
  0xdc   :  { %v1340_v16 = vpop.f32.mrf.mxu2 }
  0xeb   :  { %v1364_v53 = vpop.f32.mrf.mxu0  ;;  %v1377_v55 = vpop.f32.mrf.mxu1 }
  0xec   :  { %v1365_v54 = vadd.f32 %v1364_v53, %v251_v51  ;;  %v1378_v56 = vadd.f32 %v1377_v55, %v252_v52  ;;  %v264_v55 = vperm.slane %v239_v34, 5 }
  0xee   :  { %v1571_v58 = vmax.f32 %v1365_v54, 0.0  ;;  %v1572_v60 = vmax.f32 %v1378_v56, 0.0  ;;  %v263_v54 = vperm.slane %v239_v34, 4 }
  0xf0   :  { %v1591_v62 = vpack.c.bf16 %v1572_v60, %v1571_v58 }
  0xf2   :  { %1603 = vst [vmem:[%s2747_s3 + $0x20] sm:$0xff] %v1591_v62  ;;  %v265_v62 = vperm.slane %v239_v34, 6 }
  0xf3   :  { %v1403_v2 = vpop.f32.mrf.mxu3  ;;  %v1366_v5 = vpop.f32.mrf.mxu0 }
  0xf4   :  { %v1390_v61 = vpop.f32.mrf.mxu2  ;;  %v1404_v3 = vadd.f32 %v1403_v2, %v254_v59  ;;  %v1379_v7 = vpop.f32.mrf.mxu1 }
  0xf5   :  { %v1391_v0 = vadd.f32 %v1390_v61, %v253_v57 }
  0xf6   :  { %v1574_v6 = vmax.f32 %v1404_v3, 0.0 }
  0xf7   :  { %v1573_v4 = vmax.f32 %v1391_v0, 0.0  ;;  %v266_v0 = vperm.slane %v239_v34, 7 }
  0xf9   :  { %v1592_v8 = vpack.c.bf16 %v1574_v6, %v1573_v4 }
  0xfb   :  { %1604 = vst [vmem:[%s2747_s3 + $0x28] sm:$0xff] %v1592_v8  ;;  %v1405_v10 = vpop.f32.mrf.mxu3 }
  0xfc   :  { %v1392_v9 = vpop.f32.mrf.mxu2 }
 0x10b   :  { %v1416_v13 = vpop.f32.mrf.mxu0  ;;  %v1429_v15 = vpop.f32.mrf.mxu1 }
 0x10c   :  { %v1417_v14 = vadd.f32 %v1416_v13, %v255_v11  ;;  %v1430_v17 = vadd.f32 %v1429_v15, %v256_v12 }
 0x10e   :  { %v1575_v19 = vmax.f32 %v1417_v14, 0.0  ;;  %v1576_v21 = vmax.f32 %v1430_v17, 0.0 }
 0x110   :  { %v1593_v23 = vpack.c.bf16 %v1576_v21, %v1575_v19 }
 0x112   :  { %1605 = vst [vmem:[%s2747_s3 + $0x30] sm:$0xff] %v1593_v23 }
 0x113   :  { %v1455_v25 = vpop.f32.mrf.mxu3  ;;  %v1418_v28 = vpop.f32.mrf.mxu0 }
 0x114   :  { %v1442_v22 = vpop.f32.mrf.mxu2  ;;  %v1456_v26 = vadd.f32 %v1455_v25, %v258_v20  ;;  %v1431_v30 = vpop.f32.mrf.mxu1 }
 0x115   :  { %v1443_v24 = vadd.f32 %v1442_v22, %v257_v18 }
 0x116   :  { %v1578_v29 = vmax.f32 %v1456_v26, 0.0 }
 0x117   :  { %v1577_v27 = vmax.f32 %v1443_v24, 0.0 }
 0x119   :  { %v1594_v31 = vpack.c.bf16 %v1578_v29, %v1577_v27 }
 0x11b   :  { %1606 = vst [vmem:[%s2747_s3 + $0x38] sm:$0xff] %v1594_v31  ;;  %v1457_v33 = vpop.f32.mrf.mxu3 }
 0x11c   :  { %v1444_v32 = vpop.f32.mrf.mxu2 }
 0x12b   :  { %v1468_v37 = vpop.f32.mrf.mxu0  ;;  %v1481_v39 = vpop.f32.mrf.mxu1 }
 0x12c   :  { %v1469_v38 = vadd.f32 %v1468_v37, %v259_v35  ;;  %v1482_v40 = vadd.f32 %v1481_v39, %v260_v36 }
 0x12e   :  { %v1579_v42 = vmax.f32 %v1469_v38, 0.0  ;;  %v1580_v44 = vmax.f32 %v1482_v40, 0.0 }
 0x130   :  { %v1595_v63 = vpack.c.bf16 %v1580_v44, %v1579_v42 }
 0x132   :  { %1607 = vst [vmem:[%s2747_s3 + $0x40] sm:$0xff] %v1595_v63 }
 0x133   :  { %v1507_v47 = vpop.f32.mrf.mxu3  ;;  %v1470_v16 = vpop.f32.mrf.mxu0 }
 0x134   :  { %v1494_v45 = vpop.f32.mrf.mxu2  ;;  %v1508_v48 = vadd.f32 %v1507_v47, %v262_v43  ;;  %v1483_v1 = vpop.f32.mrf.mxu1 }
 0x135   :  { %v1495_v46 = vadd.f32 %v1494_v45, %v261_v41 }
 0x136   :  { %v1582_v50 = vmax.f32 %v1508_v48, 0.0 }
 0x137   :  { %v1581_v49 = vmax.f32 %v1495_v46, 0.0 }
 0x139   :  { %v1596_v51 = vpack.c.bf16 %v1582_v50, %v1581_v49 }
 0x13b   :  { %1608 = vst [vmem:[%s2747_s3 + $0x48] sm:$0xff] %v1596_v51  ;;  %v1509_v53 = vpop.f32.mrf.mxu3 }
 0x13c   :  { %v1496_v52 = vpop.f32.mrf.mxu2 }
 0x14b   :  { %v1520_v56 = vpop.f32.mrf.mxu0  ;;  %v1533_v58 = vpop.f32.mrf.mxu1 }
 0x14c   :  { %v1521_v57 = vadd.f32 %v1520_v56, %v263_v54  ;;  %v1534_v59 = vadd.f32 %v1533_v58, %v264_v55 }
 0x14e   :  { %v1583_v60 = vmax.f32 %v1521_v57, 0.0  ;;  %v1584_v61 = vmax.f32 %v1534_v59, 0.0 }
 0x150   :  { %v1597_v2 = vpack.c.bf16 %v1584_v61, %v1583_v60 }
 0x152   :  { %v1546_v3 = vpop.f32.mrf.mxu2  ;;  %1609 = vst [vmem:[%s2747_s3 + $0x50] sm:$0xff] %v1597_v2 }
 0x153   :  { %v1547_v4 = vadd.f32 %v1546_v3, %v265_v62  ;;  %v1559_v5 = vpop.f32.mrf.mxu3  ;;  %v1522_v6 = vpop.f32.mrf.mxu0 }
 0x154   :  { %v1560_v7 = vadd.f32 %v1559_v5, %v266_v0  ;;  %v1535_v8 = vpop.f32.mrf.mxu1 }
 0x155   :  { %v1585_v9 = vmax.f32 %v1547_v4, 0.0 }
 0x156   :  { %v1586_v10 = vmax.f32 %v1560_v7, 0.0 }
 0x158   :  { %v1598_v11 = vpack.c.bf16 %v1586_v10, %v1585_v9 }
 0x15a   :  { %1610 = vst [vmem:[%s2747_s3 + $0x58] sm:$0xff] %v1598_v11  ;;  %v1548_v12 = vpop.f32.mrf.mxu2 }
 0x15b   :  { %v1561_v13 = vpop.f32.mrf.mxu3 }
 0x15c   :  { %1615 = vsyncpa [#allocation3], 1 }
 0x15d   :  { %1616 = vsyncpa [#allocation5], 1 }

// kernel: netG_forward.5
= control target key start
LH: loop header
LB: loop body
LE: loop exit
PB: predicated region body
PF: predicated region fallthrough
CT: control target
= control target key end

     0   :  { %s3779_s1 = inlined_call_operand.vmem [shape: bf16[768,384], index: 1, kind: input, shape index: {}]   ;;  %s3780_s0 = inlined_call_operand.vmem [shape: bf16[56,768], index: 0, kind: input, shape index: {}]   ;;  %s3781_s2 = inlined_call_operand.vmem [shape: f32[1,384], index: 2, kind: input, shape index: {}]   ;;  %s3782_s3 = inlined_call_operand.vmem [shape: bf16[56,384], index: 3, kind: output, shape index: {}]  }
   0x1   :  { %v1829_v0 = vld [vmem:[%s3779_s1 + $0xa8] sm:$0xf]  ;;  %v2359_v1 = vld [vmem:[%s3779_s1 + $0xb0] sm:$0xf0]  ;;  %v1817_v5 = vld [vmem:[%s3779_s1 + $0x90] sm:$0xf] }
   0x2   :  { %v1925_v2 = vld [vmem:[%s3779_s1 + $0x168] sm:$0xf]  ;;  %v1830_v3 = vor.u32 %v2359_v1, %v1829_v0  ;;  %v2383_v4 = vld [vmem:[%s3779_s1 + $0x170] sm:$0xf0]  ;;  %v2356_v6 = vld [vmem:[%s3779_s1 + $0x98] sm:$0xf0] }
   0x3   :  { %v1926_v7 = vor.u32 %v2383_v4, %v1925_v2  ;;  %v1913_v8 = vld [vmem:[%s3779_s1 + $0x150] sm:$0xf]  ;;  %v2380_v9 = vld [vmem:[%s3779_s1 + $0x158] sm:$0xf0]  ;;  %v1818_v10 = vor.u32 %v2356_v6, %v1817_v5  ;;  %v1805_v12 = vld [vmem:[%s3779_s1 + $0x78] sm:$0xf] }
   0x4   :  { %2481 = vmatpush.bf16.msra.mxu2 %v1830_v3  ;;  %1114 = vmatpush.bf16.msra.mxu0 %v1830_v3  ;;  %v1914_v11 = vor.u32 %v2380_v9, %v1913_v8  ;;  %v2353_v13 = vld [vmem:[%s3779_s1 + $0x80] sm:$0xf0]  ;;  %v1901_v14 = vld [vmem:[%s3779_s1 + $0x138] sm:$0xf]  ;;  %v1793_v18 = vld [vmem:[%s3779_s1 + $0x60] sm:$0xf] }
   0x5   :  { %2489 = vmatpush.bf16.msra.mxu3 %v1926_v7  ;;  %1142 = vmatpush.bf16.msra.mxu1 %v1926_v7  ;;  %v2377_v15 = vld [vmem:[%s3779_s1 + $0x140] sm:$0xf0]  ;;  %v1806_v16 = vor.u32 %v2353_v13, %v1805_v12  ;;  %v2350_v19 = vld [vmem:[%s3779_s1 + $0x68] sm:$0xf0]  ;;  %v1889_v20 = vld [vmem:[%s3779_s1 + $0x120] sm:$0xf] }
   0x6   :  { %v1902_v17 = vor.u32 %v2377_v15, %v1901_v14  ;;  %v2374_v21 = vld [vmem:[%s3779_s1 + $0x128] sm:$0xf0]  ;;  %v1794_v22 = vor.u32 %v2350_v19, %v1793_v18  ;;  %v1781_v24 = vld [vmem:[%s3779_s1 + $0x48] sm:$0xf]  ;;  %v2347_v25 = vld [vmem:[%s3779_s1 + $0x50] sm:$0xf0] }
   0x7   :  { %v1890_v23 = vor.u32 %v2374_v21, %v1889_v20  ;;  %v1877_v26 = vld [vmem:[%s3779_s1 + $0x108] sm:$0xf]  ;;  %v2371_v27 = vld [vmem:[%s3779_s1 + $0x110] sm:$0xf0]  ;;  %v1782_v28 = vor.u32 %v2347_v25, %v1781_v24  ;;  %v1769_v30 = vld [vmem:[%s3779_s1 + $0x30] sm:$0xf] }
   0x8   :  { %2482 = vmatpush.bf16.msra.mxu2 %v1818_v10  ;;  %1115 = vmatpush.bf16.msra.mxu0 %v1818_v10  ;;  %v1878_v29 = vor.u32 %v2371_v27, %v1877_v26  ;;  %v2344_v31 = vld [vmem:[%s3779_s1 + $0x38] sm:$0xf0]  ;;  %v1865_v32 = vld [vmem:[%s3779_s1 + $0xf0] sm:$0xf]  ;;  %v1757_v36 = vld [vmem:[%s3779_s1 + $0x18] sm:$0xf] }
   0x9   :  { %2490 = vmatpush.bf16.msra.mxu3 %v1914_v11  ;;  %1143 = vmatpush.bf16.msra.mxu1 %v1914_v11  ;;  %v2368_v33 = vld [vmem:[%s3779_s1 + $0xf8] sm:$0xf0]  ;;  %v1770_v34 = vor.u32 %v2344_v31, %v1769_v30  ;;  %v2341_v37 = vld [vmem:[%s3779_s1 + $0x20] sm:$0xf0]  ;;  %v1853_v38 = vld [vmem:[%s3779_s1 + $0xd8] sm:$0xf] }
   0xa   :  { %v1866_v35 = vor.u32 %v2368_v33, %v1865_v32  ;;  %v2365_v39 = vld [vmem:[%s3779_s1 + $0xe0] sm:$0xf0]  ;;  %v1758_v40 = vor.u32 %v2341_v37, %v1757_v36  ;;  %v1745_v41 = vld [vmem:[%s3779_s1] sm:$0xf]  ;;  %v2338_v43 = vld [vmem:[%s3779_s1 + $0x8] sm:$0xf0] }
   0xb   :  { %v1854_v42 = vor.u32 %v2365_v39, %v1853_v38  ;;  %v1841_v44 = vld [vmem:[%s3779_s1 + $0xc0] sm:$0xf]  ;;  %v2362_v45 = vld [vmem:[%s3779_s1 + $0xc8] sm:$0xf0]  ;;  %v2334_v47 = vld [vmem:[%s3780_s0 + $0x74] sm:$0xf0]  ;;  %v1746_v52 = vor.u32 %v2338_v43, %v1745_v41 }
   0xc   :  { %2483 = vmatpush.bf16.msra.mxu2 %v1806_v16  ;;  %1116 = vmatpush.bf16.msra.mxu0 %v1806_v16  ;;  %v1721_v46 = vld [vmem:[%s3780_s0 + $0x60] sm:$0xf]  ;;  %v2021_v48 = vld [vmem:[%s3779_s1 + $0x228] sm:$0xf]  ;;  %v2407_v49 = vld [vmem:[%s3779_s1 + $0x230] sm:$0xf0]  ;;  %v1842_v56 = vor.u32 %v2362_v45, %v1841_v44 }
   0xd   :  { %2491 = vmatpush.bf16.msra.mxu3 %v1902_v17  ;;  %1144 = vmatpush.bf16.msra.mxu1 %v1902_v17  ;;  %v2117_v50 = vld [vmem:[%s3779_s1 + $0x2e8] sm:$0xf]  ;;  %v2431_v51 = vld [vmem:[%s3779_s1 + $0x2f0] sm:$0xf0]  ;;  %v2331_v53 = vld [vmem:[%s3780_s0 + $0x64] sm:$0xf]  ;;  %v2022_v60 = vor.u32 %v2407_v49, %v2021_v48  ;;  %v2658_v1 = vor.u32 %v2334_v47, %v1721_v46 }
   0xe   :  { %v1673_v54 = vld [vmem:[%s3780_s0] sm:$0xf]  ;;  %v2322_v55 = vld [vmem:[%s3780_s0 + $0x14] sm:$0xf0]  ;;  %v1723_v57 = vld [vmem:[%s3780_s0 + $0x78] sm:$0xf0]  ;;  %v2118_v61 = vor.u32 %v2431_v51, %v2117_v50 }
   0xf   :  { %v2213_v58 = vld [vmem:[%s3779_s1 + $0x3a8] sm:$0xf]  ;;  %v2455_v59 = vld [vmem:[%s3779_s1 + $0x3b0] sm:$0xf0]  ;;  %v2319_v62 = vld [vmem:[%s3780_s0 + $0x4] sm:$0xf]  ;;  %v2660_v2 = vor.u32 %v2322_v55, %v1673_v54  ;;  %v2671_v6 = vor.u32 %v2331_v53, %v1723_v57 }
  0x10   :  { %2484 = vmatpush.bf16.msra.mxu2 %v1794_v22  ;;  %1117 = vmatpush.bf16.msra.mxu0 %v1794_v22  ;;  %v1675_v63 = vld [vmem:[%s3780_s0 + $0x18] sm:$0xf0]  ;;  %v2009_v0 = vld [vmem:[%s3779_s1 + $0x210] sm:$0xf]  ;;  %v2309_v4 = vld [vmem:[%s3779_s1 + $0x468] sm:$0xf]  ;;  %v2214_v7 = vor.u32 %v2455_v59, %v2213_v58 }
  0x11   :  { %2492 = vmatpush.bf16.msra.mxu3 %v1890_v23  ;;  %1145 = vmatpush.bf16.msra.mxu1 %v1890_v23  ;;  %v2404_v3 = vld [vmem:[%s3779_s1 + $0x218] sm:$0xf0]  ;;  %v2479_v5 = vld [vmem:[%s3779_s1 + $0x470] sm:$0xf0]  ;;  %v2105_v8 = vld [vmem:[%s3779_s1 + $0x2d0] sm:$0xf]  ;;  %v2679_v10 = vor.u32 %v2319_v62, %v1675_v63 }
  0x12   :  { %v2428_v9 = vld [vmem:[%s3779_s1 + $0x2d8] sm:$0xf0]  ;;  %v2201_v11 = vld [vmem:[%s3779_s1 + $0x390] sm:$0xf]  ;;  %v2010_v13 = vor.u32 %v2404_v3, %v2009_v0  ;;  %v2310_v14 = vor.u32 %v2479_v5, %v2309_v4  ;;  %v1997_v15 = vld [vmem:[%s3779_s1 + $0x1f8] sm:$0xf] }
  0x13   :  { %v2452_v12 = vld [vmem:[%s3779_s1 + $0x398] sm:$0xf0]  ;;  %v2106_v16 = vor.u32 %v2428_v9, %v2105_v8  ;;  %v2401_v17 = vld [vmem:[%s3779_s1 + $0x200] sm:$0xf0]  ;;  %v2297_v18 = vld [vmem:[%s3779_s1 + $0x450] sm:$0xf] }
  0x14   :  { %2485 = vmatpush.bf16.msra.mxu2 %v1782_v28  ;;  %1118 = vmatpush.bf16.msra.mxu0 %v1782_v28  ;;  %v2476_v19 = vld [vmem:[%s3779_s1 + $0x458] sm:$0xf0]  ;;  %v2202_v20 = vor.u32 %v2452_v12, %v2201_v11  ;;  %v2093_v21 = vld [vmem:[%s3779_s1 + $0x2b8] sm:$0xf]  ;;  %v2425_v22 = vld [vmem:[%s3779_s1 + $0x2c0] sm:$0xf0]  ;;  %v1998_v25 = vor.u32 %v2401_v17, %v1997_v15 }
  0x15   :  { %2493 = vmatpush.bf16.msra.mxu3 %v1878_v29  ;;  %1146 = vmatpush.bf16.msra.mxu1 %v1878_v29  ;;  %v2189_v23 = vld [vmem:[%s3779_s1 + $0x378] sm:$0xf]  ;;  %v2449_v24 = vld [vmem:[%s3779_s1 + $0x380] sm:$0xf0]  ;;  %v2298_v26 = vor.u32 %v2476_v19, %v2297_v18  ;;  %v1985_v27 = vld [vmem:[%s3779_s1 + $0x1e0] sm:$0xf]  ;;  %v2094_v28 = vor.u32 %v2425_v22, %v2093_v21 }
  0x16   :  { %v2398_v29 = vld [vmem:[%s3779_s1 + $0x1e8] sm:$0xf0]  ;;  %v2285_v30 = vld [vmem:[%s3779_s1 + $0x438] sm:$0xf]  ;;  %v2473_v31 = vld [vmem:[%s3779_s1 + $0x440] sm:$0xf0]  ;;  %v2190_v32 = vor.u32 %v2449_v24, %v2189_v23 }
  0x17   :  { %v2081_v33 = vld [vmem:[%s3779_s1 + $0x2a0] sm:$0xf]  ;;  %v2446_v37 = vld [vmem:[%s3779_s1 + $0x368] sm:$0xf0]  ;;  %v1986_v38 = vor.u32 %v2398_v29, %v1985_v27  ;;  %v2286_v39 = vor.u32 %v2473_v31, %v2285_v30  ;;  %v2395_v43 = vld [vmem:[%s3779_s1 + $0x1d0] sm:$0xf0] }
  0x18   :  { %2486 = vmatpush.bf16.msra.mxu2 %v1770_v34  ;;  %1119 = vmatpush.bf16.msra.mxu0 %v1770_v34  ;;  %v2422_v34 = vld [vmem:[%s3779_s1 + $0x2a8] sm:$0xf0]  ;;  %v2177_v36 = vld [vmem:[%s3779_s1 + $0x360] sm:$0xf]  ;;  %v1697_v48 = vld [vmem:[%s3780_s0 + $0x30] sm:$0xf] }
  0x19   :  { %2494 = vmatpush.bf16.msra.mxu3 %v1866_v35  ;;  %1147 = vmatpush.bf16.msra.mxu1 %v1866_v35  ;;  %v32_v35 = vld [vmem:[%s3780_s0 + $0x90] sm:$0xff]  ;;  %v2082_v41 = vor.u32 %v2422_v34, %v2081_v33  ;;  %v2273_v44 = vld [vmem:[%s3779_s1 + $0x420] sm:$0xf]  ;;  %v2470_v45 = vld [vmem:[%s3779_s1 + $0x428] sm:$0xf0]  ;;  %v2178_v46 = vor.u32 %v2446_v37, %v2177_v36 }
  0x1a   :  { %v293_v47 = vunpack.c.h.b16 %v32_v35  ;;  %v2328_v49 = vld [vmem:[%s3780_s0 + $0x44] sm:$0xf0]  ;;  %v2419_v51 = vld [vmem:[%s3779_s1 + $0x290] sm:$0xf0]  ;;  %v2274_v55 = vor.u32 %v2470_v45, %v2273_v44  ;;  %v1699_v57 = vld [vmem:[%s3780_s0 + $0x48] sm:$0xf0] }
  0x1b   :  { %v2069_v50 = vld [vmem:[%s3779_s1 + $0x288] sm:$0xf]  ;;  %v2443_v53 = vld [vmem:[%s3779_s1 + $0x350] sm:$0xf0]  ;;  %v1961_v58 = vld [vmem:[%s3779_s1 + $0x1b0] sm:$0xf] }
  0x1c   :  { %2487 = vmatpush.bf16.msra.mxu2 %v1758_v40  ;;  %1120 = vmatpush.bf16.msra.mxu0 %v1758_v40  ;;  %v1973_v40 = vld [vmem:[%s3779_s1 + $0x1c8] sm:$0xf]  ;;  %v2467_v63 = vld [vmem:[%s3779_s1 + $0x410] sm:$0xf0]  ;;  %v2794_v0 = vpack.c.b16 %v293_v47, %v293_v47  ;;  %v2070_v4 = vor.u32 %v2419_v51, %v2069_v50  ;;  %v2440_v8 = vld [vmem:[%s3779_s1 + $0x338] sm:$0xf0] }
  0x1d   :  { %2495 = vmatpush.bf16.msra.mxu3 %v1854_v42  ;;  %1148 = vmatpush.bf16.msra.mxu1 %v1854_v42  ;;  %v292_v42 = vunpack.c.l.b16 %v32_v35  ;;  %v1974_v54 = vor.u32 %v2395_v43, %v1973_v40  ;;  %v2261_v62 = vld [vmem:[%s3779_s1 + $0x408] sm:$0xf]  ;;  %v2057_v12 = vld [vmem:[%s3779_s1 + $0x270] sm:$0xf]  ;;  %v2389_v15 = vld [vmem:[%s3779_s1 + $0x1a0] sm:$0xf0] }
  0x1e   :  { %v2262_v11 = vor.u32 %v2467_v63, %v2261_v62  ;;  %v2464_v17 = vld [vmem:[%s3779_s1 + $0x3f8] sm:$0xf0]  ;;  %v2437_v21 = vld [vmem:[%s3779_s1 + $0x320] sm:$0xf0]  ;;  %v2045_v24 = vld [vmem:[%s3779_s1 + $0x258] sm:$0xf] }
  0x1f   :  { %v2781_v59 = vpack.c.b16 %v292_v42, %v292_v42  ;;  %v2386_v27 = vld [vmem:[%s3779_s1 + $0x188] sm:$0xf0]  ;;  %v2461_v29 = vld [vmem:[%s3779_s1 + $0x3e0] sm:$0xf0]  ;;  %v2033_v31 = vld [vmem:[%s3779_s1 + $0x240] sm:$0xf] }
  0x20   :  { %2488 = vmatpush.bf16.msra.mxu2 %v1746_v52  ;;  %1121 = vmatpush.bf16.msra.mxu0 %v1746_v52  ;;  %v2165_v52 = vld [vmem:[%s3779_s1 + $0x348] sm:$0xf]  ;;  %v1831_v33 = vld [vmem:[%s3779_s1 + $0xb4] sm:$0xf0]  ;;  %v2410_v35 = vld [vmem:[%s3779_s1 + $0x248] sm:$0xf0] }
  0x21   :  { %2496 = vmatpush.bf16.msra.mxu3 %v1842_v56  ;;  %1149 = vmatpush.bf16.msra.mxu1 %v1842_v56  ;;  %v2325_v56 = vld [vmem:[%s3780_s0 + $0x34] sm:$0xf]  ;;  %v2166_v3 = vor.u32 %v2443_v53, %v2165_v52  ;;  %v2129_v36 = vld [vmem:[%s3779_s1 + $0x300] sm:$0xf]  ;;  %v2434_v37 = vld [vmem:[%s3779_s1 + $0x308] sm:$0xf0] }
  0x22   :  { %v2796_v5 = vor.u32 %v2325_v56, %v1699_v57  ;;  %v1681_v40 = vld [vmem:[%s3780_s0 + $0x8] sm:$0xf]  ;;  %v2225_v42 = vld [vmem:[%s3779_s1 + $0x3c0] sm:$0xf]  ;;  %v2406_v43 = vld [vmem:[%s3779_s1 + $0x22c] sm:$0xf]  ;;  %v2130_v51 = vor.u32 %v2434_v37, %v2129_v36 }
  0x23   :  { %1132 = vmatmul.bf16.vlgmr.msra.gmra.mxu2 %v2658_v1  ;;  %1122 = vmatmul.bf16.vlgmr.msra.gmra.mxu0 %v2660_v2  ;;  %v2023_v44 = vld [vmem:[%s3779_s1 + $0x234] sm:$0xf0]  ;;  %v2320_v45 = vld [vmem:[%s3780_s0 + $0xc] sm:$0xf]  ;;  %v1689_v52 = vld [vmem:[%s3780_s0 + $0x10] sm:$0xf] }
  0x24   :  { %1170 = vmatpush.bf16.msrb.mxu2 %v2022_v60  ;;  %1160 = vmatmul.bf16.vlgmr.msra.gmra.mxu3 %v2671_v6  ;;  %v2783_v60 = vor.u32 %v2328_v49, %v1697_v48  ;;  %v2458_v47 = vld [vmem:[%s3779_s1 + $0x3c8] sm:$0xf0]  ;;  %v1927_v50 = vld [vmem:[%s3779_s1 + $0x174] sm:$0xf0]  ;;  %v2324_v53 = vld [vmem:[%s3780_s0 + $0x24] sm:$0xf0] }
  0x25   :  { %1198 = vmatpush.bf16.msrb.mxu3 %v2118_v61  ;;  %1226 = vmatpush.bf16.msrb.mxu0 %v2214_v7  ;;  %v2392_v61 = vld [vmem:[%s3779_s1 + $0x1b8] sm:$0xf0]  ;;  %v2153_v7 = vld [vmem:[%s3779_s1 + $0x330] sm:$0xf]  ;;  %v2382_v49 = vld [vmem:[%s3779_s1 + $0x16c] sm:$0xf]  ;;  %v2226_v62 = vor.u32 %v2458_v47, %v2225_v42 }
  0x26   :  { %1150 = vmatmul.bf16.vlgmr.msra.gmra.mxu1 %v2679_v10  ;;  %v1962_v9 = vor.u32 %v2392_v61, %v1961_v58  ;;  %v2154_v18 = vor.u32 %v2440_v8, %v2153_v7  ;;  %v1691_v56 = vld [vmem:[%s3780_s0 + $0x28] sm:$0xf0]  ;;  %v2355_v57 = vld [vmem:[%s3779_s1 + $0x94] sm:$0xf]  ;;  %v1819_v58 = vld [vmem:[%s3779_s1 + $0x9c] sm:$0xf0]  ;;  %v2026_v61 = vor.u32 %v2406_v43, %v2023_v44  ;;  %v1930_v63 = vor.u32 %v2382_v49, %v1927_v50 }
  0x27   :  { %1254 = vmatpush.bf16.msrb.mxu1 %v2310_v14  ;;  %v1949_v14 = vld [vmem:[%s3779_s1 + $0x198] sm:$0xf]  ;;  %v2011_v7 = vld [vmem:[%s3779_s1 + $0x21c] sm:$0xf0]  ;;  %v1987_v36 = vld [vmem:[%s3779_s1 + $0x1ec] sm:$0xf0] }
  0x28   :  { %1171 = vmatpush.bf16.msrb.mxu2 %v2010_v13  ;;  %v2416_v13 = vld [vmem:[%s3779_s1 + $0x278] sm:$0xf0]  ;;  %v1950_v22 = vor.u32 %v2389_v15, %v1949_v14  ;;  %v1822_v15 = vor.u32 %v2355_v57, %v1819_v58  ;;  %v1891_v37 = vld [vmem:[%s3779_s1 + $0x12c] sm:$0xf0]  ;;  %v1783_v42 = vld [vmem:[%s3779_s1 + $0x54] sm:$0xf0] }
  0x29   :  { %1199 = vmatpush.bf16.msrb.mxu3 %v2106_v16  ;;  %1227 = vmatpush.bf16.msrb.mxu0 %v2202_v20  ;;  %v2249_v16 = vld [vmem:[%s3779_s1 + $0x3f0] sm:$0xf]  ;;  %v2058_v19 = vor.u32 %v2416_v13, %v2057_v12  ;;  %v2141_v20 = vld [vmem:[%s3779_s1 + $0x318] sm:$0xf]  ;;  %v2430_v12 = vld [vmem:[%s3779_s1 + $0x2ec] sm:$0xf] }
  0x2a   :  { %v2250_v23 = vor.u32 %v2464_v17, %v2249_v16  ;;  %v2142_v30 = vor.u32 %v2437_v21, %v2141_v20  ;;  %v2119_v13 = vld [vmem:[%s3779_s1 + $0x2f4] sm:$0xf0]  ;;  %v2352_v17 = vld [vmem:[%s3779_s1 + $0x7c] sm:$0xf]  ;;  %v2394_v49 = vld [vmem:[%s3779_s1 + $0x1cc] sm:$0xf] }
  0x2b   :  { %1255 = vmatpush.bf16.msrb.mxu1 %v2298_v26  ;;  %v1937_v26 = vld [vmem:[%s3779_s1 + $0x180] sm:$0xf]  ;;  %v2122_v21 = vor.u32 %v2430_v12, %v2119_v13  ;;  %v1705_v44 = vld [vmem:[%s3780_s0 + $0x38] sm:$0xf]  ;;  %v1707_v58 = vld [vmem:[%s3780_s0 + $0x50] sm:$0xf0] }
  0x2c   :  { %1172 = vmatpush.bf16.msrb.mxu2 %v1998_v25  ;;  %v2413_v25 = vld [vmem:[%s3779_s1 + $0x260] sm:$0xf0]  ;;  %v1975_v50 = vld [vmem:[%s3779_s1 + $0x1d4] sm:$0xf0]  ;;  %v2367_v12 = vld [vmem:[%s3779_s1 + $0xf4] sm:$0xf] }
  0x2d   :  { %1200 = vmatpush.bf16.msrb.mxu3 %v2094_v28  ;;  %1228 = vmatpush.bf16.msrb.mxu0 %v2190_v32  ;;  %v2237_v28 = vld [vmem:[%s3779_s1 + $0x3d8] sm:$0xf]  ;;  %v2358_v32 = vld [vmem:[%s3779_s1 + $0xac] sm:$0xf]  ;;  %v2046_v34 = vor.u32 %v2413_v25, %v2045_v24  ;;  %v1999_v24 = vld [vmem:[%s3779_s1 + $0x204] sm:$0xf0] }
  0x2e   :  { %v1834_v48 = vor.u32 %v2358_v32, %v1831_v33  ;;  %v1903_v25 = vld [vmem:[%s3779_s1 + $0x144] sm:$0xf0] }
  0x2f   :  { %1256 = vmatpush.bf16.msrb.mxu1 %v2286_v39  ;;  %v2238_v39 = vor.u32 %v2461_v29, %v2237_v28  ;;  %v2349_v29 = vld [vmem:[%s3779_s1 + $0x64] sm:$0xf] }
  0x30   :  { %1173 = vmatpush.bf16.msrb.mxu2 %v1986_v38  ;;  %v1938_v38 = vor.u32 %v2386_v27, %v1937_v26  ;;  %v2427_v26 = vld [vmem:[%s3779_s1 + $0x2d4] sm:$0xf]  ;;  %v2107_v27 = vld [vmem:[%s3779_s1 + $0x2dc] sm:$0xf0] }
  0x31   :  { %1201 = vmatpush.bf16.msrb.mxu3 %v2082_v41  ;;  %1229 = vmatpush.bf16.msrb.mxu0 %v2178_v46  ;;  %v2323_v41 = vld [vmem:[%s3780_s0 + $0x1c] sm:$0xf0]  ;;  %v1683_v46 = vld [vmem:[%s3780_s0 + $0x20] sm:$0xf0]  ;;  %v2110_v33 = vor.u32 %v2427_v26, %v2107_v27  ;;  %v1759_v26 = vld [vmem:[%s3779_s1 + $0x24] sm:$0xf0] }
  0x32   :  { %v2925_v8 = vor.u32 %v2323_v41, %v1681_v40  ;;  %v2938_v14 = vor.u32 %v2320_v45, %v1683_v46  ;;  %v2346_v41 = vld [vmem:[%s3779_s1 + $0x4c] sm:$0xf]  ;;  %v2329_v45 = vld [vmem:[%s3780_s0 + $0x4c] sm:$0xf0]  ;;  %v2364_v27 = vld [vmem:[%s3779_s1 + $0xdc] sm:$0xf] }
  0x33   :  { %1257 = vmatpush.bf16.msrb.mxu1 %v2274_v55  ;;  %1137 = vmatmul.bf16.gmra.mxu2 %v2781_v59  ;;  %v2034_v55 = vor.u32 %v2410_v35, %v2033_v31  ;;  %v2397_v35 = vld [vmem:[%s3779_s1 + $0x1e4] sm:$0xf]  ;;  %v1786_v57 = vor.u32 %v2346_v41, %v1783_v42  ;;  %v3051_v13 = vor.u32 %v2329_v45, %v1705_v44  ;;  %v2388_v42 = vld [vmem:[%s3779_s1 + $0x19c] sm:$0xf] }
  0x34   :  { %1174 = vmatpush.bf16.msrb.mxu2 %v1974_v54  ;;  %1127 = vmatmul.bf16.gmra.mxu0 %v2783_v60  ;;  %v2321_v54 = vld [vmem:[%s3780_s0 + $0x14] sm:$0xf]  ;;  %v1990_v43 = vor.u32 %v2397_v35, %v1987_v36  ;;  %v2059_v35 = vld [vmem:[%s3779_s1 + $0x27c] sm:$0xf0]  ;;  %v2337_v36 = vld [vmem:[%s3779_s1 + $0x4] sm:$0xf] }
  0x35   :  { %1165 = vmatmul.bf16.gmra.mxu3 %v2794_v0  ;;  %1230 = vmatpush.bf16.msrb.mxu0 %v2166_v3  ;;  %v2379_v3 = vld [vmem:[%s3779_s1 + $0x154] sm:$0xf]  ;;  %v2940_v16 = vor.u32 %v2321_v54, %v1691_v56  ;;  %v2326_v54 = vld [vmem:[%s3780_s0 + $0x3c] sm:$0xf]  ;;  %v2330_v56 = vld [vmem:[%s3780_s0 + $0x54] sm:$0xf0] }
  0x36   :  { %1202 = vmatpush.bf16.msrb.mxu3 %v2070_v4  ;;  %1155 = vmatmul.bf16.gmra.mxu1 %v2796_v5  ;;  %v2403_v4 = vld [vmem:[%s3779_s1 + $0x214] sm:$0xf]  ;;  %v2412_v44 = vld [vmem:[%s3779_s1 + $0x25c] sm:$0xf] }
  0x37   :  { %1258 = vmatpush.bf16.msrb.mxu1 %v2262_v11  ;;  %v1915_v11 = vld [vmem:[%s3779_s1 + $0x15c] sm:$0xf0] }
  0x38   :  { %1175 = vmatpush.bf16.msrb.mxu2 %v1962_v9  ;;  %v2927_v9 = vor.u32 %v2324_v53, %v1689_v52  ;;  %v1918_v20 = vor.u32 %v2379_v3, %v1915_v11  ;;  %v2421_v52 = vld [vmem:[%s3779_s1 + $0x2a4] sm:$0xf]  ;;  %v2083_v53 = vld [vmem:[%s3779_s1 + $0x2ac] sm:$0xf0] }
  0x39   :  { %1231 = vmatpush.bf16.msrb.mxu0 %v2154_v18  ;;  %v1807_v18 = vld [vmem:[%s3779_s1 + $0x84] sm:$0xf0]  ;;  %v2327_v3 = vld [vmem:[%s3780_s0 + $0x44] sm:$0xf]  ;;  %v2086_v11 = vor.u32 %v2421_v52, %v2083_v53  ;;  %v2335_v52 = vld [vmem:[%s3780_s0 + $0x7c] sm:$0xf0] }
  0x3a   :  { %1203 = vmatpush.bf16.msrb.mxu3 %v2058_v19  ;;  %v2014_v19 = vor.u32 %v2403_v4, %v2011_v7  ;;  %v1810_v28 = vor.u32 %v2352_v17, %v1807_v18  ;;  %v1715_v4 = vld [vmem:[%s3780_s0 + $0x58] sm:$0xf0]  ;;  %v1867_v17 = vld [vmem:[%s3779_s1 + $0xfc] sm:$0xf0]  ;;  %v2418_v18 = vld [vmem:[%s3779_s1 + $0x28c] sm:$0xf] }
  0x3b   :  { %1259 = vmatpush.bf16.msrb.mxu1 %v2250_v23  ;;  %v2400_v23 = vld [vmem:[%s3779_s1 + $0x1fc] sm:$0xf]  ;;  %v1737_v53 = vld [vmem:[%s3780_s0 + $0x70] sm:$0xf] }
  0x3c   :  { %1176 = vmatpush.bf16.msrb.mxu2 %v1950_v22  ;;  %v2376_v22 = vld [vmem:[%s3779_s1 + $0x13c] sm:$0xf]  ;;  %v2002_v31 = vor.u32 %v2400_v23, %v1999_v24  ;;  %v1870_v23 = vor.u32 %v2367_v12, %v1867_v17  ;;  %v2454_v17 = vld [vmem:[%s3779_s1 + $0x3ac] sm:$0xf] }
  0x3d   :  { %1232 = vmatpush.bf16.msrb.mxu0 %v2142_v30  ;;  %v1795_v30 = vld [vmem:[%s3779_s1 + $0x6c] sm:$0xf0]  ;;  %v1906_v32 = vor.u32 %v2376_v22, %v1903_v25  ;;  %v3066_v22 = vor.u32 %v2327_v3, %v1715_v4  ;;  %v2340_v25 = vld [vmem:[%s3779_s1 + $0x1c] sm:$0xf] }
  0x3e   :  { %1204 = vmatpush.bf16.msrb.mxu3 %v2046_v34  ;;  %v2373_v34 = vld [vmem:[%s3779_s1 + $0x124] sm:$0xf]  ;;  %v1798_v40 = vor.u32 %v2349_v29, %v1795_v30  ;;  %v1855_v29 = vld [vmem:[%s3779_s1 + $0xe4] sm:$0xf0]  ;;  %v2391_v30 = vld [vmem:[%s3779_s1 + $0x1b4] sm:$0xf] }
  0x3f   :  { %1260 = vmatpush.bf16.msrb.mxu1 %v2238_v39  ;;  %v2095_v39 = vld [vmem:[%s3779_s1 + $0x2c4] sm:$0xf0]  ;;  %v1894_v46 = vor.u32 %v2373_v34, %v1891_v37  ;;  %v2415_v34 = vld [vmem:[%s3779_s1 + $0x274] sm:$0xf] }
  0x40   :  { %1177 = vmatpush.bf16.msrb.mxu2 %v1938_v38  ;;  %v2424_v38 = vld [vmem:[%s3779_s1 + $0x2bc] sm:$0xf]  ;;  %v2062_v37 = vor.u32 %v2415_v34, %v2059_v35  ;;  %v34_v35 = vld [vmem:[%s3780_s0 + $0xa0] sm:$0xff] }
  0x41   :  { %1233 = vmatpush.bf16.msrb.mxu0 %v2130_v51  ;;  %v2098_v47 = vor.u32 %v2424_v38, %v2095_v39  ;;  %v1879_v51 = vld [vmem:[%s3779_s1 + $0x114] sm:$0xf0]  ;;  %v1747_v38 = vld [vmem:[%s3779_s1 + $0xc] sm:$0xf0]  ;;  %v2361_v39 = vld [vmem:[%s3779_s1 + $0xc4] sm:$0xf] }
  0x42   :  { %1205 = vmatpush.bf16.msrb.mxu3 %v2034_v55  ;;  %v1713_v55 = vld [vmem:[%s3780_s0 + $0x40] sm:$0xf]  ;;  %v1750_v41 = vor.u32 %v2337_v36, %v1747_v38  ;;  %v33_v34 = vld [vmem:[%s3780_s0 + $0x98] sm:$0xff] }
  0x43   :  { %1261 = vmatpush.bf16.msrb.mxu1 %v2226_v62  ;;  %1178 = vmatmul.bf16.vlgmr.msrb.gmra.mxu2 %v2925_v8  ;;  %v1771_v62 = vld [vmem:[%s3779_s1 + $0x3c] sm:$0xf0] }
  0x44   :  { %1282 = vmatpush.bf16.msra.mxu2 %v1834_v48  ;;  %1234 = vmatmul.bf16.vlgmr.msrb.gmra.mxu0 %v2927_v9  ;;  %v2370_v48 = vld [vmem:[%s3779_s1 + $0x10c] sm:$0xf] }
  0x45   :  { %1338 = vmatpush.bf16.msra.mxu0 %v2026_v61  ;;  %1206 = vmatmul.bf16.vlgmr.msrb.gmra.mxu3 %v2938_v14  ;;  %v2343_v61 = vld [vmem:[%s3779_s1 + $0x34] sm:$0xf]  ;;  %v1882_v7 = vor.u32 %v2370_v48, %v1879_v51  ;;  %v1939_v48 = vld [vmem:[%s3779_s1 + $0x18c] sm:$0xf0]  ;;  %v1729_v51 = vld [vmem:[%s3780_s0 + $0x68] sm:$0xf] }
  0x46   :  { %1310 = vmatpush.bf16.msra.mxu3 %v1930_v63  ;;  %1262 = vmatmul.bf16.vlgmr.msrb.gmra.mxu1 %v2940_v16  ;;  %v1978_v63 = vor.u32 %v2394_v49, %v1975_v50 }
  0x47   :  { %1366 = vmatpush.bf16.msra.mxu1 %v2122_v21  ;;  %v1774_v21 = vor.u32 %v2343_v61, %v1771_v62  ;;  %v1739_v61 = vld [vmem:[%s3780_s0 + $0x88] sm:$0xf0]  ;;  %v3150_v62 = vor.u32 %v2335_v52, %v1729_v51  ;;  %v2287_v51 = vld [vmem:[%s3779_s1 + $0x444] sm:$0xf0]  ;;  %v1825_v52 = vld [vmem:[%s3779_s1 + $0x98] sm:$0xf] }
  0x48   :  { %1283 = vmatpush.bf16.msra.mxu2 %v1822_v15  ;;  %v3053_v15 = vor.u32 %v2330_v56, %v1713_v55  ;;  %v2332_v56 = vld [vmem:[%s3780_s0 + $0x6c] sm:$0xf] }
  0x49   :  { %1339 = vmatpush.bf16.msra.mxu0 %v2014_v19  ;;  %v2071_v19 = vld [vmem:[%s3779_s1 + $0x294] sm:$0xf0] }
  0x4a   :  { %1311 = vmatpush.bf16.msra.mxu3 %v1918_v20  ;;  %v3064_v20 = vor.u32 %v2326_v54, %v1707_v58  ;;  %v2074_v24 = vor.u32 %v2418_v18, %v2071_v19  ;;  %v2336_v54 = vld [vmem:[%s3780_s0 + $0x84] sm:$0xf0]  ;;  %v2333_v58 = vld [vmem:[%s3780_s0 + $0x74] sm:$0xf]  ;;  %v2215_v18 = vld [vmem:[%s3779_s1 + $0x3b4] sm:$0xf0] }
  0x4b   :  { %1367 = vmatpush.bf16.msra.mxu1 %v2110_v33  ;;  %v3156_v4 = vor.u32 %v2333_v58, %v1739_v61  ;;  %v2478_v19 = vld [vmem:[%s3779_s1 + $0x46c] sm:$0xf]  ;;  %v2445_v58 = vld [vmem:[%s3779_s1 + $0x364] sm:$0xf] }
  0x4c   :  { %1284 = vmatpush.bf16.msra.mxu2 %v1810_v28  ;;  %v1762_v28 = vor.u32 %v2340_v25, %v1759_v26  ;;  %v2203_v25 = vld [vmem:[%s3779_s1 + $0x39c] sm:$0xf0] }
  0x4d   :  { %1340 = vmatpush.bf16.msra.mxu0 %v2002_v31  ;;  %v1963_v31 = vld [vmem:[%s3779_s1 + $0x1bc] sm:$0xf0] }
  0x4e   :  { %1312 = vmatpush.bf16.msra.mxu3 %v1906_v32  ;;  %v1858_v32 = vor.u32 %v2364_v27, %v1855_v29  ;;  %v1966_v33 = vor.u32 %v2391_v30, %v1963_v31  ;;  %v2475_v27 = vld [vmem:[%s3779_s1 + $0x454] sm:$0xf]  ;;  %v1837_v29 = vld [vmem:[%s3779_s1 + $0xb0] sm:$0xf]  ;;  %v2360_v31 = vld [vmem:[%s3779_s1 + $0xb8] sm:$0xf0] }
  0x4f   :  { %1368 = vmatpush.bf16.msra.mxu1 %v2098_v47  ;;  %v2385_v47 = vld [vmem:[%s3779_s1 + $0x184] sm:$0xf] }
  0x50   :  { %1285 = vmatpush.bf16.msra.mxu2 %v1798_v40  ;;  %v1843_v40 = vld [vmem:[%s3779_s1 + $0xcc] sm:$0xf0]  ;;  %v1942_v55 = vor.u32 %v2385_v47, %v1939_v48  ;;  %v2448_v47 = vld [vmem:[%s3779_s1 + $0x37c] sm:$0xf]  ;;  %v2191_v48 = vld [vmem:[%s3779_s1 + $0x384] sm:$0xf0] }
  0x51   :  { %1341 = vmatpush.bf16.msra.mxu0 %v1990_v43  ;;  %v1951_v43 = vld [vmem:[%s3779_s1 + $0x1a4] sm:$0xf0]  ;;  %v1846_v49 = vor.u32 %v2361_v39, %v1843_v40  ;;  %v294_v39 = vunpack.c.l.b16 %v33_v34  ;;  %v296_v40 = vunpack.c.l.b16 %v34_v35 }
  0x52   :  { %1313 = vmatpush.bf16.msra.mxu3 %v1894_v46  ;;  %v1954_v45 = vor.u32 %v2388_v42, %v1951_v43  ;;  %v2047_v46 = vld [vmem:[%s3779_s1 + $0x264] sm:$0xf0]  ;;  %v297_v42 = vunpack.c.h.b16 %v34_v35 }
  0x53   :  { %1369 = vmatpush.bf16.msra.mxu1 %v2086_v11  ;;  %1183 = vmatmul.bf16.gmra.mxu2 %v3051_v13  ;;  %v2050_v50 = vor.u32 %v2412_v44, %v2047_v46  ;;  %v2035_v11 = vld [vmem:[%s3779_s1 + $0x24c] sm:$0xf0]  ;;  %v3210_v43 = vpack.c.b16 %v294_v39, %v294_v39  ;;  %v3212_v44 = vpack.c.b16 %v296_v40, %v296_v40  ;;  %v2439_v39 = vld [vmem:[%s3779_s1 + $0x334] sm:$0xf]  ;;  %v2155_v40 = vld [vmem:[%s3779_s1 + $0x33c] sm:$0xf0] }
  0x54   :  { %1286 = vmatpush.bf16.msra.mxu2 %v1786_v57  ;;  %1239 = vmatmul.bf16.gmra.mxu0 %v3053_v15  ;;  %v1731_v57 = vld [vmem:[%s3780_s0 + $0x80] sm:$0xf0]  ;;  %v3216_v46 = vpack.c.b16 %v297_v42, %v297_v42  ;;  %v2158_v42 = vor.u32 %v2439_v39, %v2155_v40 }
  0x55   :  { %1342 = vmatpush.bf16.msra.mxu0 %v1978_v63  ;;  %1211 = vmatmul.bf16.gmra.mxu3 %v3064_v20  ;;  %v3152_v63 = vor.u32 %v2336_v54, %v1737_v53  ;;  %v3154_v3 = vor.u32 %v2332_v56, %v1731_v57  ;;  %v2357_v53 = vld [vmem:[%s3779_s1 + $0xa0] sm:$0xf0]  ;;  %v1921_v56 = vld [vmem:[%s3779_s1 + $0x158] sm:$0xf] }
  0x56   :  { %1314 = vmatpush.bf16.msra.mxu3 %v1882_v7  ;;  %1267 = vmatmul.bf16.gmra.mxu1 %v3066_v22  ;;  %v2409_v7 = vld [vmem:[%s3779_s1 + $0x244] sm:$0xf] }
  0x57   :  { %1370 = vmatpush.bf16.msra.mxu1 %v2074_v24  ;;  %v2038_v12 = vor.u32 %v2409_v7, %v2035_v11  ;;  %v2451_v24 = vld [vmem:[%s3779_s1 + $0x394] sm:$0xf]  ;;  %v2381_v57 = vld [vmem:[%s3779_s1 + $0x160] sm:$0xf0]  ;;  %v2179_v7 = vld [vmem:[%s3779_s1 + $0x36c] sm:$0xf0] }
  0x58   :  { %1287 = vmatpush.bf16.msra.mxu2 %v1774_v21  ;;  %v2218_v21 = vor.u32 %v2454_v17, %v2215_v18  ;;  %v2206_v30 = vor.u32 %v2451_v24, %v2203_v25  ;;  %v1922_v61 = vor.u32 %v2381_v57, %v1921_v56  ;;  %v2469_v11 = vld [vmem:[%s3779_s1 + $0x424] sm:$0xf]  ;;  %v2182_v17 = vor.u32 %v2445_v58, %v2179_v7  ;;  %v2378_v25 = vld [vmem:[%s3779_s1 + $0x148] sm:$0xf0]  ;;  %v2143_v56 = vld [vmem:[%s3779_s1 + $0x324] sm:$0xf0] }
  0x59   :  { %1343 = vmatpush.bf16.msra.mxu0 %v1966_v33  ;;  %v2384_v33 = vld [vmem:[%s3779_s1 + $0x178] sm:$0xf0]  ;;  %v1777_v7 = vld [vmem:[%s3779_s1 + $0x38] sm:$0xf] }
  0x5a   :  { %1315 = vmatpush.bf16.msra.mxu3 %v1870_v23  ;;  %v2311_v23 = vld [vmem:[%s3779_s1 + $0x474] sm:$0xf0]  ;;  %v2460_v57 = vld [vmem:[%s3779_s1 + $0x3dc] sm:$0xf] }
  0x5b   :  { %1371 = vmatpush.bf16.msra.mxu1 %v2062_v37  ;;  %v2314_v26 = vor.u32 %v2478_v19, %v2311_v23  ;;  %v1838_v37 = vor.u32 %v2360_v31, %v1837_v29  ;;  %v1813_v19 = vld [vmem:[%s3779_s1 + $0x80] sm:$0xf]  ;;  %v2466_v29 = vld [vmem:[%s3779_s1 + $0x40c] sm:$0xf]  ;;  %v2263_v31 = vld [vmem:[%s3779_s1 + $0x414] sm:$0xf0] }
  0x5c   :  { %1288 = vmatpush.bf16.msra.mxu2 %v1762_v28  ;;  %v2299_v28 = vld [vmem:[%s3779_s1 + $0x45c] sm:$0xf0] }
  0x5d   :  { %1344 = vmatpush.bf16.msra.mxu0 %v1954_v45  ;;  %v2302_v36 = vor.u32 %v2475_v27, %v2299_v28  ;;  %v1909_v23 = vld [vmem:[%s3779_s1 + $0x140] sm:$0xf]  ;;  %v2442_v27 = vld [vmem:[%s3779_s1 + $0x34c] sm:$0xf]  ;;  %v2167_v28 = vld [vmem:[%s3779_s1 + $0x354] sm:$0xf0] }
  0x5e   :  { %1316 = vmatpush.bf16.msra.mxu3 %v1858_v32  ;;  %v1933_v32 = vld [vmem:[%s3779_s1 + $0x170] sm:$0xf] }
  0x5f   :  { %1372 = vmatpush.bf16.msra.mxu1 %v2050_v50  ;;  %v1934_v38 = vor.u32 %v2384_v33, %v1933_v32  ;;  %v2194_v50 = vor.u32 %v2448_v47, %v2191_v48  ;;  %v1801_v32 = vld [vmem:[%s3779_s1 + $0x68] sm:$0xf]  ;;  %v2351_v33 = vld [vmem:[%s3779_s1 + $0x70] sm:$0xf0]  ;;  %v2251_v47 = vld [vmem:[%s3779_s1 + $0x3fc] sm:$0xf0] }
  0x60   :  { %1289 = vmatpush.bf16.msra.mxu2 %v1750_v41  ;;  %v295_v41 = vunpack.c.h.b16 %v33_v34  ;;  %v2266_v34 = vor.u32 %v2466_v29, %v2263_v31  ;;  %v1802_v35 = vor.u32 %v2351_v33, %v1801_v32  ;;  %v1789_v48 = vld [vmem:[%s3779_s1 + $0x50] sm:$0xf]  ;;  %v1765_v29 = vld [vmem:[%s3779_s1 + $0x20] sm:$0xf] }
  0x61   :  { %1345 = vmatpush.bf16.msra.mxu0 %v1942_v55  ;;  %v1826_v55 = vor.u32 %v2357_v53, %v1825_v52  ;;  %v1885_v52 = vld [vmem:[%s3779_s1 + $0x110] sm:$0xf]  ;;  %v2372_v53 = vld [vmem:[%s3779_s1 + $0x118] sm:$0xf0]  ;;  %v1861_v33 = vld [vmem:[%s3779_s1 + $0xe0] sm:$0xf] }
  0x62   :  { %1317 = vmatpush.bf16.msra.mxu3 %v1846_v49  ;;  %v3214_v45 = vpack.c.b16 %v295_v41, %v295_v41  ;;  %v2472_v49 = vld [vmem:[%s3779_s1 + $0x43c] sm:$0xf]  ;;  %v2463_v41 = vld [vmem:[%s3779_s1 + $0x3f4] sm:$0xf] }
  0x63   :  { %1188 = vmatmul.bf16.gmra.mxu2 %v3150_v62  ;;  %1373 = vmatpush.bf16.msra.mxu1 %v2038_v12  ;;  %v2290_v54 = vor.u32 %v2472_v49, %v2287_v51  ;;  %v2275_v12 = vld [vmem:[%s3779_s1 + $0x42c] sm:$0xf0]  ;;  %v2348_v49 = vld [vmem:[%s3779_s1 + $0x58] sm:$0xf0] }
  0x64   :  { %1244 = vmatmul.bf16.gmra.mxu0 %v3152_v63  ;;  %1394 = vmatpush.bf16.msrb.mxu2 %v2218_v21  ;;  %v2278_v18 = vor.u32 %v2469_v11, %v2275_v12  ;;  %v2354_v21 = vld [vmem:[%s3779_s1 + $0x88] sm:$0xf0]  ;;  %v1790_v51 = vor.u32 %v2348_v49, %v1789_v48  ;;  %v2345_v11 = vld [vmem:[%s3779_s1 + $0x40] sm:$0xf0] }
  0x65   :  { %1216 = vmatmul.bf16.gmra.mxu3 %v3154_v3  ;;  %1450 = vmatpush.bf16.msrb.mxu0 %v1838_v37  ;;  %v1814_v24 = vor.u32 %v2354_v21, %v1813_v19  ;;  %v2375_v37 = vld [vmem:[%s3779_s1 + $0x130] sm:$0xf0]  ;;  %v2369_v19 = vld [vmem:[%s3779_s1 + $0x100] sm:$0xf0]  ;;  %v3353_v21 = vld [vmem:[%s3781_s2] sm:$0x7] }
  0x66   :  { %1272 = vmatmul.bf16.gmra.mxu1 %v3156_v4  ;;  %1422 = vmatpush.bf16.msrb.mxu3 %v2314_v26  ;;  %v1910_v26 = vor.u32 %v2378_v25, %v1909_v23  ;;  %v2131_v25 = vld [vmem:[%s3779_s1 + $0x30c] sm:$0xf0] }
  0x67   :  { %1478 = vmatpush.bf16.msrb.mxu1 %v1934_v38 }
  0x68   :  { %1395 = vmatpush.bf16.msrb.mxu2 %v2206_v30  ;;  %v2170_v30 = vor.u32 %v2442_v27, %v2167_v28  ;;  %v2227_v28 = vld [vmem:[%s3779_s1 + $0x3cc] sm:$0xf0] }
  0x69   :  { %1451 = vmatpush.bf16.msrb.mxu0 %v1826_v55  ;;  %v2436_v55 = vld [vmem:[%s3779_s1 + $0x31c] sm:$0xf] }
  0x6a   :  { %1423 = vmatpush.bf16.msrb.mxu3 %v2302_v36  ;;  %v1897_v36 = vld [vmem:[%s3779_s1 + $0x128] sm:$0xf]  ;;  %v2146_v58 = vor.u32 %v2436_v55, %v2143_v56  ;;  %v2432_v55 = vld [vmem:[%s3779_s1 + $0x2f8] sm:$0xf0] }
  0x6b   :  { %1479 = vmatpush.bf16.msrb.mxu1 %v1922_v61  ;;  %v1898_v38 = vor.u32 %v2375_v37, %v1897_v36  ;;  %v2239_v61 = vld [vmem:[%s3779_s1 + $0x3e4] sm:$0xf0]  ;;  %v3380_v36 = vperm.slane %v3353_v21, 0 }
  0x6c   :  { %1396 = vmatpush.bf16.msrb.mxu2 %v2194_v50  ;;  %v2254_v50 = vor.u32 %v2463_v41, %v2251_v47  ;;  %v2242_v12 = vor.u32 %v2460_v57, %v2239_v61  ;;  %v1753_v37 = vld [vmem:[%s3779_s1 + $0x8] sm:$0xf]  ;;  %v2363_v47 = vld [vmem:[%s3779_s1 + $0xd0] sm:$0xf0] }
  0x6d   :  { %1452 = vmatpush.bf16.msrb.mxu0 %v1814_v24  ;;  %v2433_v24 = vld [vmem:[%s3779_s1 + $0x304] sm:$0xf] }
  0x6e   :  { %1424 = vmatpush.bf16.msrb.mxu3 %v2290_v54  ;;  %v1886_v54 = vor.u32 %v2372_v53, %v1885_v52  ;;  %v2134_v27 = vor.u32 %v2433_v24, %v2131_v25  ;;  %v2408_v52 = vld [vmem:[%s3779_s1 + $0x238] sm:$0xf0]  ;;  %v2125_v53 = vld [vmem:[%s3779_s1 + $0x2f0] sm:$0xf]  ;;  %v2113_v24 = vld [vmem:[%s3779_s1 + $0x2d8] sm:$0xf] }
  0x6f   :  { %1480 = vmatpush.bf16.msrb.mxu1 %v1910_v26  ;;  %v2457_v26 = vld [vmem:[%s3779_s1 + $0x3c4] sm:$0xf]  ;;  %v2126_v57 = vor.u32 %v2432_v55, %v2125_v53  ;;  %v2209_v53 = vld [vmem:[%s3779_s1 + $0x398] sm:$0xf] }
  0x70   :  { %1397 = vmatpush.bf16.msrb.mxu2 %v2182_v17  ;;  %v1778_v17 = vor.u32 %v2345_v11, %v1777_v7  ;;  %v2230_v31 = vor.u32 %v2457_v26, %v2227_v28  ;;  %v2221_v28 = vld [vmem:[%s3779_s1 + $0x3b0] sm:$0xf] }
  0x71   :  { %1453 = vmatpush.bf16.msrb.mxu0 %v1802_v35 }
  0x72   :  { %1425 = vmatpush.bf16.msrb.mxu3 %v2278_v18  ;;  %v1873_v18 = vld [vmem:[%s3779_s1 + $0xf8] sm:$0xf] }
  0x73   :  { %1193 = vmatmul.bf16.gmra.mxu2 %v3210_v43  ;;  %1481 = vmatpush.bf16.msrb.mxu1 %v1898_v38  ;;  %v1874_v23 = vor.u32 %v2369_v19, %v1873_v18  ;;  %v2339_v38 = vld [vmem:[%s3779_s1 + $0x10] sm:$0xf0]  ;;  %v2017_v19 = vld [vmem:[%s3779_s1 + $0x218] sm:$0xf] }
  0x74   :  { %1249 = vmatmul.bf16.gmra.mxu0 %v3212_v44  ;;  %1398 = vmatpush.bf16.msrb.mxu2 %v2170_v30  ;;  %v2342_v30 = vld [vmem:[%s3779_s1 + $0x28] sm:$0xf0]  ;;  %v1754_v40 = vor.u32 %v2339_v38, %v1753_v37 }
  0x75   :  { %1221 = vmatmul.bf16.gmra.mxu3 %v3214_v45  ;;  %1454 = vmatpush.bf16.msrb.mxu0 %v1790_v51  ;;  %v1766_v32 = vor.u32 %v2342_v30, %v1765_v29  ;;  %v2029_v51 = vld [vmem:[%s3779_s1 + $0x230] sm:$0xf]  ;;  %v2456_v29 = vld [vmem:[%s3779_s1 + $0x3b8] sm:$0xf0] }
  0x76   :  { %1277 = vmatmul.bf16.gmra.mxu1 %v3216_v46  ;;  %1426 = vmatpush.bf16.msrb.mxu3 %v2266_v34  ;;  %v2366_v34 = vld [vmem:[%s3779_s1 + $0xe8] sm:$0xf0] }
  0x77   :  { %1482 = vmatpush.bf16.msrb.mxu1 %v1886_v54  ;;  %v1862_v35 = vor.u32 %v2366_v34, %v1861_v33  ;;  %v2030_v54 = vor.u32 %v2408_v52, %v2029_v51  ;;  %v2222_v33 = vor.u32 %v2456_v29, %v2221_v28  ;;  %v2426_v52 = vld [vmem:[%s3779_s1 + $0x2c8] sm:$0xf0]  ;;  %v2089_v29 = vld [vmem:[%s3779_s1 + $0x2a8] sm:$0xf] }
  0x78   :  { %1399 = vmatpush.bf16.msrb.mxu2 %v2158_v42  ;;  %v1849_v42 = vld [vmem:[%s3779_s1 + $0xc8] sm:$0xf] }
  0x79   :  { %1455 = vmatpush.bf16.msrb.mxu0 %v1778_v17  ;;  %v1850_v49 = vor.u32 %v2363_v47, %v1849_v42  ;;  %v2005_v47 = vld [vmem:[%s3779_s1 + $0x200] sm:$0xf] }
  0x7a   :  { %1427 = vmatpush.bf16.msrb.mxu3 %v2254_v50 }
  0x7b   :  { %1483 = vmatpush.bf16.msrb.mxu1 %v1874_v23  ;;  %v2405_v23 = vld [vmem:[%s3779_s1 + $0x220] sm:$0xf0] }
  0x7c   :  { %1400 = vmatpush.bf16.msrb.mxu2 %v2146_v58  ;;  %v2018_v26 = vor.u32 %v2405_v23, %v2017_v19 }
  0x7d   :  { %1456 = vmatpush.bf16.msrb.mxu0 %v1766_v32 }
  0x7e   :  { %1428 = vmatpush.bf16.msrb.mxu3 %v2242_v12 }
  0x7f   :  { %1484 = vmatpush.bf16.msrb.mxu1 %v1862_v35 }
  0x80   :  { %1401 = vmatpush.bf16.msrb.mxu2 %v2134_v27  ;;  %v2429_v27 = vld [vmem:[%s3779_s1 + $0x2e0] sm:$0xf0] }
  0x81   :  { %1457 = vmatpush.bf16.msrb.mxu0 %v1754_v40  ;;  %v2114_v32 = vor.u32 %v2429_v27, %v2113_v24  ;;  %v2317_v40 = vld [vmem:[%s3779_s1 + $0x470] sm:$0xf]  ;;  %v2305_v24 = vld [vmem:[%s3779_s1 + $0x458] sm:$0xf] }
  0x82   :  { %1429 = vmatpush.bf16.msrb.mxu3 %v2230_v31 }
  0x83   :  { %1290 = vmatmul.bf16.vlgmr.msra.gmra.mxu2 %v2660_v2  ;;  %1485 = vmatpush.bf16.msrb.mxu1 %v1850_v49  ;;  %v2101_v49 = vld [vmem:[%s3779_s1 + $0x2c0] sm:$0xf] }
  0x84   :  { %1346 = vmatmul.bf16.vlgmr.msra.gmra.mxu0 %v2925_v8  ;;  %1506 = vmatpush.bf16.msra.mxu2 %v2030_v54  ;;  %v2453_v54 = vld [vmem:[%s3779_s1 + $0x3a0] sm:$0xf0] }
  0x85   :  { %1318 = vmatmul.bf16.vlgmr.msra.gmra.mxu3 %v2679_v10  ;;  %1562 = vmatpush.bf16.msra.mxu0 %v2222_v33 }
  0x86   :  { %1374 = vmatmul.bf16.vlgmr.msra.gmra.mxu1 %v2938_v14  ;;  %1534 = vmatpush.bf16.msra.mxu3 %v2126_v57  ;;  %v2210_v57 = vor.u32 %v2453_v54, %v2209_v53  ;;  %v2420_v53 = vld [vmem:[%s3779_s1 + $0x298] sm:$0xf0]  ;;  %v2185_v54 = vld [vmem:[%s3779_s1 + $0x368] sm:$0xf] }
  0x88   :  { %1507 = vmatpush.bf16.msra.mxu2 %v2018_v26  ;;  %v1993_v26 = vld [vmem:[%s3779_s1 + $0x1e8] sm:$0xf] }
  0x89   :  { %1563 = vmatpush.bf16.msra.mxu0 %v2210_v57 }
  0x8a   :  { %1535 = vmatpush.bf16.msra.mxu3 %v2114_v32 }
  0x93   :  { %1295 = vmatmul.bf16.gmra.mxu2 %v2783_v60 }
  0x94   :  { %1351 = vmatmul.bf16.gmra.mxu0 %v3051_v13 }
  0x95   :  { %1323 = vmatmul.bf16.gmra.mxu3 %v2796_v5 }
  0x96   :  { %1379 = vmatmul.bf16.gmra.mxu1 %v3064_v20 }
  0xa0   :  { %v1123_v39 = vpop.f32.mrf.mxu0 }
  0xa1   :  { %v1124_v41 = vadd.f32 %v1123_v39, %v3380_v36 }
  0xa3   :  { %v1151_v48 = vpop.f32.mrf.mxu1  ;;  %1300 = vmatmul.bf16.gmra.mxu2 %v2658_v1 }
  0xa4   :  { %v3395_v50 = vadd.f32 %v1151_v48, %v1124_v41  ;;  %1356 = vmatmul.bf16.gmra.mxu0 %v3150_v62  ;;  %v2480_v41 = vld [vmem:[%s3779_s1 + $0x478] sm:$0xf0]  ;;  %v2402_v48 = vld [vmem:[%s3779_s1 + $0x208] sm:$0xf0] }
  0xa5   :  { %1328 = vmatmul.bf16.gmra.mxu3 %v2671_v6  ;;  %v2318_v42 = vor.u32 %v2480_v41, %v2317_v40  ;;  %v2006_v51 = vor.u32 %v2402_v48, %v2005_v47  ;;  %v2474_v47 = vld [vmem:[%s3779_s1 + $0x448] sm:$0xf0] }
  0xa6   :  { %1384 = vmatmul.bf16.gmra.mxu1 %v3154_v3  ;;  %v1133_v56 = vpop.f32.mrf.mxu2 }
  0xa7   :  { %v1134_v58 = vadd.f32 %v1133_v56, %v3380_v36  ;;  %v1161_v61 = vpop.f32.mrf.mxu3  ;;  %1590 = vmatpush.bf16.msra.mxu1 %v2318_v42  ;;  %v2102_v56 = vor.u32 %v2426_v52, %v2101_v49  ;;  %1508 = vmatpush.bf16.msra.mxu2 %v2006_v51  ;;  %v2293_v42 = vld [vmem:[%s3779_s1 + $0x440] sm:$0xf]  ;;  %v1981_v49 = vld [vmem:[%s3779_s1 + $0x1d0] sm:$0xf]  ;;  %v2396_v51 = vld [vmem:[%s3779_s1 + $0x1d8] sm:$0xf0] }
  0xa8   :  { %v1125_v7 = vpop.f32.mrf.mxu0  ;;  %v2294_v48 = vor.u32 %v2474_v47, %v2293_v42  ;;  %v1982_v52 = vor.u32 %v2396_v51, %v1981_v49  ;;  %v2269_v49 = vld [vmem:[%s3779_s1 + $0x410] sm:$0xf]  ;;  %v2468_v51 = vld [vmem:[%s3779_s1 + $0x418] sm:$0xf0] }
  0xa9   :  { %v3414_v11 = vadd.f32 %v1161_v61, %v1134_v58  ;;  %v1126_v12 = vadd.f32 %v1125_v7, %v3380_v36  ;;  %1536 = vmatpush.bf16.msra.mxu3 %v2102_v56 }
  0xab   :  { %v1153_v17 = vpop.f32.mrf.mxu1 }
  0xac   :  { %v3417_v18 = vadd.f32 %v1153_v17, %v1126_v12 }
  0xae   :  { %v1135_v25 = vpop.f32.mrf.mxu2 }
  0xaf   :  { %v1136_v30 = vadd.f32 %v1135_v25, %v3380_v36  ;;  %v1163_v31 = vpop.f32.mrf.mxu3  ;;  %v2477_v25 = vld [vmem:[%s3779_s1 + $0x460] sm:$0xf0] }
  0xb0   :  { %v2306_v28 = vor.u32 %v2477_v25, %v2305_v24 }
  0xb1   :  { %v1128_v34 = vpop.f32.mrf.mxu0  ;;  %v3438_v35 = vadd.f32 %v1163_v31, %v1136_v30  ;;  %v2423_v30 = vld [vmem:[%s3779_s1 + $0x2b0] sm:$0xf0] }
  0xb2   :  { %v1129_v37 = vadd.f32 %v1128_v34, %v3380_v36  ;;  %v2090_v33 = vor.u32 %v2423_v30, %v2089_v29  ;;  %v2197_v34 = vld [vmem:[%s3779_s1 + $0x380] sm:$0xf]  ;;  %1591 = vmatpush.bf16.msra.mxu1 %v2306_v28  ;;  %v2393_v29 = vld [vmem:[%s3779_s1 + $0x1c0] sm:$0xf0]  ;;  %v2065_v30 = vld [vmem:[%s3779_s1 + $0x278] sm:$0xf] }
  0xb3   :  { %v1156_v38 = vpop.f32.mrf.mxu1  ;;  %1305 = vmatmul.bf16.gmra.mxu2 %v2781_v59 }
  0xb4   :  { %v3441_v39 = vadd.f32 %v1156_v38, %v1129_v37  ;;  %1361 = vmatmul.bf16.gmra.mxu0 %v3210_v43  ;;  %v2450_v37 = vld [vmem:[%s3779_s1 + $0x388] sm:$0xf0]  ;;  %1537 = vmatpush.bf16.msra.mxu3 %v2090_v33 }
  0xb5   :  { %1333 = vmatmul.bf16.gmra.mxu3 %v2794_v0  ;;  %v2198_v40 = vor.u32 %v2450_v37, %v2197_v34 }
  0xb6   :  { %1389 = vmatmul.bf16.gmra.mxu1 %v3214_v45  ;;  %v1138_v55 = vpop.f32.mrf.mxu2 }
  0xb7   :  { %v1139_v58 = vadd.f32 %v1138_v55, %v3380_v36  ;;  %1564 = vmatpush.bf16.msra.mxu0 %v2198_v40  ;;  %v2447_v55 = vld [vmem:[%s3779_s1 + $0x370] sm:$0xf0]  ;;  %1592 = vmatpush.bf16.msra.mxu1 %v2294_v48  ;;  %v2444_v40 = vld [vmem:[%s3779_s1 + $0x358] sm:$0xf0] }
  0xb8   :  { %v1166_v61 = vpop.f32.mrf.mxu3 }
  0xb9   :  { %v1130_v7 = vpop.f32.mrf.mxu0  ;;  %v3472_v12 = vadd.f32 %v1166_v61, %v1139_v58  ;;  %v2186_v58 = vor.u32 %v2447_v55, %v2185_v54  ;;  %v2414_v55 = vld [vmem:[%s3779_s1 + $0x268] sm:$0xf0] }
  0xba   :  { %v1131_v17 = vadd.f32 %v1130_v7, %v3380_v36  ;;  %v2399_v36 = vld [vmem:[%s3779_s1 + $0x1f0] sm:$0xf0] }
  0xbb   :  { %v1158_v19 = vpop.f32.mrf.mxu1  ;;  %v1994_v32 = vor.u32 %v2399_v36, %v1993_v26  ;;  %1565 = vmatpush.bf16.msra.mxu0 %v2186_v58  ;;  %v2281_v26 = vld [vmem:[%s3779_s1 + $0x428] sm:$0xf] }
  0xbc   :  { %v3475_v23 = vadd.f32 %v1158_v19, %v1131_v17 }
  0xbd   :  { %1509 = vmatpush.bf16.msra.mxu2 %v1994_v32 }
  0xbe   :  { %v1140_v27 = vpop.f32.mrf.mxu2 }
  0xbf   :  { %v2471_v27 = vld [vmem:[%s3779_s1 + $0x430] sm:$0xf0] }
  0xc0   :  { %v1168_v31 = vpop.f32.mrf.mxu3  ;;  %v2282_v36 = vor.u32 %v2471_v27, %v2281_v26  ;;  %v2257_v27 = vld [vmem:[%s3779_s1 + $0x3f8] sm:$0xf] }
  0xc1   :  { %v1235_v38 = vpop.f32.mrf.mxu0  ;;  %1510 = vmatpush.bf16.msra.mxu2 %v1982_v52  ;;  %v2417_v31 = vld [vmem:[%s3779_s1 + $0x280] sm:$0xf0]  ;;  %v1957_v52 = vld [vmem:[%s3779_s1 + $0x1a0] sm:$0xf] }
  0xc2   :  { %v2066_v37 = vor.u32 %v2417_v31, %v2065_v30  ;;  %1593 = vmatpush.bf16.msra.mxu1 %v2282_v36  ;;  %v1945_v31 = vld [vmem:[%s3779_s1 + $0x188] sm:$0xf] }
  0xc3   :  { %v1263_v41 = vpop.f32.mrf.mxu1  ;;  %1402 = vmatmul.bf16.vlgmr.msrb.gmra.mxu2 %v2927_v9 }
  0xc4   :  { %1458 = vmatmul.bf16.vlgmr.msrb.gmra.mxu0 %v2660_v2  ;;  %v2077_v2 = vld [vmem:[%s3779_s1 + $0x290] sm:$0xf] }
  0xc5   :  { %1430 = vmatmul.bf16.vlgmr.msrb.gmra.mxu3 %v2940_v16  ;;  %v2078_v57 = vor.u32 %v2420_v53, %v2077_v2  ;;  %v2270_v2 = vor.u32 %v2468_v51, %v2269_v49  ;;  %v2390_v53 = vld [vmem:[%s3779_s1 + $0x1a8] sm:$0xf0] }
  0xc6   :  { %1486 = vmatmul.bf16.vlgmr.msrb.gmra.mxu1 %v2679_v10  ;;  %v1179_v56 = vpop.f32.mrf.mxu2  ;;  %v1958_v54 = vor.u32 %v2390_v53, %v1957_v52  ;;  %v2435_v52 = vld [vmem:[%s3779_s1 + $0x310] sm:$0xf0] }
  0xc7   :  { %v1180_v61 = vadd.f32 %v1179_v56, %v3395_v50  ;;  %1538 = vmatpush.bf16.msra.mxu3 %v2078_v57  ;;  %v1969_v50 = vld [vmem:[%s3779_s1 + $0x1b8] sm:$0xf]  ;;  %v2441_v57 = vld [vmem:[%s3779_s1 + $0x340] sm:$0xf0]  ;;  %1594 = vmatpush.bf16.msra.mxu1 %v2270_v2  ;;  %v2137_v2 = vld [vmem:[%s3779_s1 + $0x308] sm:$0xf] }
  0xc8   :  { %v1207_v10 = vpop.f32.mrf.mxu3  ;;  %v1970_v34 = vor.u32 %v2393_v29, %v1969_v50  ;;  %v2161_v56 = vld [vmem:[%s3779_s1 + $0x338] sm:$0xf]  ;;  %v2438_v29 = vld [vmem:[%s3779_s1 + $0x328] sm:$0xf0] }
  0xc9   :  { %v1237_v7 = vpop.f32.mrf.mxu0  ;;  %v1208_v17 = vadd.f32 %v1207_v10, %v1180_v61 }
  0xca   :  { %1511 = vmatpush.bf16.msra.mxu2 %v1970_v34 }
  0xcb   :  { %v1265_v19 = vpop.f32.mrf.mxu1  ;;  %v1236_v24 = vadd.f32 %v1235_v38, %v1208_v17  ;;  %v2173_v38 = vld [vmem:[%s3779_s1 + $0x350] sm:$0xf]  ;;  %1539 = vmatpush.bf16.msra.mxu3 %v2066_v37 }
  0xcc   :  { %v2174_v42 = vor.u32 %v2444_v40, %v2173_v38  ;;  %v2411_v40 = vld [vmem:[%s3779_s1 + $0x250] sm:$0xf0] }
  0xcd   :  { %v3530_v25 = vadd.f32 %v1263_v41, %v1236_v24 }
  0xce   :  { %v1181_v28 = vpop.f32.mrf.mxu2  ;;  %1566 = vmatpush.bf16.msra.mxu0 %v2174_v42  ;;  %1512 = vmatpush.bf16.msra.mxu2 %v1958_v54  ;;  %v2462_v42 = vld [vmem:[%s3779_s1 + $0x3e8] sm:$0xf0]  ;;  %v2459_v54 = vld [vmem:[%s3779_s1 + $0x3d0] sm:$0xf0] }
  0xcf   :  { %v1182_v32 = vadd.f32 %v1181_v28, %v3417_v18 }
  0xd0   :  { %v1209_v33 = vpop.f32.mrf.mxu3 }
  0xd1   :  { %v1240_v41 = vpop.f32.mrf.mxu0  ;;  %v1210_v47 = vadd.f32 %v1209_v33, %v1182_v32  ;;  %v2387_v32 = vld [vmem:[%s3779_s1 + $0x190] sm:$0xf0]  ;;  %v2041_v33 = vld [vmem:[%s3779_s1 + $0x248] sm:$0xf] }
  0xd2   :  { %v1946_v38 = vor.u32 %v2387_v32, %v1945_v31 }
  0xd3   :  { %v1268_v48 = vpop.f32.mrf.mxu1  ;;  %v1238_v18 = vadd.f32 %v1237_v7, %v1210_v47  ;;  %1407 = vmatmul.bf16.gmra.mxu2 %v3053_v15  ;;  %v2162_v7 = vor.u32 %v2441_v57, %v2161_v56 }
  0xd4   :  { %1463 = vmatmul.bf16.gmra.mxu0 %v2783_v60  ;;  %v2053_v60 = vld [vmem:[%s3779_s1 + $0x260] sm:$0xf]  ;;  %1513 = vmatpush.bf16.msra.mxu2 %v1946_v38 }
  0xd5   :  { %1435 = vmatmul.bf16.gmra.mxu3 %v3066_v22  ;;  %v3585_v58 = vadd.f32 %v1265_v19, %v1238_v18  ;;  %v2054_v10 = vor.u32 %v2414_v55, %v2053_v60  ;;  %1567 = vmatpush.bf16.msra.mxu0 %v2162_v7  ;;  %v2465_v19 = vld [vmem:[%s3779_s1 + $0x400] sm:$0xf0]  ;;  %v2042_v18 = vor.u32 %v2411_v40, %v2041_v33 }
  0xd6   :  { %1491 = vmatmul.bf16.gmra.mxu1 %v2796_v5  ;;  %v1184_v61 = vpop.f32.mrf.mxu2  ;;  %v2258_v28 = vor.u32 %v2465_v19, %v2257_v27  ;;  %v2138_v60 = vor.u32 %v2435_v52, %v2137_v2 }
  0xd7   :  { %v1185_v5 = vadd.f32 %v1184_v61, %v3441_v39  ;;  %1540 = vmatpush.bf16.msra.mxu3 %v2054_v10  ;;  %v2149_v39 = vld [vmem:[%s3779_s1 + $0x320] sm:$0xf] }
  0xd8   :  { %v1212_v17 = vpop.f32.mrf.mxu3  ;;  %1595 = vmatpush.bf16.msra.mxu1 %v2258_v28  ;;  %v2150_v34 = vor.u32 %v2438_v29, %v2149_v39 }
  0xd9   :  { %v1242_v24 = vpop.f32.mrf.mxu0  ;;  %v1213_v26 = vadd.f32 %v1212_v17, %v1185_v5 }
  0xda   :  { %1568 = vmatpush.bf16.msra.mxu0 %v2150_v34 }
  0xdb   :  { %v1270_v50 = vpop.f32.mrf.mxu1  ;;  %v1241_v36 = vadd.f32 %v1240_v41, %v1213_v26  ;;  %v2245_v41 = vld [vmem:[%s3779_s1 + $0x3e0] sm:$0xf]  ;;  %1541 = vmatpush.bf16.msra.mxu3 %v2042_v18 }
  0xdc   :  { %v2246_v49 = vor.u32 %v2462_v42, %v2245_v41 }
  0xdd   :  { %v3600_v30 = vadd.f32 %v1268_v48, %v1241_v36 }
  0xde   :  { %v1186_v37 = vpop.f32.mrf.mxu2  ;;  %1596 = vmatpush.bf16.msra.mxu1 %v2246_v49  ;;  %1569 = vmatpush.bf16.msra.mxu0 %v2138_v60 }
  0xdf   :  { %v1187_v47 = vadd.f32 %v1186_v37, %v3475_v23  ;;  %v2233_v23 = vld [vmem:[%s3779_s1 + $0x3c8] sm:$0xf] }
  0xe0   :  { %v1214_v48 = vpop.f32.mrf.mxu3  ;;  %v2234_v56 = vor.u32 %v2459_v54, %v2233_v23 }
  0xe1   :  { %v1245_v51 = vpop.f32.mrf.mxu0  ;;  %v1215_v53 = vadd.f32 %v1214_v48, %v1187_v47 }
  0xe2   :  { %1597 = vmatpush.bf16.msra.mxu1 %v2234_v56 }
  0xe3   :  { %v1273_v55 = vpop.f32.mrf.mxu1  ;;  %v1243_v57 = vadd.f32 %v1242_v24, %v1215_v53  ;;  %1412 = vmatmul.bf16.gmra.mxu2 %v3152_v63 }
  0xe4   :  { %1468 = vmatmul.bf16.gmra.mxu0 %v2658_v1 }
  0xe5   :  { %1440 = vmatmul.bf16.gmra.mxu3 %v3156_v4  ;;  %v3637_v61 = vadd.f32 %v1270_v50, %v1243_v57 }
  0xe6   :  { %1496 = vmatmul.bf16.gmra.mxu1 %v2671_v6  ;;  %v1189_v10 = vpop.f32.mrf.mxu2 }
  0xe7   :  { %v1190_v7 = vadd.f32 %v1189_v10, %v3414_v11 }
  0xe8   :  { %v1217_v5 = vpop.f32.mrf.mxu3 }
  0xe9   :  { %v1247_v17 = vpop.f32.mrf.mxu0  ;;  %v1218_v26 = vadd.f32 %v1217_v5, %v1190_v7 }
  0xeb   :  { %v1275_v27 = vpop.f32.mrf.mxu1  ;;  %v1246_v24 = vadd.f32 %v1245_v51, %v1218_v26 }
  0xed   :  { %v3640_v19 = vadd.f32 %v1273_v55, %v1246_v24 }
  0xee   :  { %v1191_v28 = vpop.f32.mrf.mxu2 }
  0xef   :  { %v1192_v1 = vadd.f32 %v1191_v28, %v3438_v35 }
  0xf0   :  { %v1219_v36 = vpop.f32.mrf.mxu3 }
  0xf1   :  { %v1250_v39 = vpop.f32.mrf.mxu0  ;;  %v1220_v29 = vadd.f32 %v1219_v36, %v1192_v1 }
  0xf3   :  { %v1278_v6 = vpop.f32.mrf.mxu1  ;;  %v1248_v50 = vadd.f32 %v1247_v17, %v1220_v29  ;;  %1417 = vmatmul.bf16.gmra.mxu2 %v3212_v44 }
  0xf4   :  { %1473 = vmatmul.bf16.gmra.mxu0 %v2781_v59 }
  0xf5   :  { %1445 = vmatmul.bf16.gmra.mxu3 %v3216_v46  ;;  %v3647_v11 = vadd.f32 %v1275_v27, %v1248_v50 }
  0xf6   :  { %1501 = vmatmul.bf16.gmra.mxu1 %v2794_v0  ;;  %v1194_v31 = vpop.f32.mrf.mxu2  ;;  %v3655_v0 = vperm.slane %v3353_v21, 1 }
  0xf7   :  { %v1195_v32 = vadd.f32 %v1194_v31, %v3472_v12 }
  0xf8   :  { %v1222_v33 = vpop.f32.mrf.mxu3 }
  0xf9   :  { %v1252_v35 = vpop.f32.mrf.mxu0  ;;  %v1223_v34 = vadd.f32 %v1222_v33, %v1195_v32 }
  0xfb   :  { %v1280_v37 = vpop.f32.mrf.mxu1  ;;  %v1251_v38 = vadd.f32 %v1250_v39, %v1223_v34 }
  0xfd   :  { %v3650_v40 = vadd.f32 %v1278_v6, %v1251_v38 }
  0xfe   :  { %v1196_v41 = vpop.f32.mrf.mxu2 }
 0x100   :  { %v1224_v42 = vpop.f32.mrf.mxu3 }
 0x101   :  { %v1347_v47 = vpop.f32.mrf.mxu0 }
 0x103   :  { %v1375_v59 = vpop.f32.mrf.mxu1  ;;  %1514 = vmatmul.bf16.vlgmr.msra.gmra.mxu2 %v2925_v8 }
 0x104   :  { %1570 = vmatmul.bf16.vlgmr.msra.gmra.mxu0 %v2927_v9 }
 0x105   :  { %1542 = vmatmul.bf16.vlgmr.msra.gmra.mxu3 %v2938_v14 }
 0x106   :  { %1598 = vmatmul.bf16.vlgmr.msra.gmra.mxu1 %v2940_v16  ;;  %v1291_v12 = vpop.f32.mrf.mxu2 }
 0x107   :  { %v1292_v48 = vadd.f32 %v1291_v12, %v3655_v0 }
 0x108   :  { %v1319_v18 = vpop.f32.mrf.mxu3 }
 0x109   :  { %v1349_v49 = vpop.f32.mrf.mxu0  ;;  %v1320_v51 = vadd.f32 %v1319_v18, %v1292_v48 }
 0x10b   :  { %v1377_v2 = vpop.f32.mrf.mxu1  ;;  %v1348_v52 = vadd.f32 %v1347_v47, %v1320_v51  ;;  %v3691_v51 = vperm.slane %v3353_v21, 2 }
 0x10d   :  { %v3660_v53 = vadd.f32 %v1375_v59, %v1348_v52 }
 0x10e   :  { %v1293_v8 = vpop.f32.mrf.mxu2 }
 0x10f   :  { %v1294_v9 = vadd.f32 %v1293_v8, %v3655_v0 }
 0x110   :  { %v1321_v60 = vpop.f32.mrf.mxu3 }
 0x111   :  { %v1352_v23 = vpop.f32.mrf.mxu0  ;;  %v1322_v54 = vadd.f32 %v1321_v60, %v1294_v9 }
 0x113   :  { %v1380_v55 = vpop.f32.mrf.mxu1  ;;  %v1350_v14 = vadd.f32 %v1349_v49, %v1322_v54  ;;  %1519 = vmatmul.bf16.gmra.mxu2 %v3051_v13 }
 0x114   :  { %1575 = vmatmul.bf16.gmra.mxu0 %v3053_v15 }
 0x115   :  { %1547 = vmatmul.bf16.gmra.mxu3 %v3064_v20  ;;  %v3667_v16 = vadd.f32 %v1377_v2, %v1350_v14  ;;  %v1618_v14 = vmax.f32 %v3530_v25, 0.0 }
 0x116   :  { %1603 = vmatmul.bf16.gmra.mxu1 %v3066_v22  ;;  %v1296_v56 = vpop.f32.mrf.mxu2 }
 0x117   :  { %v1297_v57 = vadd.f32 %v1296_v56, %v3655_v0 }
 0x118   :  { %v1324_v10 = vpop.f32.mrf.mxu3 }
 0x119   :  { %v1354_v7 = vpop.f32.mrf.mxu0  ;;  %v1325_v5 = vadd.f32 %v1324_v10, %v1297_v57 }
 0x11b   :  { %v1382_v17 = vpop.f32.mrf.mxu1  ;;  %v1353_v26 = vadd.f32 %v1352_v23, %v1325_v5 }
 0x11d   :  { %v3670_v27 = vadd.f32 %v1380_v55, %v1353_v26 }
 0x11e   :  { %v1298_v24 = vpop.f32.mrf.mxu2 }
 0x11f   :  { %v1299_v13 = vadd.f32 %v1298_v24, %v3655_v0 }
 0x120   :  { %v1326_v15 = vpop.f32.mrf.mxu3 }
 0x121   :  { %v1357_v28 = vpop.f32.mrf.mxu0  ;;  %v1327_v20 = vadd.f32 %v1326_v15, %v1299_v13  ;;  %v1621_v15 = vmax.f32 %v3585_v58, 0.0 }
 0x123   :  { %v1385_v1 = vpop.f32.mrf.mxu1  ;;  %v1355_v22 = vadd.f32 %v1354_v7, %v1327_v20  ;;  %1524 = vmatmul.bf16.gmra.mxu2 %v3150_v62 }
 0x124   :  { %1580 = vmatmul.bf16.gmra.mxu0 %v3152_v63 }
 0x125   :  { %1552 = vmatmul.bf16.gmra.mxu3 %v3154_v3  ;;  %v3677_v36 = vadd.f32 %v1382_v17, %v1355_v22 }
 0x126   :  { %1608 = vmatmul.bf16.gmra.mxu1 %v3156_v4  ;;  %v1301_v39 = vpop.f32.mrf.mxu2 }
 0x127   :  { %v1302_v29 = vadd.f32 %v1301_v39, %v3655_v0 }
 0x128   :  { %v1329_v6 = vpop.f32.mrf.mxu3 }
 0x129   :  { %v1359_v50 = vpop.f32.mrf.mxu0  ;;  %v1330_v31 = vadd.f32 %v1329_v6, %v1302_v29 }
 0x12b   :  { %v1387_v32 = vpop.f32.mrf.mxu1  ;;  %v1358_v33 = vadd.f32 %v1357_v28, %v1330_v31  ;;  %v1624_v31 = vmax.f32 %v3600_v30, 0.0 }
 0x12d   :  { %v3680_v35 = vadd.f32 %v1385_v1, %v1358_v33 }
 0x12e   :  { %v1303_v34 = vpop.f32.mrf.mxu2 }
 0x12f   :  { %v1304_v62 = vadd.f32 %v1303_v34, %v3655_v0 }
 0x130   :  { %v1331_v63 = vpop.f32.mrf.mxu3 }
 0x131   :  { %v1362_v37 = vpop.f32.mrf.mxu0  ;;  %v1332_v3 = vadd.f32 %v1331_v63, %v1304_v62 }
 0x133   :  { %v1390_v38 = vpop.f32.mrf.mxu1  ;;  %v1360_v4 = vadd.f32 %v1359_v50, %v1332_v3  ;;  %1529 = vmatmul.bf16.gmra.mxu2 %v3210_v43 }
 0x134   :  { %1585 = vmatmul.bf16.gmra.mxu0 %v3212_v44 }
 0x135   :  { %1557 = vmatmul.bf16.gmra.mxu3 %v3214_v45  ;;  %v3687_v41 = vadd.f32 %v1387_v32, %v1360_v4  ;;  %v1627_v4 = vmax.f32 %v3637_v61, 0.0 }
 0x136   :  { %1613 = vmatmul.bf16.gmra.mxu1 %v3216_v46  ;;  %v1306_v42 = vpop.f32.mrf.mxu2 }
 0x137   :  { %v1307_v47 = vadd.f32 %v1306_v42, %v3655_v0 }
 0x138   :  { %v1334_v59 = vpop.f32.mrf.mxu3 }
 0x139   :  { %v1364_v12 = vpop.f32.mrf.mxu0  ;;  %v1335_v48 = vadd.f32 %v1334_v59, %v1307_v47 }
 0x13b   :  { %v1392_v18 = vpop.f32.mrf.mxu1  ;;  %v1363_v49 = vadd.f32 %v1362_v37, %v1335_v48 }
 0x13d   :  { %v3693_v43 = vadd.f32 %v1390_v38, %v1363_v49 }
 0x13e   :  { %v1308_v44 = vpop.f32.mrf.mxu2 }
 0x140   :  { %v1336_v2 = vpop.f32.mrf.mxu3 }
 0x141   :  { %v1459_v45 = vpop.f32.mrf.mxu0  ;;  %v1630_v2 = vmax.f32 %v3640_v19, 0.0 }
 0x142   :  { %v1460_v46 = vadd.f32 %v1459_v45, %v3691_v51 }
 0x143   :  { %v1487_v52 = vpop.f32.mrf.mxu1 }
 0x144   :  { %v3696_v8 = vadd.f32 %v1487_v52, %v1460_v46 }
 0x146   :  { %v1403_v9 = vpop.f32.mrf.mxu2 }
 0x147   :  { %v1404_v0 = vadd.f32 %v1403_v9, %v3660_v53 }
 0x148   :  { %v1431_v60 = vpop.f32.mrf.mxu3 }
 0x149   :  { %v1461_v23 = vpop.f32.mrf.mxu0  ;;  %v1432_v54 = vadd.f32 %v1431_v60, %v1404_v0 }
 0x14a   :  { %v1462_v55 = vadd.f32 %v1461_v23, %v3691_v51 }
 0x14b   :  { %v1489_v21 = vpop.f32.mrf.mxu1  ;;  %v1619_v56 = vmax.f32 %v1432_v54, 0.0 }
 0x14c   :  { %v3701_v57 = vadd.f32 %v1489_v21, %v1462_v55  ;;  %v1633_v55 = vmax.f32 %v3647_v11, 0.0 }
 0x14d   :  { %v1639_v10 = vpack.c.bf16 %v1619_v56, %v1618_v14 }
 0x14e   :  { %v1405_v7 = vpop.f32.mrf.mxu2 }
 0x14f   :  { %1653 = vst [vmem:[%s3782_s3] sm:$0xff] %v1639_v10  ;;  %v1406_v5 = vadd.f32 %v1405_v7, %v3667_v16 }
 0x150   :  { %v1433_v53 = vpop.f32.mrf.mxu3 }
 0x151   :  { %v1464_v17 = vpop.f32.mrf.mxu0  ;;  %v1434_v26 = vadd.f32 %v1433_v53, %v1406_v5 }
 0x152   :  { %v1465_v24 = vadd.f32 %v1464_v17, %v3691_v51 }
 0x153   :  { %v1492_v13 = vpop.f32.mrf.mxu1  ;;  %v1622_v25 = vmax.f32 %v1434_v26, 0.0 }
 0x154   :  { %v3709_v28 = vadd.f32 %v1492_v13, %v1465_v24 }
 0x155   :  { %v1641_v20 = vpack.c.bf16 %v1622_v25, %v1621_v15 }
 0x156   :  { %v1408_v1 = vpop.f32.mrf.mxu2 }
 0x157   :  { %1655 = vst [vmem:[%s3782_s3 + $0xc] sm:$0xff] %v1641_v20  ;;  %v1409_v22 = vadd.f32 %v1408_v1, %v3670_v27 }
 0x158   :  { %v1436_v16 = vpop.f32.mrf.mxu3 }
 0x159   :  { %v1466_v39 = vpop.f32.mrf.mxu0  ;;  %v1437_v29 = vadd.f32 %v1436_v16, %v1409_v22 }
 0x15a   :  { %v1467_v6 = vadd.f32 %v1466_v39, %v3691_v51 }
 0x15b   :  { %v1494_v50 = vpop.f32.mrf.mxu1  ;;  %v1625_v58 = vmax.f32 %v1437_v29, 0.0 }
 0x15c   :  { %v3717_v32 = vadd.f32 %v1494_v50, %v1467_v6 }
 0x15d   :  { %v1643_v33 = vpack.c.bf16 %v1625_v58, %v1624_v31 }
 0x15e   :  { %v1410_v34 = vpop.f32.mrf.mxu2 }
 0x15f   :  { %1657 = vst [vmem:[%s3782_s3 + $0x18] sm:$0xff] %v1643_v33  ;;  %v1411_v62 = vadd.f32 %v1410_v34, %v3677_v36 }
 0x160   :  { %v1438_v27 = vpop.f32.mrf.mxu3 }
 0x161   :  { %v1469_v63 = vpop.f32.mrf.mxu0  ;;  %v1439_v37 = vadd.f32 %v1438_v27, %v1411_v62 }
 0x162   :  { %v1470_v3 = vadd.f32 %v1469_v63, %v3691_v51 }
 0x163   :  { %v1497_v38 = vpop.f32.mrf.mxu1  ;;  %v1628_v30 = vmax.f32 %v1439_v37, 0.0 }
 0x164   :  { %v3725_v42 = vadd.f32 %v1497_v38, %v1470_v3 }
 0x165   :  { %v1645_v47 = vpack.c.bf16 %v1628_v30, %v1627_v4 }
 0x166   :  { %v1413_v59 = vpop.f32.mrf.mxu2 }
 0x167   :  { %1659 = vst [vmem:[%s3782_s3 + $0x24] sm:$0xff] %v1645_v47  ;;  %v1414_v12 = vadd.f32 %v1413_v59, %v3680_v35 }
 0x168   :  { %v1441_v36 = vpop.f32.mrf.mxu3 }
 0x169   :  { %v1471_v48 = vpop.f32.mrf.mxu0  ;;  %v1442_v18 = vadd.f32 %v1441_v36, %v1414_v12 }
 0x16a   :  { %v1472_v49 = vadd.f32 %v1471_v48, %v3691_v51 }
 0x16b   :  { %v1499_v44 = vpop.f32.mrf.mxu1  ;;  %v1631_v61 = vmax.f32 %v1442_v18, 0.0 }
 0x16c   :  { %v3733_v45 = vadd.f32 %v1499_v44, %v1472_v49 }
 0x16d   :  { %v1647_v46 = vpack.c.bf16 %v1631_v61, %v1630_v2 }
 0x16e   :  { %v1415_v52 = vpop.f32.mrf.mxu2 }
 0x16f   :  { %1661 = vst [vmem:[%s3782_s3 + $0x30] sm:$0xff] %v1647_v46  ;;  %v1416_v9 = vadd.f32 %v1415_v52, %v3687_v41 }
 0x170   :  { %v1443_v35 = vpop.f32.mrf.mxu3 }
 0x171   :  { %v1474_v0 = vpop.f32.mrf.mxu0  ;;  %v1444_v60 = vadd.f32 %v1443_v35, %v1416_v9 }
 0x172   :  { %v1475_v23 = vadd.f32 %v1474_v0, %v3691_v51  ;;  %v1636_v51 = vmax.f32 %v3650_v40, 0.0 }
 0x173   :  { %v1502_v54 = vpop.f32.mrf.mxu1  ;;  %v1634_v19 = vmax.f32 %v1444_v60, 0.0 }
 0x174   :  { %v3741_v21 = vadd.f32 %v1502_v54, %v1475_v23 }
 0x175   :  { %v1649_v14 = vpack.c.bf16 %v1634_v19, %v1633_v55 }
 0x176   :  { %v1418_v56 = vpop.f32.mrf.mxu2 }
 0x177   :  { %1663 = vst [vmem:[%s3782_s3 + $0x3c] sm:$0xff] %v1649_v14  ;;  %v1419_v10 = vadd.f32 %v1418_v56, %v3693_v43 }
 0x178   :  { %v1446_v41 = vpop.f32.mrf.mxu3 }
 0x179   :  { %v1476_v7 = vpop.f32.mrf.mxu0  ;;  %v1447_v5 = vadd.f32 %v1446_v41, %v1419_v10 }
 0x17b   :  { %v1504_v53 = vpop.f32.mrf.mxu1  ;;  %v1637_v17 = vmax.f32 %v1447_v5, 0.0 }
 0x17d   :  { %v1651_v26 = vpack.c.bf16 %v1637_v17, %v1636_v51 }
 0x17e   :  { %v1420_v11 = vpop.f32.mrf.mxu2 }
 0x17f   :  { %1665 = vst [vmem:[%s3782_s3 + $0x48] sm:$0xff] %v1651_v26 }
 0x180   :  { %v1448_v24 = vpop.f32.mrf.mxu3 }
 0x181   :  { %v1571_v13 = vpop.f32.mrf.mxu0 }
 0x183   :  { %v1599_v15 = vpop.f32.mrf.mxu1 }
 0x186   :  { %v1515_v25 = vpop.f32.mrf.mxu2 }
 0x187   :  { %v1516_v20 = vadd.f32 %v1515_v25, %v3696_v8 }
 0x188   :  { %v1543_v43 = vpop.f32.mrf.mxu3 }
 0x189   :  { %v1573_v1 = vpop.f32.mrf.mxu0  ;;  %v1544_v22 = vadd.f32 %v1543_v43, %v1516_v20 }
 0x18b   :  { %v1601_v16 = vpop.f32.mrf.mxu1  ;;  %v1572_v39 = vadd.f32 %v1571_v13, %v1544_v22 }
 0x18d   :  { %v1600_v29 = vadd.f32 %v1599_v15, %v1572_v39 }
 0x18e   :  { %v1517_v40 = vpop.f32.mrf.mxu2 }
 0x18f   :  { %v1620_v6 = vmax.f32 %v1600_v29, 0.0  ;;  %v1518_v50 = vadd.f32 %v1517_v40, %v3701_v57 }
 0x190   :  { %v1545_v31 = vpop.f32.mrf.mxu3 }
 0x191   :  { %v1576_v58 = vpop.f32.mrf.mxu0  ;;  %v1640_v33 = vpack.c.bf16 %v1620_v6, %v1620_v6  ;;  %v1546_v34 = vadd.f32 %v1545_v31, %v1518_v50 }
 0x193   :  { %v1604_v62 = vpop.f32.mrf.mxu1  ;;  %1654 = vst [vmem:[%s3782_s3 + $0x8] sm:$0xf] %v1640_v33  ;;  %v1574_v8 = vadd.f32 %v1573_v1, %v1546_v34 }
 0x195   :  { %v1602_v27 = vadd.f32 %v1601_v16, %v1574_v8 }
 0x196   :  { %v1520_v63 = vpop.f32.mrf.mxu2 }
 0x197   :  { %v1623_v37 = vmax.f32 %v1602_v27, 0.0  ;;  %v1521_v3 = vadd.f32 %v1520_v63, %v3709_v28 }
 0x198   :  { %v1548_v38 = vpop.f32.mrf.mxu3 }
 0x199   :  { %v1578_v4 = vpop.f32.mrf.mxu0  ;;  %v1642_v30 = vpack.c.bf16 %v1623_v37, %v1623_v37  ;;  %v1549_v47 = vadd.f32 %v1548_v38, %v1521_v3 }
 0x19b   :  { %v1606_v57 = vpop.f32.mrf.mxu1  ;;  %1656 = vst [vmem:[%s3782_s3 + $0x14] sm:$0xf] %v1642_v30  ;;  %v1577_v59 = vadd.f32 %v1576_v58, %v1549_v47 }
 0x19d   :  { %v1605_v12 = vadd.f32 %v1604_v62, %v1577_v59 }
 0x19e   :  { %v1522_v36 = vpop.f32.mrf.mxu2 }
 0x19f   :  { %v1626_v48 = vmax.f32 %v1605_v12, 0.0  ;;  %v1523_v18 = vadd.f32 %v1522_v36, %v3717_v32 }
 0x1a0   :  { %v1550_v49 = vpop.f32.mrf.mxu3 }
 0x1a1   :  { %v1581_v44 = vpop.f32.mrf.mxu0  ;;  %v1644_v2 = vpack.c.bf16 %v1626_v48, %v1626_v48  ;;  %v1551_v61 = vadd.f32 %v1550_v49, %v1523_v18 }
 0x1a3   :  { %v1609_v28 = vpop.f32.mrf.mxu1  ;;  %1658 = vst [vmem:[%s3782_s3 + $0x20] sm:$0xf] %v1644_v2  ;;  %v1579_v46 = vadd.f32 %v1578_v4, %v1551_v61 }
 0x1a5   :  { %v1607_v52 = vadd.f32 %v1606_v57, %v1579_v46 }
 0x1a6   :  { %v1525_v9 = vpop.f32.mrf.mxu2 }
 0x1a7   :  { %v1629_v35 = vmax.f32 %v1607_v52, 0.0  ;;  %v1526_v0 = vadd.f32 %v1525_v9, %v3725_v42 }
 0x1a8   :  { %v1553_v60 = vpop.f32.mrf.mxu3 }
 0x1a9   :  { %v1583_v23 = vpop.f32.mrf.mxu0  ;;  %v1646_v54 = vpack.c.bf16 %v1629_v35, %v1629_v35  ;;  %v1554_v55 = vadd.f32 %v1553_v60, %v1526_v0 }
 0x1ab   :  { %v1611_v32 = vpop.f32.mrf.mxu1  ;;  %1660 = vst [vmem:[%s3782_s3 + $0x2c] sm:$0xf] %v1646_v54  ;;  %v1582_v19 = vadd.f32 %v1581_v44, %v1554_v55 }
 0x1ad   :  { %v1610_v14 = vadd.f32 %v1609_v28, %v1582_v19 }
 0x1ae   :  { %v1527_v56 = vpop.f32.mrf.mxu2 }
 0x1af   :  { %v1632_v10 = vmax.f32 %v1610_v14, 0.0  ;;  %v1528_v41 = vadd.f32 %v1527_v56, %v3733_v45 }
 0x1b0   :  { %v1555_v7 = vpop.f32.mrf.mxu3 }
 0x1b1   :  { %v1586_v5 = vpop.f32.mrf.mxu0  ;;  %v1648_v53 = vpack.c.bf16 %v1632_v10, %v1632_v10  ;;  %v1556_v51 = vadd.f32 %v1555_v7, %v1528_v41 }
 0x1b3   :  { %v1614_v42 = vpop.f32.mrf.mxu1  ;;  %1662 = vst [vmem:[%s3782_s3 + $0x38] sm:$0xf] %v1648_v53  ;;  %v1584_v17 = vadd.f32 %v1583_v23, %v1556_v51 }
 0x1b5   :  { %v1612_v26 = vadd.f32 %v1611_v32, %v1584_v17 }
 0x1b6   :  { %v1530_v11 = vpop.f32.mrf.mxu2 }
 0x1b7   :  { %v1635_v24 = vmax.f32 %v1612_v26, 0.0  ;;  %v1531_v13 = vadd.f32 %v1530_v11, %v3741_v21 }
 0x1b8   :  { %v1558_v15 = vpop.f32.mrf.mxu3 }
 0x1b9   :  { %v1588_v25 = vpop.f32.mrf.mxu0  ;;  %v1650_v20 = vpack.c.bf16 %v1635_v24, %v1635_v24  ;;  %v1559_v43 = vadd.f32 %v1558_v15, %v1531_v13 }
 0x1bb   :  { %v1616_v45 = vpop.f32.mrf.mxu1  ;;  %1664 = vst [vmem:[%s3782_s3 + $0x44] sm:$0xf] %v1650_v20  ;;  %v1587_v1 = vadd.f32 %v1586_v5, %v1559_v43 }
 0x1bd   :  { %v1615_v22 = vadd.f32 %v1614_v42, %v1587_v1 }
 0x1be   :  { %v1532_v16 = vpop.f32.mrf.mxu2 }
 0x1bf   :  { %v1638_v39 = vmax.f32 %v1615_v22, 0.0 }
 0x1c0   :  { %v1560_v29 = vpop.f32.mrf.mxu3 }
 0x1c1   :  { %v1652_v40 = vpack.c.bf16 %v1638_v39, %v1638_v39 }
 0x1c3   :  { %1666 = vst [vmem:[%s3782_s3 + $0x50] sm:$0xf] %v1652_v40 }

// kernel: netG_forward.6
= control target key start
LH: loop header
LB: loop body
LE: loop exit
PB: predicated region body
PF: predicated region fallthrough
CT: control target
= control target key end

     0   :  { %vm962_vm0 = vcmask 1043456   ;;  %vm963_vm1 = vcmask 523268   ;;  %s2203_s1 = inlined_call_operand.vmem [shape: bf16[384,192], index: 1, kind: input, shape index: {}]   ;;  %s2204_s0 = inlined_call_operand.vmem [shape: bf16[168,384], index: 0, kind: input, shape index: {}]   ;;  %s2205_s2 = inlined_call_operand.vmem [shape: f32[1,192], index: 2, kind: input, shape index: {}]   ;;  %s2206_s3 = inlined_call_operand.vmem [shape: bf16[168,192], index: 3, kind: output, shape index: {}]  }
   0x1   :  { %v1168_v0 = vld [vmem:[%s2203_s1 + $0x70] sm:$0xf]  ;;  %v1347_v1 = vld [vmem:[%s2203_s1 + $0x74] sm:$0xf0]  ;;  %v1160_v5 = vld [vmem:[%s2203_s1 + $0x60] sm:$0xf] }
   0x2   :  { %v1232_v2 = vld [vmem:[%s2203_s1 + $0xf0] sm:$0xf]  ;;  %v1169_v3 = vor.u32 %v1347_v1, %v1168_v0  ;;  %v1363_v4 = vld [vmem:[%s2203_s1 + $0xf4] sm:$0xf0]  ;;  %v1345_v6 = vld [vmem:[%s2203_s1 + $0x64] sm:$0xf0] }
   0x3   :  { %v1233_v7 = vor.u32 %v1363_v4, %v1232_v2  ;;  %v1224_v8 = vld [vmem:[%s2203_s1 + $0xe0] sm:$0xf]  ;;  %v1361_v9 = vld [vmem:[%s2203_s1 + $0xe4] sm:$0xf0]  ;;  %v1161_v10 = vor.u32 %v1345_v6, %v1160_v5  ;;  %v1152_v12 = vld [vmem:[%s2203_s1 + $0x50] sm:$0xf] }
   0x4   :  { %521 = vmatpush.bf16.msra.mxu0 %v1169_v3  ;;  %1380 = vmatpush.bf16.msra.mxu2 %v1169_v3  ;;  %v1225_v11 = vor.u32 %v1361_v9, %v1224_v8  ;;  %v1343_v13 = vld [vmem:[%s2203_s1 + $0x54] sm:$0xf0]  ;;  %v1216_v14 = vld [vmem:[%s2203_s1 + $0xd0] sm:$0xf]  ;;  %v1144_v18 = vld [vmem:[%s2203_s1 + $0x40] sm:$0xf] }
   0x5   :  { %584 = vmatpush.bf16.msra.mxu1 %v1233_v7  ;;  %1388 = vmatpush.bf16.msra.mxu3 %v1233_v7  ;;  %v1359_v15 = vld [vmem:[%s2203_s1 + $0xd4] sm:$0xf0]  ;;  %v1153_v16 = vor.u32 %v1343_v13, %v1152_v12  ;;  %v1341_v19 = vld [vmem:[%s2203_s1 + $0x44] sm:$0xf0]  ;;  %v1208_v20 = vld [vmem:[%s2203_s1 + $0xc0] sm:$0xf] }
   0x6   :  { %v1217_v17 = vor.u32 %v1359_v15, %v1216_v14  ;;  %v1357_v21 = vld [vmem:[%s2203_s1 + $0xc4] sm:$0xf0]  ;;  %v1145_v22 = vor.u32 %v1341_v19, %v1144_v18  ;;  %v1136_v24 = vld [vmem:[%s2203_s1 + $0x30] sm:$0xf]  ;;  %v1339_v25 = vld [vmem:[%s2203_s1 + $0x34] sm:$0xf0] }
   0x7   :  { %v1209_v23 = vor.u32 %v1357_v21, %v1208_v20  ;;  %v1200_v26 = vld [vmem:[%s2203_s1 + $0xb0] sm:$0xf]  ;;  %v1355_v27 = vld [vmem:[%s2203_s1 + $0xb4] sm:$0xf0]  ;;  %v1137_v28 = vor.u32 %v1339_v25, %v1136_v24  ;;  %v1128_v30 = vld [vmem:[%s2203_s1 + $0x20] sm:$0xf] }
   0x8   :  { %522 = vmatpush.bf16.msra.mxu0 %v1161_v10  ;;  %1381 = vmatpush.bf16.msra.mxu2 %v1161_v10  ;;  %v1201_v29 = vor.u32 %v1355_v27, %v1200_v26  ;;  %v1337_v31 = vld [vmem:[%s2203_s1 + $0x24] sm:$0xf0]  ;;  %v1192_v32 = vld [vmem:[%s2203_s1 + $0xa0] sm:$0xf]  ;;  %v1120_v36 = vld [vmem:[%s2203_s1 + $0x10] sm:$0xf] }
   0x9   :  { %585 = vmatpush.bf16.msra.mxu1 %v1225_v11  ;;  %1389 = vmatpush.bf16.msra.mxu3 %v1225_v11  ;;  %v1353_v33 = vld [vmem:[%s2203_s1 + $0xa4] sm:$0xf0]  ;;  %v1129_v34 = vor.u32 %v1337_v31, %v1128_v30  ;;  %v1335_v37 = vld [vmem:[%s2203_s1 + $0x14] sm:$0xf0]  ;;  %v1184_v38 = vld [vmem:[%s2203_s1 + $0x90] sm:$0xf] }
   0xa   :  { %v1193_v35 = vor.u32 %v1353_v33, %v1192_v32  ;;  %v1351_v39 = vld [vmem:[%s2203_s1 + $0x94] sm:$0xf0]  ;;  %v1121_v40 = vor.u32 %v1335_v37, %v1120_v36  ;;  %v1112_v41 = vld [vmem:[%s2203_s1] sm:$0xf]  ;;  %v1333_v43 = vld [vmem:[%s2203_s1 + $0x4] sm:$0xf0] }
   0xb   :  { %v1185_v42 = vor.u32 %v1351_v39, %v1184_v38  ;;  %v1176_v44 = vld [vmem:[%s2203_s1 + $0x80] sm:$0xf]  ;;  %v1349_v45 = vld [vmem:[%s2203_s1 + $0x84] sm:$0xf0]  ;;  %v1303_v47 = vld [vmem:[%s2204_s0 + $0x8] sm:$0xf0]  ;;  %v1113_v54 = vor.u32 %v1333_v43, %v1112_v41 }
   0xc   :  { %523 = vmatpush.bf16.msra.mxu0 %v1153_v16  ;;  %1382 = vmatpush.bf16.msra.mxu2 %v1153_v16  ;;  %v992_v46 = vld [vmem:[%s2204_s0] sm:$0xf]  ;;  %v1064_v48 = vld [vmem:[%s2204_s0 + $0x90] sm:$0xf]  ;;  %v1321_v49 = vld [vmem:[%s2204_s0 + $0x98] sm:$0xf0]  ;;  %v1177_v58 = vor.u32 %v1349_v45, %v1176_v44 }
   0xd   :  { %586 = vmatpush.bf16.msra.mxu1 %v1217_v17  ;;  %1390 = vmatpush.bf16.msra.mxu3 %v1217_v17  ;;  %v1362_v50 = vld [vmem:[%s2203_s1 + $0xf4] sm:$0xf]  ;;  %v1234_v51 = vld [vmem:[%s2203_s1 + $0xf8] sm:$0xf0]  ;;  %v1302_v55 = vld [vmem:[%s2204_s0 + $0x4] sm:$0xf]  ;;  %v1563_v3 = vor.u32 %v1303_v47, %v992_v46  ;;  %v1565_v4 = vor.u32 %v1321_v49, %v1064_v48 }
   0xe   :  { %v1378_v52 = vld [vmem:[%s2203_s1 + $0x174] sm:$0xf]  ;;  %v1298_v53 = vld [vmem:[%s2203_s1 + $0x178] sm:$0xf0]  ;;  %v994_v56 = vld [vmem:[%s2204_s0 + $0xc] sm:$0xf0]  ;;  %v1237_v62 = vor.u32 %v1362_v50, %v1234_v51 }
   0xf   :  { %v1320_v57 = vld [vmem:[%s2204_s0 + $0x94] sm:$0xf]  ;;  %v1066_v59 = vld [vmem:[%s2204_s0 + $0x9c] sm:$0xf0]  ;;  %v1170_v61 = vld [vmem:[%s2203_s1 + $0x78] sm:$0xf0]  ;;  %v1301_v63 = vor.u32 %v1378_v52, %v1298_v53  ;;  %v1576_v8 = vor.u32 %v1302_v55, %v994_v56 }
  0x10   :  { %524 = vmatpush.bf16.msra.mxu0 %v1145_v22  ;;  %1383 = vmatpush.bf16.msra.mxu2 %v1145_v22  ;;  %v1346_v60 = vld [vmem:[%s2203_s1 + $0x74] sm:$0xf]  ;;  %v1296_v0 = vld [vmem:[%s2203_s1 + $0x170] sm:$0xf]  ;;  %v1379_v1 = vld [vmem:[%s2203_s1 + $0x174] sm:$0xf0]  ;;  %v1578_v9 = vor.u32 %v1320_v57, %v1066_v59 }
  0x11   :  { %587 = vmatpush.bf16.msra.mxu1 %v1209_v23  ;;  %1391 = vmatpush.bf16.msra.mxu3 %v1209_v23  ;;  %v1360_v2 = vld [vmem:[%s2203_s1 + $0xe4] sm:$0xf]  ;;  %v1226_v5 = vld [vmem:[%s2203_s1 + $0xe8] sm:$0xf0]  ;;  %v1173_v10 = vor.u32 %v1346_v60, %v1170_v61  ;;  %v1297_v11 = vor.u32 %v1379_v1, %v1296_v0  ;;  %v1288_v16 = vld [vmem:[%s2203_s1 + $0x160] sm:$0xf] }
  0x12   :  { %v1376_v6 = vld [vmem:[%s2203_s1 + $0x164] sm:$0xf]  ;;  %v1290_v7 = vld [vmem:[%s2203_s1 + $0x168] sm:$0xf0]  ;;  %v1229_v14 = vor.u32 %v1360_v2, %v1226_v5  ;;  %v1377_v17 = vld [vmem:[%s2203_s1 + $0x164] sm:$0xf0] }
  0x13   :  { %v1344_v12 = vld [vmem:[%s2203_s1 + $0x64] sm:$0xf]  ;;  %v1162_v13 = vld [vmem:[%s2203_s1 + $0x68] sm:$0xf0]  ;;  %v1293_v15 = vor.u32 %v1376_v6, %v1290_v7  ;;  %v1358_v18 = vld [vmem:[%s2203_s1 + $0xd4] sm:$0xf]  ;;  %v1289_v23 = vor.u32 %v1377_v17, %v1288_v16 }
  0x14   :  { %525 = vmatpush.bf16.msra.mxu0 %v1137_v28  ;;  %1384 = vmatpush.bf16.msra.mxu2 %v1137_v28  ;;  %v1218_v19 = vld [vmem:[%s2203_s1 + $0xd8] sm:$0xf0]  ;;  %v1374_v20 = vld [vmem:[%s2203_s1 + $0x154] sm:$0xf]  ;;  %v1165_v22 = vor.u32 %v1344_v12, %v1162_v13  ;;  %v1280_v28 = vld [vmem:[%s2203_s1 + $0x150] sm:$0xf] }
  0x15   :  { %588 = vmatpush.bf16.msra.mxu1 %v1201_v29  ;;  %1392 = vmatpush.bf16.msra.mxu3 %v1201_v29  ;;  %v1282_v21 = vld [vmem:[%s2203_s1 + $0x158] sm:$0xf0]  ;;  %v1342_v24 = vld [vmem:[%s2203_s1 + $0x54] sm:$0xf]  ;;  %v1221_v26 = vor.u32 %v1358_v18, %v1218_v19  ;;  %v1375_v29 = vld [vmem:[%s2203_s1 + $0x154] sm:$0xf0] }
  0x16   :  { %v1154_v25 = vld [vmem:[%s2203_s1 + $0x58] sm:$0xf0]  ;;  %v1285_v27 = vor.u32 %v1374_v20, %v1282_v21  ;;  %v1356_v30 = vld [vmem:[%s2203_s1 + $0xc4] sm:$0xf]  ;;  %v1210_v31 = vld [vmem:[%s2203_s1 + $0xc8] sm:$0xf0] }
  0x17   :  { %v1372_v32 = vld [vmem:[%s2203_s1 + $0x144] sm:$0xf]  ;;  %v1274_v33 = vld [vmem:[%s2203_s1 + $0x148] sm:$0xf0]  ;;  %v1213_v37 = vor.u32 %v1356_v30, %v1210_v31  ;;  %v1373_v41 = vld [vmem:[%s2203_s1 + $0x144] sm:$0xf0] }
  0x18   :  { %526 = vmatpush.bf16.msra.mxu0 %v1129_v34  ;;  %1385 = vmatpush.bf16.msra.mxu2 %v1129_v34  ;;  %v1157_v34 = vor.u32 %v1342_v24, %v1154_v25  ;;  %v1340_v36 = vld [vmem:[%s2203_s1 + $0x44] sm:$0xf]  ;;  %v1277_v38 = vor.u32 %v1372_v32, %v1274_v33  ;;  %v1146_v39 = vld [vmem:[%s2203_s1 + $0x48] sm:$0xf0]  ;;  %v1076_v44 = vld [vmem:[%s2204_s0 + $0xa8] sm:$0xf] }
  0x19   :  { %589 = vmatpush.bf16.msra.mxu1 %v1193_v35  ;;  %1393 = vmatpush.bf16.msra.mxu3 %v1193_v35  ;;  %v1281_v35 = vor.u32 %v1375_v29, %v1280_v28  ;;  %v1306_v43 = vld [vmem:[%s2204_s0 + $0x20] sm:$0xf0]  ;;  %v1324_v45 = vld [vmem:[%s2204_s0 + $0xb0] sm:$0xf0]  ;;  %v1305_v46 = vld [vmem:[%s2204_s0 + $0x1c] sm:$0xf]  ;;  %v1149_v50 = vor.u32 %v1340_v36, %v1146_v39 }
  0x1a   :  { %v1006_v47 = vld [vmem:[%s2204_s0 + $0x24] sm:$0xf0]  ;;  %v1323_v48 = vld [vmem:[%s2204_s0 + $0xac] sm:$0xf]  ;;  %v1078_v49 = vld [vmem:[%s2204_s0 + $0xb4] sm:$0xf0]  ;;  %v1670_v53 = vor.u32 %v1324_v45, %v1076_v44 }
  0x1b   :  { %v1674_v55 = vor.u32 %v1323_v48, %v1078_v49  ;;  %v1338_v56 = vld [vmem:[%s2203_s1 + $0x34] sm:$0xf]  ;;  %v1138_v57 = vld [vmem:[%s2203_s1 + $0x38] sm:$0xf0]  ;;  %v1264_v1 = vld [vmem:[%s2203_s1 + $0x130] sm:$0xf] }
  0x1c   :  { %527 = vmatpush.bf16.msra.mxu0 %v1121_v40  ;;  %1386 = vmatpush.bf16.msra.mxu2 %v1121_v40  ;;  %v1272_v40 = vld [vmem:[%s2203_s1 + $0x140] sm:$0xf]  ;;  %v1141_v59 = vor.u32 %v1338_v56, %v1138_v57  ;;  %v1202_v60 = vld [vmem:[%s2203_s1 + $0xb8] sm:$0xf0]  ;;  %v1370_v61 = vld [vmem:[%s2203_s1 + $0x134] sm:$0xf] }
  0x1d   :  { %590 = vmatpush.bf16.msra.mxu1 %v1185_v42  ;;  %1394 = vmatpush.bf16.msra.mxu3 %v1185_v42  ;;  %v1004_v42 = vld [vmem:[%s2204_s0 + $0x18] sm:$0xf]  ;;  %v1273_v51 = vor.u32 %v1373_v41, %v1272_v40  ;;  %v1336_v5 = vld [vmem:[%s2203_s1 + $0x24] sm:$0xf]  ;;  %v1130_v7 = vld [vmem:[%s2203_s1 + $0x28] sm:$0xf0] }
  0x1e   :  { %v1668_v52 = vor.u32 %v1306_v43, %v1004_v42  ;;  %v1371_v2 = vld [vmem:[%s2203_s1 + $0x134] sm:$0xf0]  ;;  %v1133_v12 = vor.u32 %v1336_v5, %v1130_v7  ;;  %v1368_v16 = vld [vmem:[%s2203_s1 + $0x124] sm:$0xf]  ;;  %v1258_v18 = vld [vmem:[%s2203_s1 + $0x128] sm:$0xf0] }
  0x1f   :  { %v1265_v6 = vor.u32 %v1371_v2, %v1264_v1  ;;  %v1261_v19 = vor.u32 %v1368_v16, %v1258_v18  ;;  %v1016_v20 = vld [vmem:[%s2204_s0 + $0x30] sm:$0xf]  ;;  %v1309_v21 = vld [vmem:[%s2204_s0 + $0x38] sm:$0xf0]  ;;  %v1308_v24 = vld [vmem:[%s2204_s0 + $0x34] sm:$0xf] }
  0x20   :  { %528 = vmatpush.bf16.msra.mxu0 %v1113_v54  ;;  %1387 = vmatpush.bf16.msra.mxu2 %v1113_v54  ;;  %v1672_v54 = vor.u32 %v1305_v46, %v1006_v47  ;;  %v1018_v25 = vld [vmem:[%s2204_s0 + $0x3c] sm:$0xf0]  ;;  %v1752_v28 = vor.u32 %v1309_v21, %v1016_v20  ;;  %v1334_v32 = vld [vmem:[%s2203_s1 + $0x14] sm:$0xf]  ;;  %v1122_v33 = vld [vmem:[%s2203_s1 + $0x18] sm:$0xf0] }
  0x21   :  { %591 = vmatpush.bf16.msra.mxu1 %v1177_v58  ;;  %1395 = vmatpush.bf16.msra.mxu3 %v1177_v58  ;;  %v1354_v58 = vld [vmem:[%s2203_s1 + $0xb4] sm:$0xf]  ;;  %v1756_v30 = vor.u32 %v1308_v24, %v1018_v25  ;;  %v1367_v36 = vld [vmem:[%s2203_s1 + $0x114] sm:$0xf0]  ;;  %v1250_v42 = vld [vmem:[%s2203_s1 + $0x118] sm:$0xf0] }
  0x22   :  { %v1366_v41 = vld [vmem:[%s2203_s1 + $0x114] sm:$0xf]  ;;  %v1240_v43 = vld [vmem:[%s2203_s1 + $0x100] sm:$0xf]  ;;  %v1365_v45 = vld [vmem:[%s2203_s1 + $0x104] sm:$0xf0] }
  0x23   :  { %529 = vmatmul.bf16.vlgmr.msra.gmra.mxu0 %v1563_v3  ;;  %559 = vmatmul.bf16.vlgmr.msra.gmra.mxu2 %v1565_v4  ;;  %v1253_v44 = vor.u32 %v1366_v41, %v1250_v42  ;;  %v1332_v46 = vld [vmem:[%s2203_s1 + $0x4] sm:$0xf]  ;;  %v1114_v47 = vld [vmem:[%s2203_s1 + $0x8] sm:$0xf0]  ;;  %v1241_v48 = vor.u32 %v1365_v45, %v1240_v43  ;;  %v1100_v56 = vld [vmem:[%s2204_s0 + $0xd8] sm:$0xf] }
  0x24   :  { %773 = vmatpush.bf16.msrb.mxu0 %v1237_v62  ;;  %592 = vmatmul.bf16.vlgmr.msra.gmra.mxu1 %v1576_v8  ;;  %v1266_v62 = vld [vmem:[%s2203_s1 + $0x138] sm:$0xf0]  ;;  %v1117_v49 = vor.u32 %v1332_v46, %v1114_v47  ;;  %v1330_v57 = vld [vmem:[%s2204_s0 + $0xe0] sm:$0xf0]  ;;  %v1178_v5 = vld [vmem:[%s2203_s1 + $0x88] sm:$0xf0] }
  0x25   :  { %836 = vmatpush.bf16.msrb.mxu1 %v1301_v63  ;;  %622 = vmatmul.bf16.vlgmr.msra.gmra.mxu3 %v1578_v9  ;;  %v1205_v63 = vor.u32 %v1354_v58, %v1202_v60  ;;  %v1269_v0 = vor.u32 %v1370_v61, %v1266_v62  ;;  %v1311_v58 = vld [vmem:[%s2204_s0 + $0x4c] sm:$0xf]  ;;  %v1329_v60 = vld [vmem:[%s2204_s0 + $0xdc] sm:$0xf]  ;;  %v1102_v61 = vld [vmem:[%s2204_s0 + $0xe4] sm:$0xf0] }
  0x26   :  { %710 = vmatpush.bf16.msrb.mxu3 %v1173_v10  ;;  %647 = vmatpush.bf16.msrb.mxu2 %v1297_v11  ;;  %v1352_v10 = vld [vmem:[%s2203_s1 + $0xa4] sm:$0xf]  ;;  %v1194_v11 = vld [vmem:[%s2203_s1 + $0xa8] sm:$0xf0]  ;;  %v1830_v1 = vor.u32 %v1329_v60, %v1102_v61  ;;  %v1042_v18 = vld [vmem:[%s2204_s0 + $0x6c] sm:$0xf0] }
  0x27   :  { %v1197_v13 = vor.u32 %v1352_v10, %v1194_v11  ;;  %v1348_v2 = vld [vmem:[%s2203_s1 + $0x84] sm:$0xf]  ;;  %v1242_v10 = vld [vmem:[%s2203_s1 + $0x108] sm:$0xf0]  ;;  %v1000_v25 = vld [vmem:[%s2204_s0 + $0x8] sm:$0xf] }
  0x28   :  { %774 = vmatpush.bf16.msrb.mxu0 %v1229_v14  ;;  %v1256_v14 = vld [vmem:[%s2203_s1 + $0x120] sm:$0xf]  ;;  %v1181_v7 = vor.u32 %v1348_v2, %v1178_v5  ;;  %v1318_v24 = vld [vmem:[%s2204_s0 + $0x80] sm:$0xf0]  ;;  %v1313_v41 = vld [vmem:[%s2204_s0 + $0x58] sm:$0xf0] }
  0x29   :  { %837 = vmatpush.bf16.msrb.mxu1 %v1293_v15  ;;  %v1369_v15 = vld [vmem:[%s2203_s1 + $0x124] sm:$0xf0]  ;;  %vm2048_vm2 = vmor %vm963_vm1, %vm962_vm0 }
  0x2a   :  { %711 = vmatpush.bf16.msrb.mxu3 %v1165_v22  ;;  %648 = vmatpush.bf16.msrb.mxu2 %v1289_v23  ;;  %v1257_v17 = vor.u32 %v1369_v15, %v1256_v14  ;;  %v1088_v22 = vld [vmem:[%s2204_s0 + $0xc0] sm:$0xf]  ;;  %v1327_v23 = vld [vmem:[%s2204_s0 + $0xc8] sm:$0xf0] }
  0x2b   :  { %v1754_v29 = vor.u32 %v1327_v23, %v1088_v22  ;;  %v1040_v14 = vld [vmem:[%s2204_s0 + $0x60] sm:$0xf]  ;;  %v1315_v15 = vld [vmem:[%s2204_s0 + $0x68] sm:$0xf0]  ;;  %v1052_v23 = vld [vmem:[%s2204_s0 + $0x78] sm:$0xf] }
  0x2c   :  { %775 = vmatpush.bf16.msrb.mxu0 %v1221_v26  ;;  %v1326_v26 = vld [vmem:[%s2204_s0 + $0xc4] sm:$0xf] }
  0x2d   :  { %838 = vmatpush.bf16.msrb.mxu1 %v1285_v27  ;;  %v1090_v27 = vld [vmem:[%s2204_s0 + $0xcc] sm:$0xf0] }
  0x2e   :  { %712 = vmatpush.bf16.msrb.mxu3 %v1157_v34  ;;  %649 = vmatpush.bf16.msrb.mxu2 %v1281_v35  ;;  %v1758_v31 = vor.u32 %v1326_v26, %v1090_v27  ;;  %v1248_v34 = vld [vmem:[%s2203_s1 + $0x110] sm:$0xf]  ;;  %v1125_v35 = vor.u32 %v1334_v32, %v1122_v33  ;;  %v1304_v26 = vld [vmem:[%s2204_s0 + $0x10] sm:$0xf0]  ;;  %v1317_v27 = vld [vmem:[%s2204_s0 + $0x7c] sm:$0xf]  ;;  %v1893_v33 = vor.u32 %v1318_v24, %v1052_v23 }
  0x2f   :  { %v1249_v39 = vor.u32 %v1367_v36, %v1248_v34  ;;  %v1054_v32 = vld [vmem:[%s2204_s0 + $0x84] sm:$0xf0]  ;;  %v1001_v34 = vor.u32 %v1304_v26, %v1000_v25  ;;  %v1012_v36 = vld [vmem:[%s2204_s0 + $0x20] sm:$0xf] }
  0x30   :  { %776 = vmatpush.bf16.msrb.mxu0 %v1213_v37  ;;  %v1350_v37 = vld [vmem:[%s2203_s1 + $0x94] sm:$0xf]  ;;  %v1060_v23 = vld [vmem:[%s2204_s0 + $0x80] sm:$0xf] }
  0x31   :  { %839 = vmatpush.bf16.msrb.mxu1 %v1277_v38  ;;  %v1186_v38 = vld [vmem:[%s2203_s1 + $0x98] sm:$0xf0] }
  0x32   :  { %713 = vmatpush.bf16.msrb.mxu3 %v1149_v50  ;;  %650 = vmatpush.bf16.msrb.mxu2 %v1273_v51  ;;  %v1189_v40 = vor.u32 %v1350_v37, %v1186_v38  ;;  %v1028_v50 = vld [vmem:[%s2204_s0 + $0x48] sm:$0xf]  ;;  %v1312_v51 = vld [vmem:[%s2204_s0 + $0x50] sm:$0xf0]  ;;  %v1307_v37 = vld [vmem:[%s2204_s0 + $0x28] sm:$0xf0] }
  0x33   :  { %534 = vmatmul.bf16.gmra.mxu0 %v1668_v52  ;;  %564 = vmatmul.bf16.gmra.mxu2 %v1670_v53  ;;  %v1824_v62 = vor.u32 %v1312_v51, %v1028_v50  ;;  %v1013_v38 = vor.u32 %v1307_v37, %v1012_v36 }
  0x34   :  { %597 = vmatmul.bf16.gmra.mxu1 %v1672_v54  ;;  %777 = vmatpush.bf16.msrb.mxu0 %v1205_v63  ;;  %v1826_v63 = vor.u32 %v1330_v57, %v1100_v56 }
  0x35   :  { %627 = vmatmul.bf16.gmra.mxu3 %v1674_v55  ;;  %840 = vmatpush.bf16.msrb.mxu1 %v1269_v0 }
  0x36   :  { %714 = vmatpush.bf16.msrb.mxu3 %v1141_v59  ;;  %651 = vmatpush.bf16.msrb.mxu2 %v1265_v6  ;;  %v1030_v59 = vld [vmem:[%s2204_s0 + $0x54] sm:$0xf0]  ;;  %v1364_v6 = vld [vmem:[%s2203_s1 + $0x104] sm:$0xf] }
  0x37   :  { %v1828_v0 = vor.u32 %v1311_v58, %v1030_v59  ;;  %v1245_v11 = vor.u32 %v1364_v6, %v1242_v10  ;;  %v1048_v58 = vld [vmem:[%s2204_s0 + $0x68] sm:$0xf] }
  0x38   :  { %778 = vmatpush.bf16.msrb.mxu0 %v1197_v13 }
  0x39   :  { %841 = vmatpush.bf16.msrb.mxu1 %v1261_v19  ;;  %v1863_v19 = vor.u32 %v1315_v15, %v1040_v14 }
  0x3a   :  { %715 = vmatpush.bf16.msrb.mxu3 %v1133_v12  ;;  %652 = vmatpush.bf16.msrb.mxu2 %v1257_v17  ;;  %v54_v12 = vld [vmem:[%s2204_s0 + $0xf0] sm:$0xff]  ;;  %v1314_v17 = vld [vmem:[%s2204_s0 + $0x64] sm:$0xf] }
  0x3b   :  { %v212_v13 = vunpack.c.l.b16 %v54_v12  ;;  %v213_v16 = vunpack.c.h.b16 %v54_v12  ;;  %v1867_v21 = vor.u32 %v1314_v17, %v1042_v18 }
  0x3c   :  { %779 = vmatpush.bf16.msrb.mxu0 %v1189_v40 }
  0x3d   :  { %842 = vmatpush.bf16.msrb.mxu1 %v1253_v44  ;;  %v1865_v20 = vpack.c.b16 %v212_v13, %v212_v13  ;;  %v1869_v22 = vpack.c.b16 %v213_v16, %v213_v16 }
  0x3e   :  { %716 = vmatpush.bf16.msrb.mxu3 %v1125_v35  ;;  %653 = vmatpush.bf16.msrb.mxu2 %v1249_v39  ;;  %v1895_v35 = vor.u32 %v1317_v27, %v1054_v32  ;;  %v1024_v39 = vld [vmem:[%s2204_s0 + $0x38] sm:$0xf] }
  0x40   :  { %780 = vmatpush.bf16.msrb.mxu0 %v1181_v7 }
  0x41   :  { %843 = vmatpush.bf16.msrb.mxu1 %v1245_v11 }
  0x42   :  { %717 = vmatpush.bf16.msrb.mxu3 %v1117_v49  ;;  %654 = vmatpush.bf16.msrb.mxu2 %v1241_v48 }
  0x43   :  { %539 = vmatmul.bf16.gmra.mxu0 %v1752_v28  ;;  %569 = vmatmul.bf16.gmra.mxu2 %v1754_v29 }
  0x44   :  { %602 = vmatmul.bf16.gmra.mxu1 %v1756_v30 }
  0x45   :  { %632 = vmatmul.bf16.gmra.mxu3 %v1758_v31 }
  0x53   :  { %544 = vmatmul.bf16.gmra.mxu0 %v1824_v62  ;;  %574 = vmatmul.bf16.gmra.mxu2 %v1826_v63 }
  0x54   :  { %607 = vmatmul.bf16.gmra.mxu1 %v1828_v0 }
  0x55   :  { %637 = vmatmul.bf16.gmra.mxu3 %v1830_v1 }
  0x63   :  { %549 = vmatmul.bf16.gmra.mxu0 %v1863_v19  ;;  %579 = vmatmul.bf16.gmra.mxu2 %v1865_v20 }
  0x64   :  { %612 = vmatmul.bf16.gmra.mxu1 %v1867_v21 }
  0x65   :  { %642 = vmatmul.bf16.gmra.mxu3 %v1869_v22 }
  0x73   :  { %554 = vmatmul.bf16.gmra.mxu0 %v1893_v33  ;;  %655 = vmatmul.bf16.vlgmr.msrb.gmra.mxu2 %v1001_v34 }
  0x74   :  { %617 = vmatmul.bf16.gmra.mxu1 %v1895_v35 }
  0x75   :  { %718 = vmatmul.bf16.vlgmr.msrb.gmra.mxu3 %v1563_v3  ;;  %v1310_v3 = vld [vmem:[%s2204_s0 + $0x40] sm:$0xf0] }
  0x76   :  { %v1025_v40 = vor.u32 %v1310_v3, %v1024_v39 }
  0x83   :  { %660 = vmatmul.bf16.gmra.mxu2 %v1013_v38  ;;  %781 = vmatmul.bf16.vlgmr.msrb.gmra.mxu0 %v1576_v8  ;;  %v1919_v8 = vld [vmem:[%s2205_s2] sm:$0x3] }
  0x84   :  { %844 = vmatmul.bf16.vlgmr.msrb.gmra.mxu1 %v1001_v34  ;;  %v1928_v42 = vperm.slane %v1919_v8, 0 }
  0x85   :  { %723 = vmatmul.bf16.gmra.mxu3 %v1668_v52  ;;  %v1036_v52 = vld [vmem:[%s2204_s0 + $0x50] sm:$0xf] }
  0x93   :  { %665 = vmatmul.bf16.gmra.mxu2 %v1025_v40  ;;  %786 = vmatmul.bf16.gmra.mxu0 %v1672_v54  ;;  %v1037_v54 = vor.u32 %v1313_v41, %v1036_v52 }
  0x94   :  { %849 = vmatmul.bf16.gmra.mxu1 %v1013_v38 }
  0x95   :  { %728 = vmatmul.bf16.gmra.mxu3 %v1752_v28 }
  0xa0   :  { %v530_v43 = vpop.f32.mrf.mxu0 }
  0xa1   :  { %v531_v28 = vadd.f32 %v530_v43, %v1928_v42  ;;  %v593_v44 = vpop.f32.mrf.mxu1 }
  0xa3   :  { %v1931_v45 = vadd.f32 %v593_v44, %v531_v28  ;;  %670 = vmatmul.bf16.gmra.mxu2 %v1037_v54  ;;  %791 = vmatmul.bf16.gmra.mxu0 %v1756_v30  ;;  %v1316_v30 = vld [vmem:[%s2204_s0 + $0x70] sm:$0xf0]  ;;  %v1072_v28 = vld [vmem:[%s2204_s0 + $0x98] sm:$0xf] }
  0xa4   :  { %854 = vmatmul.bf16.gmra.mxu1 %v1025_v40 }
  0xa5   :  { %733 = vmatmul.bf16.gmra.mxu3 %v1824_v62  ;;  %v1049_v62 = vor.u32 %v1316_v30, %v1048_v58 }
  0xa6   :  { %v560_v46 = vpop.f32.mrf.mxu2 }
  0xa7   :  { %v561_v47 = vadd.f32 %v560_v46, %v1928_v42 }
  0xa8   :  { %v623_v48 = vpop.f32.mrf.mxu3  ;;  %v532_v49 = vpop.f32.mrf.mxu0 }
  0xa9   :  { %v1936_v50 = vadd.f32 %v623_v48, %v561_v47  ;;  %v533_v51 = vadd.f32 %v532_v49, %v1928_v42  ;;  %v595_v56 = vpop.f32.mrf.mxu1 }
  0xab   :  { %v1939_v57 = vadd.f32 %v595_v56, %v533_v51 }
  0xae   :  { %v562_v59 = vpop.f32.mrf.mxu2 }
  0xaf   :  { %v563_v60 = vadd.f32 %v562_v59, %v1928_v42 }
  0xb0   :  { %v625_v61 = vpop.f32.mrf.mxu3  ;;  %v535_v2 = vpop.f32.mrf.mxu0 }
  0xb1   :  { %v1948_v5 = vadd.f32 %v625_v61, %v563_v60  ;;  %v536_v6 = vadd.f32 %v535_v2, %v1928_v42  ;;  %v598_v7 = vpop.f32.mrf.mxu1 }
  0xb3   :  { %v1951_v10 = vadd.f32 %v598_v7, %v536_v6  ;;  %675 = vmatmul.bf16.gmra.mxu2 %v1049_v62  ;;  %796 = vmatmul.bf16.gmra.mxu0 %v1828_v0  ;;  %v1319_v0 = vld [vmem:[%s2204_s0 + $0x88] sm:$0xf0] }
  0xb4   :  { %859 = vmatmul.bf16.gmra.mxu1 %v1037_v54  ;;  %v1061_v26 = vor.u32 %v1319_v0, %v1060_v23 }
  0xb5   :  { %738 = vmatmul.bf16.gmra.mxu3 %v1863_v19 }
  0xb6   :  { %v565_v11 = vpop.f32.mrf.mxu2 }
  0xb7   :  { %v566_v12 = vadd.f32 %v565_v11, %v1928_v42  ;;  %v1084_v11 = vld [vmem:[%s2204_s0 + $0xb0] sm:$0xf] }
  0xb8   :  { %v628_v13 = vpop.f32.mrf.mxu3  ;;  %v537_v14 = vpop.f32.mrf.mxu0 }
  0xb9   :  { %v1956_v15 = vadd.f32 %v628_v13, %v566_v12  ;;  %v538_v16 = vadd.f32 %v537_v14, %v1928_v42  ;;  %v600_v17 = vpop.f32.mrf.mxu1 }
  0xbb   :  { %v1959_v18 = vadd.f32 %v600_v17, %v538_v16 }
  0xbe   :  { %v567_v19 = vpop.f32.mrf.mxu2 }
  0xbf   :  { %v568_v24 = vadd.f32 %v567_v19, %v1928_v42 }
  0xc0   :  { %v630_v25 = vpop.f32.mrf.mxu3  ;;  %v540_v27 = vpop.f32.mrf.mxu0 }
  0xc1   :  { %v1968_v32 = vadd.f32 %v630_v25, %v568_v24  ;;  %v541_v34 = vadd.f32 %v540_v27, %v1928_v42  ;;  %v603_v36 = vpop.f32.mrf.mxu1 }
  0xc3   :  { %v1971_v37 = vadd.f32 %v603_v36, %v541_v34  ;;  %680 = vmatmul.bf16.gmra.mxu2 %v1061_v26  ;;  %801 = vmatmul.bf16.gmra.mxu0 %v1867_v21  ;;  %v1322_v21 = vld [vmem:[%s2204_s0 + $0xa0] sm:$0xf0] }
  0xc4   :  { %864 = vmatmul.bf16.gmra.mxu1 %v1049_v62  ;;  %v1073_v47 = vor.u32 %v1322_v21, %v1072_v28 }
  0xc5   :  { %743 = vmatmul.bf16.gmra.mxu3 %v1893_v33 }
  0xc6   :  { %v570_v38 = vpop.f32.mrf.mxu2 }
  0xc7   :  { %v571_v39 = vadd.f32 %v570_v38, %v1928_v42 }
  0xc8   :  { %v633_v3 = vpop.f32.mrf.mxu3  ;;  %v542_v40 = vpop.f32.mrf.mxu0 }
  0xc9   :  { %v1976_v52 = vadd.f32 %v633_v3, %v571_v39  ;;  %v543_v41 = vadd.f32 %v542_v40, %v1928_v42  ;;  %v605_v54 = vpop.f32.mrf.mxu1  ;;  %v1096_v3 = vld [vmem:[%s2204_s0 + $0xc8] sm:$0xf] }
  0xcb   :  { %v1979_v43 = vadd.f32 %v605_v54, %v543_v41 }
  0xce   :  { %v572_v33 = vpop.f32.mrf.mxu2 }
  0xcf   :  { %v573_v44 = vadd.f32 %v572_v33, %v1928_v42 }
  0xd0   :  { %v635_v46 = vpop.f32.mrf.mxu3  ;;  %v545_v48 = vpop.f32.mrf.mxu0 }
  0xd1   :  { %v1988_v49 = vadd.f32 %v635_v46, %v573_v44  ;;  %v546_v51 = vadd.f32 %v545_v48, %v1928_v42  ;;  %v608_v56 = vpop.f32.mrf.mxu1  ;;  %v2033_v48 = vperm.slane %v1919_v8, 1 }
  0xd3   :  { %v1991_v58 = vadd.f32 %v608_v56, %v546_v51  ;;  %685 = vmatmul.bf16.gmra.mxu2 %v1073_v47  ;;  %806 = vmatmul.bf16.gmra.mxu0 %v1895_v35 }
  0xd4   :  { %869 = vmatmul.bf16.gmra.mxu1 %v1061_v26 }
  0xd5   :  { %748 = vmatmul.bf16.gmra.mxu3 %v1565_v4  ;;  %v1325_v4 = vld [vmem:[%s2204_s0 + $0xb8] sm:$0xf0] }
  0xd6   :  { %v575_v30 = vpop.f32.mrf.mxu2  ;;  %v1085_v14 = vor.u32 %v1325_v4, %v1084_v11 }
  0xd7   :  { %v576_v59 = vadd.f32 %v575_v30, %v1928_v42 }
  0xd8   :  { %v638_v60 = vpop.f32.mrf.mxu3  ;;  %v547_v61 = vpop.f32.mrf.mxu0 }
  0xd9   :  { %v1996_v62 = vadd.f32 %v638_v60, %v576_v59  ;;  %v548_v2 = vadd.f32 %v547_v61, %v1928_v42  ;;  %v610_v6 = vpop.f32.mrf.mxu1  ;;  %v1108_v59 = vld [vmem:[%s2204_s0 + $0xe0] sm:$0xf] }
  0xdb   :  { %v1999_v7 = vadd.f32 %v610_v6, %v548_v2 }
  0xde   :  { %v577_v35 = vpop.f32.mrf.mxu2 }
  0xdf   :  { %v578_v12 = vadd.f32 %v577_v35, %v1928_v42 }
  0xe0   :  { %v640_v13 = vpop.f32.mrf.mxu3  ;;  %v550_v16 = vpop.f32.mrf.mxu0 }
  0xe1   :  { %v2008_v17 = vadd.f32 %v640_v13, %v578_v12  ;;  %v551_v23 = vadd.f32 %v550_v16, %v1928_v42  ;;  %v613_v0 = vpop.f32.mrf.mxu1 }
  0xe3   :  { %v2011_v19 = vadd.f32 %v613_v0, %v551_v23  ;;  %690 = vmatmul.bf16.gmra.mxu2 %v1085_v14  ;;  %811 = vmatmul.bf16.gmra.mxu0 %v1578_v9  ;;  %v1328_v9 = vld [vmem:[%s2204_s0 + $0xd0] sm:$0xf0] }
  0xe4   :  { %874 = vmatmul.bf16.gmra.mxu1 %v1073_v47  ;;  %v1097_v41 = vor.u32 %v1328_v9, %v1096_v3 }
  0xe5   :  { %753 = vmatmul.bf16.gmra.mxu3 %v1670_v53 }
  0xe6   :  { %v580_v24 = vpop.f32.mrf.mxu2 }
  0xe7   :  { %v581_v25 = vadd.f32 %v580_v24, %v1928_v42  ;;  %v55_v24 = vld [vmem:[%s2204_s0 + $0xf8] sm:$0xf] }
  0xe8   :  { %v643_v26 = vpop.f32.mrf.mxu3  ;;  %v552_v27 = vpop.f32.mrf.mxu0 }
  0xe9   :  { %v2016_v34 = vadd.f32 %v643_v26, %v581_v25  ;;  %v553_v36 = vadd.f32 %v552_v27, %v1928_v42  ;;  %v615_v38 = vpop.f32.mrf.mxu1  ;;  %v214_v27 = vunpack.c.l.b16 %v55_v24 }
  0xeb   :  { %v2019_v39 = vadd.f32 %v615_v38, %v553_v36 }
  0xee   :  { %v582_v53 = vpop.f32.mrf.mxu2 }
  0xf0   :  { %v645_v40 = vpop.f32.mrf.mxu3  ;;  %v555_v54 = vpop.f32.mrf.mxu0 }
  0xf1   :  { %v556_v28 = vadd.f32 %v555_v54, %v1928_v42  ;;  %v618_v21 = vpop.f32.mrf.mxu1 }
  0xf3   :  { %v2028_v33 = vadd.f32 %v618_v21, %v556_v28  ;;  %695 = vmatmul.bf16.gmra.mxu2 %v1097_v41  ;;  %816 = vmatmul.bf16.gmra.mxu0 %v1674_v55  ;;  %v1331_v55 = vld [vmem:[%s2204_s0 + $0xe8] sm:$0xf0] }
  0xf4   :  { %879 = vmatmul.bf16.gmra.mxu1 %v1085_v14  ;;  %v1109_v2 = vor.u32 %v1331_v55, %v1108_v59 }
  0xf5   :  { %758 = vmatmul.bf16.gmra.mxu3 %v1754_v29 }
  0xf6   :  { %v656_v44 = vpop.f32.mrf.mxu2 }
  0xf7   :  { %v657_v6 = vadd.f32 %v656_v44, %v1931_v45 }
  0xf8   :  { %v719_v46 = vpop.f32.mrf.mxu3  ;;  %v557_v47 = vpop.f32.mrf.mxu0 }
  0xf9   :  { %v558_v51 = vadd.f32 %v557_v47, %v1928_v42  ;;  %v620_v56 = vpop.f32.mrf.mxu1  ;;  %v720_v29 = vadd.f32 %v719_v46, %v2033_v48  ;;  %v899_v35 = vmax.f32 %v657_v6, 0.0 }
  0xfb   :  { %v2036_v30 = vadd.f32 %v620_v56, %v558_v51 }
  0xfe   :  { %v658_v60 = vpop.f32.mrf.mxu2 }
 0x100   :  { %v721_v61 = vpop.f32.mrf.mxu3  ;;  %v782_v8 = vpop.f32.mrf.mxu0 }
 0x101   :  { %v783_v42 = vadd.f32 %v782_v8, %v720_v29  ;;  %v845_v11 = vpop.f32.mrf.mxu1  ;;  %v722_v45 = vadd.f32 %v721_v61, %v2033_v48 }
 0x103   :  { %v846_v4 = vadd.f32 %v845_v11, %v783_v42  ;;  %700 = vmatmul.bf16.gmra.mxu2 %v1109_v2  ;;  %821 = vmatmul.bf16.gmra.mxu0 %v1758_v31  ;;  %v659_v31 = vadd.f32 %v658_v60, %v1939_v57 }
 0x104   :  { %884 = vmatmul.bf16.gmra.mxu1 %v1097_v41  ;;  %v247_v41 = vpack.c.b16 %v214_v27, %v214_v27 }
 0x105   :  { %763 = vmatmul.bf16.gmra.mxu3 %v1826_v63  ;;  %v900_v12 = vmax.f32 %v846_v4, 0.0  ;;  %v901_v36 = vmax.f32 %v659_v31, 0.0 }
 0x106   :  { %v661_v14 = vpop.f32.mrf.mxu2 }
 0x107   :  { %v941_v16 = vpack.c.bf16 %v900_v12, %v899_v35  ;;  %v662_v57 = vadd.f32 %v661_v14, %v1951_v10 }
 0x108   :  { %v724_v23 = vpop.f32.mrf.mxu3  ;;  %v784_v0 = vpop.f32.mrf.mxu0 }
 0x109   :  { %965 = vst.msk [vmem:[%s2206_s3] sm:$0xff] %vm2048_vm2, %v941_v16  ;;  %v785_v63 = vadd.f32 %v784_v0, %v722_v45  ;;  %v847_v25 = vpop.f32.mrf.mxu1  ;;  %v725_v38 = vadd.f32 %v724_v23, %v2033_v48  ;;  %v903_v46 = vmax.f32 %v662_v57, 0.0 }
 0x10b   :  { %v848_v26 = vadd.f32 %v847_v25, %v785_v63 }
 0x10d   :  { %v902_v3 = vmax.f32 %v848_v26, 0.0 }
 0x10e   :  { %v663_v9 = vpop.f32.mrf.mxu2 }
 0x10f   :  { %v942_v53 = vpack.c.bf16 %v902_v3, %v901_v36  ;;  %v664_v29 = vadd.f32 %v663_v9, %v1959_v18 }
 0x110   :  { %v726_v40 = vpop.f32.mrf.mxu3  ;;  %v787_v54 = vpop.f32.mrf.mxu0 }
 0x111   :  { %966 = vst.msk [vmem:[%s2206_s3 + $0x8] sm:$0xff] %vm2048_vm2, %v942_v53  ;;  %v788_v28 = vadd.f32 %v787_v54, %v725_v38  ;;  %v850_v21 = vpop.f32.mrf.mxu1  ;;  %v727_v10 = vadd.f32 %v726_v40, %v2033_v48  ;;  %v905_v61 = vmax.f32 %v664_v29, 0.0 }
 0x113   :  { %v851_v44 = vadd.f32 %v850_v21, %v788_v28  ;;  %705 = vmatmul.bf16.gmra.mxu2 %v247_v41  ;;  %826 = vmatmul.bf16.gmra.mxu0 %v1830_v1 }
 0x114   :  { %889 = vmatmul.bf16.gmra.mxu1 %v1109_v2 }
 0x115   :  { %768 = vmatmul.bf16.gmra.mxu3 %v1865_v20  ;;  %v904_v47 = vmax.f32 %v851_v44, 0.0 }
 0x116   :  { %v666_v51 = vpop.f32.mrf.mxu2 }
 0x117   :  { %v943_v56 = vpack.c.bf16 %v904_v47, %v903_v46  ;;  %v667_v35 = vadd.f32 %v666_v51, %v1971_v37 }
 0x118   :  { %v729_v59 = vpop.f32.mrf.mxu3  ;;  %v789_v55 = vpop.f32.mrf.mxu0 }
 0x119   :  { %967 = vst.msk [vmem:[%s2206_s3 + $0x10] sm:$0xff] %vm2048_vm2, %v943_v56  ;;  %v790_v1 = vadd.f32 %v789_v55, %v727_v10  ;;  %v852_v60 = vpop.f32.mrf.mxu1  ;;  %v730_v2 = vadd.f32 %v729_v59, %v2033_v48  ;;  %v907_v45 = vmax.f32 %v667_v35, 0.0 }
 0x11b   :  { %v853_v20 = vadd.f32 %v852_v60, %v790_v1 }
 0x11d   :  { %v906_v8 = vmax.f32 %v853_v20, 0.0 }
 0x11e   :  { %v668_v6 = vpop.f32.mrf.mxu2 }
 0x11f   :  { %v944_v42 = vpack.c.bf16 %v906_v8, %v905_v61  ;;  %v669_v63 = vadd.f32 %v668_v6, %v1979_v43 }
 0x120   :  { %v731_v11 = vpop.f32.mrf.mxu3  ;;  %v792_v4 = vpop.f32.mrf.mxu0 }
 0x121   :  { %968 = vst.msk [vmem:[%s2206_s3 + $0x18] sm:$0xff] %vm2048_vm2, %v944_v42  ;;  %v793_v18 = vadd.f32 %v792_v4, %v730_v2  ;;  %v855_v12 = vpop.f32.mrf.mxu1  ;;  %v732_v0 = vadd.f32 %v731_v11, %v2033_v48  ;;  %v909_v27 = vmax.f32 %v669_v63, 0.0 }
 0x123   :  { %v856_v14 = vadd.f32 %v855_v12, %v793_v18  ;;  %831 = vmatmul.bf16.gmra.mxu0 %v1869_v22 }
 0x124   :  { %894 = vmatmul.bf16.gmra.mxu1 %v247_v41 }
 0x125   :  { %v908_v16 = vmax.f32 %v856_v14, 0.0 }
 0x126   :  { %v671_v23 = vpop.f32.mrf.mxu2 }
 0x127   :  { %v945_v24 = vpack.c.bf16 %v908_v16, %v907_v45  ;;  %v672_v41 = vadd.f32 %v671_v23, %v1991_v58 }
 0x128   :  { %v734_v31 = vpop.f32.mrf.mxu3  ;;  %v794_v37 = vpop.f32.mrf.mxu0 }
 0x129   :  { %969 = vst.msk [vmem:[%s2206_s3 + $0x20] sm:$0xff] %vm2048_vm2, %v945_v24  ;;  %v795_v25 = vadd.f32 %v794_v37, %v732_v0  ;;  %v857_v26 = vpop.f32.mrf.mxu1  ;;  %v735_v36 = vadd.f32 %v734_v31, %v2033_v48  ;;  %v911_v28 = vmax.f32 %v672_v41, 0.0 }
 0x12b   :  { %v858_v22 = vadd.f32 %v857_v26, %v795_v25 }
 0x12d   :  { %v910_v38 = vmax.f32 %v858_v22, 0.0 }
 0x12e   :  { %v673_v3 = vpop.f32.mrf.mxu2 }
 0x12f   :  { %v946_v9 = vpack.c.bf16 %v910_v38, %v909_v27  ;;  %v674_v56 = vadd.f32 %v673_v3, %v1999_v7 }
 0x130   :  { %v736_v53 = vpop.f32.mrf.mxu3  ;;  %v797_v40 = vpop.f32.mrf.mxu0 }
 0x131   :  { %970 = vst.msk [vmem:[%s2206_s3 + $0x28] sm:$0xff] %vm2048_vm2, %v946_v9  ;;  %v798_v43 = vadd.f32 %v797_v40, %v735_v36  ;;  %v860_v54 = vpop.f32.mrf.mxu1  ;;  %v737_v46 = vadd.f32 %v736_v53, %v2033_v48  ;;  %v913_v29 = vmax.f32 %v674_v56, 0.0 }
 0x133   :  { %v861_v57 = vadd.f32 %v860_v54, %v798_v43 }
 0x135   :  { %v912_v21 = vmax.f32 %v861_v57, 0.0 }
 0x136   :  { %v676_v44 = vpop.f32.mrf.mxu2 }
 0x137   :  { %v947_v47 = vpack.c.bf16 %v912_v21, %v911_v28  ;;  %v677_v6 = vadd.f32 %v676_v44, %v2011_v19 }
 0x138   :  { %v739_v51 = vpop.f32.mrf.mxu3  ;;  %v799_v10 = vpop.f32.mrf.mxu0 }
 0x139   :  { %971 = vst.msk [vmem:[%s2206_s3 + $0x30] sm:$0xff] %vm2048_vm2, %v947_v47  ;;  %v800_v58 = vadd.f32 %v799_v10, %v737_v46  ;;  %v862_v59 = vpop.f32.mrf.mxu1  ;;  %v740_v1 = vadd.f32 %v739_v51, %v2033_v48  ;;  %v915_v4 = vmax.f32 %v677_v6, 0.0 }
 0x13b   :  { %v863_v55 = vadd.f32 %v862_v59, %v800_v58 }
 0x13d   :  { %v914_v60 = vmax.f32 %v863_v55, 0.0 }
 0x13e   :  { %v678_v20 = vpop.f32.mrf.mxu2 }
 0x13f   :  { %v948_v61 = vpack.c.bf16 %v914_v60, %v913_v29  ;;  %v679_v23 = vadd.f32 %v678_v20, %v2019_v39 }
 0x140   :  { %v741_v2 = vpop.f32.mrf.mxu3  ;;  %v802_v8 = vpop.f32.mrf.mxu0 }
 0x141   :  { %972 = vst.msk [vmem:[%s2206_s3 + $0x38] sm:$0xff] %vm2048_vm2, %v948_v61  ;;  %v803_v7 = vadd.f32 %v802_v8, %v740_v1  ;;  %v865_v42 = vpop.f32.mrf.mxu1  ;;  %v742_v12 = vadd.f32 %v741_v2, %v2033_v48  ;;  %v917_v31 = vmax.f32 %v679_v23, 0.0 }
 0x143   :  { %v866_v11 = vadd.f32 %v865_v42, %v803_v7 }
 0x145   :  { %v916_v35 = vmax.f32 %v866_v11, 0.0 }
 0x146   :  { %v681_v18 = vpop.f32.mrf.mxu2 }
 0x147   :  { %v949_v14 = vpack.c.bf16 %v916_v35, %v915_v4  ;;  %v682_v36 = vadd.f32 %v681_v18, %v2028_v33 }
 0x148   :  { %v744_v45 = vpop.f32.mrf.mxu3  ;;  %v804_v16 = vpop.f32.mrf.mxu0 }
 0x149   :  { %973 = vst.msk [vmem:[%s2206_s3 + $0x40] sm:$0xff] %vm2048_vm2, %v949_v14  ;;  %v805_v19 = vadd.f32 %v804_v16, %v742_v12  ;;  %v867_v0 = vpop.f32.mrf.mxu1  ;;  %v745_v37 = vadd.f32 %v744_v45, %v2033_v48  ;;  %v919_v9 = vmax.f32 %v682_v36, 0.0 }
 0x14b   :  { %v868_v24 = vadd.f32 %v867_v0, %v805_v19 }
 0x14d   :  { %v918_v63 = vmax.f32 %v868_v24, 0.0 }
 0x14e   :  { %v683_v25 = vpop.f32.mrf.mxu2 }
 0x14f   :  { %v950_v26 = vpack.c.bf16 %v918_v63, %v917_v31  ;;  %v684_v28 = vadd.f32 %v683_v25, %v2036_v30 }
 0x150   :  { %v746_v22 = vpop.f32.mrf.mxu3  ;;  %v807_v27 = vpop.f32.mrf.mxu0 }
 0x151   :  { %974 = vst.msk [vmem:[%s2206_s3 + $0x48] sm:$0xff] %vm2048_vm2, %v950_v26  ;;  %v808_v39 = vadd.f32 %v807_v27, %v745_v37  ;;  %v870_v38 = vpop.f32.mrf.mxu1  ;;  %v747_v41 = vadd.f32 %v746_v22, %v2033_v48  ;;  %v921_v46 = vmax.f32 %v684_v28, 0.0 }
 0x153   :  { %v871_v3 = vadd.f32 %v870_v38, %v808_v39 }
 0x155   :  { %v920_v53 = vmax.f32 %v871_v3, 0.0 }
 0x156   :  { %v686_v40 = vpop.f32.mrf.mxu2 }
 0x157   :  { %v951_v43 = vpack.c.bf16 %v920_v53, %v919_v9  ;;  %v687_v55 = vadd.f32 %v686_v40, %v1936_v50 }
 0x158   :  { %v749_v54 = vpop.f32.mrf.mxu3  ;;  %v809_v57 = vpop.f32.mrf.mxu0 }
 0x159   :  { %975 = vst.msk [vmem:[%s2206_s3 + $0x50] sm:$0xff] %vm2048_vm2, %v951_v43  ;;  %v810_v33 = vadd.f32 %v809_v57, %v747_v41  ;;  %v872_v21 = vpop.f32.mrf.mxu1  ;;  %v750_v47 = vadd.f32 %v749_v54, %v2033_v48  ;;  %v923_v60 = vmax.f32 %v687_v55, 0.0 }
 0x15b   :  { %v873_v44 = vadd.f32 %v872_v21, %v810_v33 }
 0x15d   :  { %v922_v51 = vmax.f32 %v873_v44, 0.0 }
 0x15e   :  { %v688_v10 = vpop.f32.mrf.mxu2 }
 0x15f   :  { %v952_v56 = vpack.c.bf16 %v922_v51, %v921_v46  ;;  %v689_v42 = vadd.f32 %v688_v10, %v1948_v5 }
 0x160   :  { %v751_v58 = vpop.f32.mrf.mxu3  ;;  %v812_v59 = vpop.f32.mrf.mxu0 }
 0x161   :  { %976 = vst.msk [vmem:[%s2206_s3 + $0x58] sm:$0xff] %vm2048_vm2, %v952_v56  ;;  %v813_v30 = vadd.f32 %v812_v59, %v750_v47  ;;  %v875_v29 = vpop.f32.mrf.mxu1  ;;  %v752_v2 = vadd.f32 %v751_v58, %v2033_v48  ;;  %v925_v35 = vmax.f32 %v689_v42, 0.0 }
 0x163   :  { %v876_v1 = vadd.f32 %v875_v29, %v813_v30 }
 0x165   :  { %v924_v20 = vmax.f32 %v876_v1, 0.0 }
 0x166   :  { %v691_v61 = vpop.f32.mrf.mxu2 }
 0x167   :  { %v953_v8 = vpack.c.bf16 %v924_v20, %v923_v60  ;;  %v692_v19 = vadd.f32 %v691_v61, %v1956_v15 }
 0x168   :  { %v754_v6 = vpop.f32.mrf.mxu3  ;;  %v814_v7 = vpop.f32.mrf.mxu0 }
 0x169   :  { %977 = vst.msk [vmem:[%s2206_s3 + $0x60] sm:$0xff] %vm2048_vm2, %v953_v8  ;;  %v815_v50 = vadd.f32 %v814_v7, %v752_v2  ;;  %v877_v11 = vpop.f32.mrf.mxu1  ;;  %v755_v18 = vadd.f32 %v754_v6, %v2033_v48  ;;  %v927_v31 = vmax.f32 %v692_v19, 0.0 }
 0x16b   :  { %v878_v4 = vadd.f32 %v877_v11, %v815_v50 }
 0x16d   :  { %v926_v12 = vmax.f32 %v878_v4, 0.0 }
 0x16e   :  { %v693_v14 = vpop.f32.mrf.mxu2 }
 0x16f   :  { %v954_v45 = vpack.c.bf16 %v926_v12, %v925_v35  ;;  %v694_v36 = vadd.f32 %v693_v14, %v1968_v32 }
 0x170   :  { %v756_v16 = vpop.f32.mrf.mxu3  ;;  %v817_v23 = vpop.f32.mrf.mxu0 }
 0x171   :  { %978 = vst.msk [vmem:[%s2206_s3 + $0x68] sm:$0xff] %vm2048_vm2, %v954_v45  ;;  %v818_v5 = vadd.f32 %v817_v23, %v755_v18  ;;  %v880_v0 = vpop.f32.mrf.mxu1  ;;  %v757_v25 = vadd.f32 %v756_v16, %v2033_v48  ;;  %v929_v3 = vmax.f32 %v694_v36, 0.0 }
 0x173   :  { %v881_v24 = vadd.f32 %v880_v0, %v818_v5 }
 0x175   :  { %v928_v37 = vmax.f32 %v881_v24, 0.0 }
 0x176   :  { %v696_v63 = vpop.f32.mrf.mxu2 }
 0x177   :  { %v955_v26 = vpack.c.bf16 %v928_v37, %v927_v31  ;;  %v697_v57 = vadd.f32 %v696_v63, %v1976_v52 }
 0x178   :  { %v759_v22 = vpop.f32.mrf.mxu3  ;;  %v819_v27 = vpop.f32.mrf.mxu0 }
 0x179   :  { %979 = vst.msk [vmem:[%s2206_s3 + $0x70] sm:$0xff] %vm2048_vm2, %v955_v26  ;;  %v820_v15 = vadd.f32 %v819_v27, %v757_v25  ;;  %v882_v39 = vpop.f32.mrf.mxu1  ;;  %v760_v9 = vadd.f32 %v759_v22, %v2033_v48  ;;  %v931_v21 = vmax.f32 %v697_v57, 0.0 }
 0x17b   :  { %v883_v38 = vadd.f32 %v882_v39, %v820_v15 }
 0x17d   :  { %v930_v53 = vmax.f32 %v883_v38, 0.0 }
 0x17e   :  { %v698_v40 = vpop.f32.mrf.mxu2 }
 0x17f   :  { %v956_v41 = vpack.c.bf16 %v930_v53, %v929_v3  ;;  %v699_v58 = vadd.f32 %v698_v40, %v1988_v49 }
 0x180   :  { %v761_v43 = vpop.f32.mrf.mxu3  ;;  %v822_v54 = vpop.f32.mrf.mxu0 }
 0x181   :  { %980 = vst.msk [vmem:[%s2206_s3 + $0x78] sm:$0xff] %vm2048_vm2, %v956_v41  ;;  %v823_v32 = vadd.f32 %v822_v54, %v760_v9  ;;  %v885_v28 = vpop.f32.mrf.mxu1  ;;  %v762_v47 = vadd.f32 %v761_v43, %v2033_v48  ;;  %v933_v30 = vmax.f32 %v699_v58, 0.0 }
 0x183   :  { %v886_v33 = vadd.f32 %v885_v28, %v823_v32 }
 0x185   :  { %v932_v44 = vmax.f32 %v886_v33, 0.0 }
 0x186   :  { %v701_v46 = vpop.f32.mrf.mxu2 }
 0x187   :  { %v957_v51 = vpack.c.bf16 %v932_v44, %v931_v21  ;;  %v702_v8 = vadd.f32 %v701_v46, %v1996_v62 }
 0x188   :  { %v764_v10 = vpop.f32.mrf.mxu3  ;;  %v824_v56 = vpop.f32.mrf.mxu0 }
 0x189   :  { %981 = vst.msk [vmem:[%s2206_s3 + $0x80] sm:$0xff] %vm2048_vm2, %v957_v51  ;;  %v825_v52 = vadd.f32 %v824_v56, %v762_v47  ;;  %v887_v59 = vpop.f32.mrf.mxu1  ;;  %v765_v29 = vadd.f32 %v764_v10, %v2033_v48  ;;  %v935_v42 = vmax.f32 %v702_v8, 0.0 }
 0x18b   :  { %v888_v55 = vadd.f32 %v887_v59, %v825_v52 }
 0x18d   :  { %v934_v1 = vmax.f32 %v888_v55, 0.0 }
 0x18e   :  { %v703_v60 = vpop.f32.mrf.mxu2 }
 0x18f   :  { %v958_v20 = vpack.c.bf16 %v934_v1, %v933_v30  ;;  %v704_v14 = vadd.f32 %v703_v60, %v2008_v17 }
 0x190   :  { %v766_v61 = vpop.f32.mrf.mxu3  ;;  %v827_v2 = vpop.f32.mrf.mxu0 }
 0x191   :  { %982 = vst.msk [vmem:[%s2206_s3 + $0x88] sm:$0xff] %vm2048_vm2, %v958_v20  ;;  %v828_v49 = vadd.f32 %v827_v2, %v765_v29  ;;  %v890_v6 = vpop.f32.mrf.mxu1  ;;  %v767_v4 = vadd.f32 %v766_v61, %v2033_v48  ;;  %v937_v23 = vmax.f32 %v704_v14, 0.0 }
 0x193   :  { %v891_v7 = vadd.f32 %v890_v6, %v828_v49 }
 0x195   :  { %v936_v50 = vmax.f32 %v891_v7, 0.0 }
 0x196   :  { %v706_v11 = vpop.f32.mrf.mxu2 }
 0x197   :  { %v959_v35 = vpack.c.bf16 %v936_v50, %v935_v42  ;;  %v707_v63 = vadd.f32 %v706_v11, %v2016_v34 }
 0x198   :  { %v769_v18 = vpop.f32.mrf.mxu3  ;;  %v829_v12 = vpop.f32.mrf.mxu0 }
 0x199   :  { %983 = vst.msk [vmem:[%s2206_s3 + $0x90] sm:$0xff] %vm2048_vm2, %v959_v35  ;;  %v830_v62 = vadd.f32 %v829_v12, %v767_v4  ;;  %v892_v45 = vpop.f32.mrf.mxu1  ;;  %v770_v19 = vadd.f32 %v769_v18, %v2033_v48  ;;  %v939_v22 = vmax.f32 %v707_v63, 0.0 }
 0x19b   :  { %v893_v16 = vadd.f32 %v892_v45, %v830_v62 }
 0x19d   :  { %v938_v5 = vmax.f32 %v893_v16, 0.0 }
 0x19e   :  { %v708_v0 = vpop.f32.mrf.mxu2 }
 0x19f   :  { %v960_v24 = vpack.c.bf16 %v938_v5, %v937_v23 }
 0x1a0   :  { %v771_v31 = vpop.f32.mrf.mxu3  ;;  %v832_v37 = vpop.f32.mrf.mxu0 }
 0x1a1   :  { %984 = vst.msk [vmem:[%s2206_s3 + $0x98] sm:$0xff] %vm2048_vm2, %v960_v24  ;;  %v833_v17 = vadd.f32 %v832_v37, %v770_v19  ;;  %v895_v25 = vpop.f32.mrf.mxu1 }
 0x1a3   :  { %v896_v26 = vadd.f32 %v895_v25, %v833_v17 }
 0x1a5   :  { %v940_v27 = vmax.f32 %v896_v26, 0.0 }
 0x1a7   :  { %v961_v36 = vpack.c.bf16 %v940_v27, %v939_v22 }
 0x1a8   :  { %v834_v48 = vpop.f32.mrf.mxu0 }
 0x1a9   :  { %985 = vst.msk [vmem:[%s2206_s3 + $0xa0] sm:$0xff] %vm2048_vm2, %v961_v36  ;;  %v897_v34 = vpop.f32.mrf.mxu1 }

// kernel: netG_forward.7
= control target key start
LH: loop header
LB: loop body
LE: loop exit
PB: predicated region body
PF: predicated region fallthrough
CT: control target
= control target key end

     0   :  { %s1270_s12 = smov 0   ;;  %s1517_s0 = inlined_call_operand.vmem [shape: bf16[592,192], index: 0, kind: input, shape index: {}]   ;;  %s1518_s1 = inlined_call_operand.vmem [shape: bf16[192,128], index: 1, kind: input, shape index: {}]   ;;  %s1519_s2 = inlined_call_operand.vmem [shape: f32[1,128], index: 2, kind: input, shape index: {}]   ;;  %s1520_s3 = inlined_call_operand.vmem [shape: f32[592,128], index: 3, kind: output, shape index: {}]  }
   0x1 LB: > { %s877_s13 = sadd.s32 4294967295, %s1248_s12   ;;  %p881_p0 = scmp.ge.s32.totalorder %s1248_s12, 1  ;;  %s1248_s12 = sphi %s1270_s12, %s13_s12  }
   0x2   : > { %p139_p1 = scmp.lt.s32.totalorder %s1248_s12, 3 }
   0x4   : > { %p140_p2 = pnand %p881_p0, %p139_p1 }
   0x5   : > { %s164_s18 = smul.u32 (!%p140_p2), 37, %s877_s13 }
   0x6   : > { %143 = sbr.rel (%p140_p2) target bundleno = 332 (0x14c), region = 32 }
   0x7   : > { %p165_p3 = scmp.lt.s32.totalorder (!%p140_p2), %s164_s18, 73 }
   0xb   : > { %v1142_v0 = vld [vmem:[%s1518_s1 + $0x38] sm:$0xff]  ;;  %v1141_v2 = vld [vmem:[%s1518_s1 + $0x30] sm:$0xff]  ;;  %s1522_s18 = smov (!%p165_p3, %s164_s18), 73  ;;  %v1140_v4 = vld [vmem:[%s1518_s1 + $0x28] sm:$0xff]  ;;  %vm483_vm0 = vcmask 523264  }
   0xc   : > { %v1146_v1 = vld [vmem:[%s1518_s1 + $0x58] sm:$0xff]  ;;  %541 = vmatpush.bf16.msra.mxu0 %v1142_v0  ;;  %1147 = vmatpush.bf16.msra.mxu2 %v1142_v0  ;;  %v1145_v3 = vld [vmem:[%s1518_s1 + $0x50] sm:$0xff]  ;;  %s1098_s25 = sshll.u32 %s1522_s18, 3  ;;  %v1144_v5 = vld [vmem:[%s1518_s1 + $0x48] sm:$0xff] }
   0xd   : > { %648 = vmatpush.bf16.msra.mxu1 %v1146_v1  ;;  %1155 = vmatpush.bf16.msra.mxu3 %v1146_v1  ;;  %s1304_s30 = scalar_lea.vmem %s1517_s0, %s1098_s25  ;;  %v1139_v6 = vld [vmem:[%s1518_s1 + $0x20] sm:$0xff]  ;;  %v1138_v13 = vld [vmem:[%s1518_s1 + $0x18] sm:$0xff]  ;;  %v1137_v15 = vld [vmem:[%s1518_s1 + $0x10] sm:$0xff]  ;;  %s1429_s22 = scalar_lea.vmem %s1520_s3, %s1098_s25 }
   0xe   : > { %v1143_v7 = vld [vmem:[%s1518_s1 + $0x40] sm:$0xff]  ;;  %v889_v9 = vld [vmem:[%s1304_s30 + $0x8] sm:$0xf0]  ;;  %v1100_v19 = vld [vmem:[%s1304_s30 + $0x4] sm:$0xf0] }
   0xf   : > { %v1099_v8 = vld [vmem:[%s1304_s30 + $0x4] sm:$0xf]  ;;  %v969_v11 = vld [vmem:[%s1304_s30 + $0xa8] sm:$0xf0]  ;;  %v887_v18 = vld [vmem:[%s1304_s30] sm:$0xf] }
  0x10   : > { %542 = vmatpush.bf16.msra.mxu0 %v1141_v2  ;;  %1148 = vmatpush.bf16.msra.mxu2 %v1141_v2  ;;  %v1119_v10 = vld [vmem:[%s1304_s30 + $0xa4] sm:$0xf]  ;;  %v892_v12 = vor.u32 %v1099_v8, %v889_v9  ;;  %v1136_v16 = vld [vmem:[%s1518_s1 + $0x8] sm:$0xff]  ;;  %v959_v20 = vld [vmem:[%s1304_s30 + $0x90] sm:$0xf]  ;;  %v888_v26 = vor.u32 %v1100_v19, %v887_v18 }
  0x11   : > { %649 = vmatpush.bf16.msra.mxu1 %v1145_v3  ;;  %1156 = vmatpush.bf16.msra.mxu3 %v1145_v3  ;;  %v972_v14 = vor.u32 %v1119_v10, %v969_v11  ;;  %v1135_v17 = vld [vmem:[%s1518_s1] sm:$0xff]  ;;  %v1118_v21 = vld [vmem:[%s1304_s30 + $0x94] sm:$0xf0]  ;;  %v1101_v22 = vld [vmem:[%s1304_s30 + $0x14] sm:$0xf] }
  0x12   : > { %v897_v23 = vld [vmem:[%s1304_s30 + $0x18] sm:$0xf0]  ;;  %v1121_v24 = vld [vmem:[%s1304_s30 + $0xb4] sm:$0xf]  ;;  %v960_v27 = vor.u32 %v1118_v21, %v959_v20  ;;  %v895_v30 = vld [vmem:[%s1304_s30 + $0x10] sm:$0xf] }
  0x13   : > { %v977_v25 = vld [vmem:[%s1304_s30 + $0xb8] sm:$0xf0]  ;;  %v900_v28 = vor.u32 %v1101_v22, %v897_v23  ;;  %v1102_v31 = vld [vmem:[%s1304_s30 + $0x14] sm:$0xf0]  ;;  %v967_v32 = vld [vmem:[%s1304_s30 + $0xa0] sm:$0xf] }
  0x14   : > { %543 = vmatpush.bf16.msra.mxu0 %v1140_v4  ;;  %1149 = vmatpush.bf16.msra.mxu2 %v1140_v4  ;;  %v980_v29 = vor.u32 %v1121_v24, %v977_v25  ;;  %v1120_v33 = vld [vmem:[%s1304_s30 + $0xa4] sm:$0xf0]  ;;  %v1103_v34 = vld [vmem:[%s1304_s30 + $0x24] sm:$0xf]  ;;  %v905_v35 = vld [vmem:[%s1304_s30 + $0x28] sm:$0xf0]  ;;  %v896_v38 = vor.u32 %v1102_v31, %v895_v30 }
  0x15   : > { %650 = vmatpush.bf16.msra.mxu1 %v1144_v5  ;;  %1157 = vmatpush.bf16.msra.mxu3 %v1144_v5  ;;  %v1123_v36 = vld [vmem:[%s1304_s30 + $0xc4] sm:$0xf]  ;;  %v985_v37 = vld [vmem:[%s1304_s30 + $0xc8] sm:$0xf0]  ;;  %v968_v39 = vor.u32 %v1120_v33, %v967_v32  ;;  %v908_v40 = vor.u32 %v1103_v34, %v905_v35  ;;  %v903_v42 = vld [vmem:[%s1304_s30 + $0x20] sm:$0xf] }
  0x16   : > { %v988_v41 = vor.u32 %v1123_v36, %v985_v37  ;;  %v1104_v43 = vld [vmem:[%s1304_s30 + $0x24] sm:$0xf0]  ;;  %v975_v44 = vld [vmem:[%s1304_s30 + $0xb0] sm:$0xf]  ;;  %v1122_v45 = vld [vmem:[%s1304_s30 + $0xb4] sm:$0xf0] }
  0x17   : > { %v1105_v46 = vld [vmem:[%s1304_s30 + $0x34] sm:$0xf]  ;;  %v913_v47 = vld [vmem:[%s1304_s30 + $0x38] sm:$0xf0]  ;;  %v904_v50 = vor.u32 %v1104_v43, %v903_v42  ;;  %v976_v51 = vor.u32 %v1122_v45, %v975_v44  ;;  %v911_v54 = vld [vmem:[%s1304_s30 + $0x30] sm:$0xf] }
  0x18   : > { %544 = vmatpush.bf16.msra.mxu0 %v1139_v6  ;;  %1150 = vmatpush.bf16.msra.mxu2 %v1139_v6  ;;  %v1125_v48 = vld [vmem:[%s1304_s30 + $0xd4] sm:$0xf]  ;;  %v993_v49 = vld [vmem:[%s1304_s30 + $0xd8] sm:$0xf0]  ;;  %v916_v52 = vor.u32 %v1105_v46, %v913_v47  ;;  %v1106_v55 = vld [vmem:[%s1304_s30 + $0x34] sm:$0xf0] }
  0x19   : > { %651 = vmatpush.bf16.msra.mxu1 %v1143_v7  ;;  %1158 = vmatpush.bf16.msra.mxu3 %v1143_v7  ;;  %v996_v53 = vor.u32 %v1125_v48, %v993_v49  ;;  %v983_v56 = vld [vmem:[%s1304_s30 + $0xc0] sm:$0xf]  ;;  %v1124_v57 = vld [vmem:[%s1304_s30 + $0xc4] sm:$0xf0]  ;;  %v1107_v58 = vld [vmem:[%s1304_s30 + $0x44] sm:$0xf]  ;;  %v912_v62 = vor.u32 %v1106_v55, %v911_v54 }
  0x1a   : > { %v921_v59 = vld [vmem:[%s1304_s30 + $0x48] sm:$0xf0]  ;;  %v1127_v60 = vld [vmem:[%s1304_s30 + $0xe4] sm:$0xf]  ;;  %v984_v63 = vor.u32 %v1124_v57, %v983_v56  ;;  %v919_v2 = vld [vmem:[%s1304_s30 + $0x40] sm:$0xf] }
  0x1b   : > { %v1001_v61 = vld [vmem:[%s1304_s30 + $0xe8] sm:$0xf0]  ;;  %v924_v0 = vor.u32 %v1107_v58, %v921_v59  ;;  %v1108_v3 = vld [vmem:[%s1304_s30 + $0x44] sm:$0xf0]  ;;  %v991_v4 = vld [vmem:[%s1304_s30 + $0xd0] sm:$0xf] }
  0x1c   : > { %1077 = vmatmul.msk.bf16.vlgmr.msra.gmra.mxu1 %vm483_vm0, %v892_v12  ;;  %545 = vmatpush.bf16.msra.mxu0 %v1138_v13  ;;  %v1004_v1 = vor.u32 %v1127_v60, %v1001_v61  ;;  %v1126_v5 = vld [vmem:[%s1304_s30 + $0xd4] sm:$0xf0]  ;;  %v1109_v6 = vld [vmem:[%s1304_s30 + $0x54] sm:$0xf]  ;;  %v929_v7 = vld [vmem:[%s1304_s30 + $0x58] sm:$0xf0]  ;;  %v920_v10 = vor.u32 %v1108_v3, %v919_v2 }
  0x1d   : > { %1151 = vmatpush.bf16.msra.mxu2 %v1138_v13  ;;  %1087 = vmatmul.msk.bf16.vlgmr.msra.gmra.mxu3 %vm483_vm0, %v972_v14  ;;  %v1129_v8 = vld [vmem:[%s1304_s30 + $0xf4] sm:$0xf]  ;;  %v1009_v9 = vld [vmem:[%s1304_s30 + $0xf8] sm:$0xf0]  ;;  %v992_v11 = vor.u32 %v1126_v5, %v991_v4  ;;  %v932_v12 = vor.u32 %v1109_v6, %v929_v7  ;;  %v927_v14 = vld [vmem:[%s1304_s30 + $0x50] sm:$0xf] }
  0x1e   : > { %v1012_v13 = vor.u32 %v1129_v8, %v1009_v9  ;;  %v1111_v18 = vld [vmem:[%s1304_s30 + $0x64] sm:$0xf]  ;;  %v937_v19 = vld [vmem:[%s1304_s30 + $0x68] sm:$0xf0]  ;;  %v1113_v30 = vld [vmem:[%s1304_s30 + $0x74] sm:$0xf] }
  0x1f   : > { %v1131_v20 = vld [vmem:[%s1304_s30 + $0x104] sm:$0xf]  ;;  %v1017_v21 = vld [vmem:[%s1304_s30 + $0x108] sm:$0xf0]  ;;  %v940_v24 = vor.u32 %v1111_v18, %v937_v19  ;;  %v945_v31 = vld [vmem:[%s1304_s30 + $0x78] sm:$0xf0] }
  0x20   : > { %546 = vmatpush.bf16.msra.mxu0 %v1137_v15  ;;  %v1020_v25 = vor.u32 %v1131_v20, %v1017_v21  ;;  %v1133_v32 = vld [vmem:[%s1304_s30 + $0x114] sm:$0xf]  ;;  %v1025_v33 = vld [vmem:[%s1304_s30 + $0x118] sm:$0xf0]  ;;  %v948_v36 = vor.u32 %v1113_v30, %v945_v31  ;;  %v1132_v42 = vld [vmem:[%s1304_s30 + $0x104] sm:$0xf0] }
  0x21   : > { %1152 = vmatpush.bf16.msra.mxu2 %v1137_v15  ;;  %v1110_v15 = vld [vmem:[%s1304_s30 + $0x54] sm:$0xf0]  ;;  %v1028_v37 = vor.u32 %v1133_v32, %v1025_v33  ;;  %v1115_v43 = vld [vmem:[%s1304_s30 + $0x84] sm:$0xf]  ;;  %v953_v44 = vld [vmem:[%s1304_s30 + $0x88] sm:$0xf0] }
  0x22   : > { %v928_v22 = vor.u32 %v1110_v15, %v927_v14  ;;  %v956_v48 = vor.u32 %v1115_v43, %v953_v44  ;;  %v951_v54 = vld [vmem:[%s1304_s30 + $0x80] sm:$0xf]  ;;  %v1116_v55 = vld [vmem:[%s1304_s30 + $0x84] sm:$0xf0]  ;;  %v1023_v56 = vld [vmem:[%s1304_s30 + $0x110] sm:$0xf] }
  0x23   : > { %v1134_v57 = vld [vmem:[%s1304_s30 + $0x114] sm:$0xf0]  ;;  %v1117_v58 = vld [vmem:[%s1304_s30 + $0x94] sm:$0xf]  ;;  %v961_v59 = vld [vmem:[%s1304_s30 + $0x98] sm:$0xf0]  ;;  %v952_v60 = vor.u32 %v1116_v55, %v951_v54 }
  0x24   : > { %547 = vmatpush.bf16.msra.mxu0 %v1136_v16 }
  0x25   : > { %1153 = vmatpush.bf16.msra.mxu2 %v1136_v16  ;;  %v999_v16 = vld [vmem:[%s1304_s30 + $0xe0] sm:$0xf] }
  0x28   : > { %548 = vmatpush.bf16.msra.mxu0 %v1135_v17 }
  0x29   : > { %1154 = vmatpush.bf16.msra.mxu2 %v1135_v17  ;;  %v1128_v17 = vld [vmem:[%s1304_s30 + $0xe4] sm:$0xf0] }
  0x2a   : > { %v1000_v23 = vor.u32 %v1128_v17, %v999_v16 }
  0x2b   : > { %549 = vmatmul.bf16.vlgmr.msra.gmra.mxu0 %v888_v26  ;;  %v935_v26 = vld [vmem:[%s1304_s30 + $0x60] sm:$0xf] }
  0x2c   : > { %594 = vmatmul.bf16.vlgmr.msra.gmra.mxu2 %v960_v27  ;;  %1078 = vmatmul.msk.bf16.gmra.mxu1 %vm483_vm0, %v900_v28  ;;  %v1112_v27 = vld [vmem:[%s1304_s30 + $0x64] sm:$0xf0]  ;;  %v1007_v28 = vld [vmem:[%s1304_s30 + $0xf0] sm:$0xf] }
  0x2d   : > { %1088 = vmatmul.msk.bf16.gmra.mxu3 %vm483_vm0, %v980_v29  ;;  %v1130_v29 = vld [vmem:[%s1304_s30 + $0xf4] sm:$0xf0]  ;;  %v936_v34 = vor.u32 %v1112_v27, %v935_v26 }
  0x2e   : > { %v1008_v35 = vor.u32 %v1130_v29, %v1007_v28 }
  0x3b   : > { %554 = vmatmul.bf16.gmra.mxu0 %v896_v38  ;;  %v214_v38 = vld [vmem:[%s1304_s30 + $0x120] sm:$0xff] }
  0x3c   : > { %599 = vmatmul.bf16.gmra.mxu2 %v968_v39  ;;  %1079 = vmatmul.msk.bf16.gmra.mxu1 %vm483_vm0, %v908_v40  ;;  %v943_v39 = vld [vmem:[%s1304_s30 + $0x70] sm:$0xf]  ;;  %v1114_v40 = vld [vmem:[%s1304_s30 + $0x74] sm:$0xf0]  ;;  %v353_v45 = vunpack.c.h.b16 %v214_v38 }
  0x3d   : > { %1089 = vmatmul.msk.bf16.gmra.mxu3 %vm483_vm0, %v988_v41  ;;  %v1015_v41 = vld [vmem:[%s1304_s30 + $0x100] sm:$0xf]  ;;  %v944_v46 = vor.u32 %v1114_v40, %v943_v39 }
  0x3e   : > { %v1016_v47 = vor.u32 %v1132_v42, %v1015_v41 }
  0x4b   : > { %559 = vmatmul.bf16.gmra.mxu0 %v904_v50  ;;  %v391_v50 = vpack.c.b16 %v353_v45, %v353_v45 }
  0x4c   : > { %604 = vmatmul.bf16.gmra.mxu2 %v976_v51  ;;  %1080 = vmatmul.msk.bf16.gmra.mxu1 %vm483_vm0, %v916_v52 }
  0x4d   : > { %1090 = vmatmul.msk.bf16.gmra.mxu3 %vm483_vm0, %v996_v53  ;;  %v1412_v53 = vld [vmem:[%s1519_s2] ss:$0 sm:$0xff] }
  0x5b   : > { %564 = vmatmul.bf16.gmra.mxu0 %v912_v62  ;;  %v1024_v62 = vor.u32 %v1134_v57, %v1023_v56 }
  0x5c   : > { %609 = vmatmul.bf16.gmra.mxu2 %v984_v63  ;;  %1081 = vmatmul.msk.bf16.gmra.mxu1 %vm483_vm0, %v924_v0  ;;  %v964_v63 = vor.u32 %v1117_v58, %v961_v59 }
  0x5d   : > { %1091 = vmatmul.msk.bf16.gmra.mxu3 %vm483_vm0, %v1004_v1 }
  0x6b   : > { %569 = vmatmul.bf16.gmra.mxu0 %v920_v10 }
  0x6c   : > { %614 = vmatmul.bf16.gmra.mxu2 %v992_v11  ;;  %1082 = vmatmul.msk.bf16.gmra.mxu1 %vm483_vm0, %v932_v12  ;;  %v352_v11 = vunpack.c.l.b16 %v214_v38 }
  0x6d   : > { %1092 = vmatmul.msk.bf16.gmra.mxu3 %vm483_vm0, %v1012_v13 }
  0x6e   : > { %v390_v14 = vpack.c.b16 %v352_v11, %v352_v11 }
  0x7b   : > { %574 = vmatmul.bf16.gmra.mxu0 %v928_v22 }
  0x7c   : > { %619 = vmatmul.bf16.gmra.mxu2 %v1000_v23  ;;  %1083 = vmatmul.msk.bf16.gmra.mxu1 %vm483_vm0, %v940_v24 }
  0x7d   : > { %1093 = vmatmul.msk.bf16.gmra.mxu3 %vm483_vm0, %v1020_v25 }
  0x8b   : > { %579 = vmatmul.bf16.gmra.mxu0 %v936_v34 }
  0x8c   : > { %624 = vmatmul.bf16.gmra.mxu2 %v1008_v35  ;;  %1084 = vmatmul.msk.bf16.gmra.mxu1 %vm483_vm0, %v948_v36 }
  0x8d   : > { %1094 = vmatmul.msk.bf16.gmra.mxu3 %vm483_vm0, %v1028_v37 }
  0x99   : > { %v653_v49 = vpop.f32.mrf.mxu1 }
  0x9b   : > { %584 = vmatmul.bf16.gmra.mxu0 %v944_v46 }
  0x9c   : > { %629 = vmatmul.bf16.gmra.mxu2 %v1016_v47  ;;  %1085 = vmatmul.msk.bf16.gmra.mxu1 %vm483_vm0, %v956_v48 }
  0x9d   : > { %1095 = vmatmul.msk.bf16.gmra.mxu3 %vm483_vm0, %v391_v50 }
  0xa0   : > { %v703_v51 = vpop.f32.mrf.mxu3 }
  0xa1   : > { %v655_v52 = vpop.f32.mrf.mxu1 }
  0xa8   : > { %v550_v61 = vpop.f32.mrf.mxu0  ;;  %v705_v0 = vpop.f32.mrf.mxu3 }
  0xa9   : > { %v551_v1 = vadd.f32 %v1412_v53, %v550_v61  ;;  %v658_v2 = vpop.f32.mrf.mxu1 }
  0xab   : > { %v654_v3 = vadd.f32 %v653_v49, %v551_v1  ;;  %589 = vmatmul.bf16.gmra.mxu0 %v952_v60 }
  0xac   : > { %634 = vmatmul.bf16.gmra.mxu2 %v1024_v62  ;;  %1086 = vmatmul.msk.bf16.gmra.mxu1 %vm483_vm0, %v964_v63 }
  0xad   : > { %1168 = vtanh.f32 %v654_v3 }
  0xaf   : > { %v1422_v4 = vpop.f32.mrf.mxu2 }
  0xb0   : > { %v552_v5 = vpop.f32.mrf.mxu0  ;;  %v708_v6 = vpop.f32.mrf.mxu3 }
  0xb1   : > { %v553_v7 = vadd.f32 %v1412_v53, %v552_v5  ;;  %v660_v8 = vpop.f32.mrf.mxu1 }
  0xb3   : > { %v1169_v9 = vpop.eup %1168  ;;  %v656_v10 = vadd.f32 %v655_v52, %v553_v7 }
  0xb4   : > { %784 = vst [vmem:[%s1429_s22] sm:$0xff] %v1169_v9 }
  0xb5   : > { %1170 = vtanh.f32 %v656_v10 }
  0xb7   : > { %v1433_v12 = vpop.f32.mrf.mxu2 }
  0xb8   : > { %v555_v13 = vpop.f32.mrf.mxu0  ;;  %v710_v15 = vpop.f32.mrf.mxu3 }
  0xb9   : > { %v556_v16 = vadd.f32 %v1412_v53, %v555_v13  ;;  %v663_v17 = vpop.f32.mrf.mxu1 }
  0xbb   : > { %v1171_v18 = vpop.eup %1170  ;;  %v659_v19 = vadd.f32 %v658_v2, %v556_v16 }
  0xbc   : > { %785 = vst [vmem:[%s1429_s22 + $0x8] sm:$0xff] %v1171_v18  ;;  %639 = vmatmul.bf16.gmra.mxu2 %v390_v14 }
  0xbd   : > { %1172 = vtanh.f32 %v659_v19 }
  0xbf   : > { %v600_v20 = vpop.f32.mrf.mxu2 }
  0xc0   : > { %v601_v21 = vadd.f32 %v1412_v53, %v600_v20  ;;  %v557_v22 = vpop.f32.mrf.mxu0  ;;  %v713_v23 = vpop.f32.mrf.mxu3 }
  0xc1   : > { %v558_v24 = vadd.f32 %v1412_v53, %v557_v22  ;;  %v665_v25 = vpop.f32.mrf.mxu1 }
  0xc2   : > { %v704_v26 = vadd.f32 %v703_v51, %v601_v21 }
  0xc3   : > { %v1173_v27 = vpop.eup %1172  ;;  %v661_v28 = vadd.f32 %v660_v8, %v558_v24 }
  0xc4   : > { %786 = vst [vmem:[%s1429_s22 + $0x10] sm:$0xff] %v1173_v27  ;;  %1174 = vtanh.f32 %v704_v26 }
  0xc5   : > { %1176 = vtanh.f32 %v661_v28 }
  0xc7   : > { %v602_v29 = vpop.f32.mrf.mxu2 }
  0xc8   : > { %v603_v30 = vadd.f32 %v1412_v53, %v602_v29  ;;  %v560_v31 = vpop.f32.mrf.mxu0  ;;  %v715_v32 = vpop.f32.mrf.mxu3 }
  0xc9   : > { %v561_v33 = vadd.f32 %v1412_v53, %v560_v31  ;;  %v668_v34 = vpop.f32.mrf.mxu1 }
  0xca   : > { %v1175_v35 = vpop.eup %1174  ;;  %v706_v36 = vadd.f32 %v705_v0, %v603_v30 }
  0xcb   : > { %v1177_v37 = vpop.eup %1176  ;;  %804 = vst [vmem:[%s1429_s22 + $0xa0] sm:$0xff] %v1175_v35  ;;  %v664_v38 = vadd.f32 %v663_v17, %v561_v33 }
  0xcc   : > { %787 = vst [vmem:[%s1429_s22 + $0x18] sm:$0xff] %v1177_v37  ;;  %1178 = vtanh.f32 %v706_v36 }
  0xcd   : > { %1180 = vtanh.f32 %v664_v38 }
  0xcf   : > { %v605_v39 = vpop.f32.mrf.mxu2 }
  0xd0   : > { %v606_v40 = vadd.f32 %v1412_v53, %v605_v39  ;;  %v562_v41 = vpop.f32.mrf.mxu0  ;;  %v718_v42 = vpop.f32.mrf.mxu3 }
  0xd1   : > { %v563_v43 = vadd.f32 %v1412_v53, %v562_v41  ;;  %v670_v44 = vpop.f32.mrf.mxu1 }
  0xd2   : > { %v1179_v45 = vpop.eup %1178  ;;  %v709_v46 = vadd.f32 %v708_v6, %v606_v40 }
  0xd3   : > { %v1181_v47 = vpop.eup %1180  ;;  %805 = vst [vmem:[%s1429_s22 + $0xa8] sm:$0xff] %v1179_v45  ;;  %v666_v48 = vadd.f32 %v665_v25, %v563_v43 }
  0xd4   : > { %788 = vst [vmem:[%s1429_s22 + $0x20] sm:$0xff] %v1181_v47  ;;  %1182 = vtanh.f32 %v709_v46 }
  0xd5   : > { %1184 = vtanh.f32 %v666_v48 }
  0xd7   : > { %v607_v49 = vpop.f32.mrf.mxu2 }
  0xd8   : > { %v608_v50 = vadd.f32 %v1412_v53, %v607_v49  ;;  %v565_v51 = vpop.f32.mrf.mxu0  ;;  %v720_v52 = vpop.f32.mrf.mxu3 }
  0xd9   : > { %v566_v54 = vadd.f32 %v1412_v53, %v565_v51  ;;  %v673_v55 = vpop.f32.mrf.mxu1 }
  0xda   : > { %v1183_v56 = vpop.eup %1182  ;;  %v711_v57 = vadd.f32 %v710_v15, %v608_v50 }
  0xdb   : > { %v1185_v58 = vpop.eup %1184  ;;  %806 = vst [vmem:[%s1429_s22 + $0xb0] sm:$0xff] %v1183_v56  ;;  %v669_v59 = vadd.f32 %v668_v34, %v566_v54 }
  0xdc   : > { %789 = vst [vmem:[%s1429_s22 + $0x28] sm:$0xff] %v1185_v58  ;;  %1186 = vtanh.f32 %v711_v57 }
  0xdd   : > { %1188 = vtanh.f32 %v669_v59 }
  0xdf   : > { %v610_v60 = vpop.f32.mrf.mxu2 }
  0xe0   : > { %v611_v61 = vadd.f32 %v1412_v53, %v610_v60  ;;  %v567_v62 = vpop.f32.mrf.mxu0  ;;  %v723_v63 = vpop.f32.mrf.mxu3 }
  0xe1   : > { %v568_v0 = vadd.f32 %v1412_v53, %v567_v62  ;;  %v675_v1 = vpop.f32.mrf.mxu1 }
  0xe2   : > { %v1187_v2 = vpop.eup %1186  ;;  %v714_v3 = vadd.f32 %v713_v23, %v611_v61 }
  0xe3   : > { %v1189_v5 = vpop.eup %1188  ;;  %807 = vst [vmem:[%s1429_s22 + $0xb8] sm:$0xff] %v1187_v2  ;;  %v671_v6 = vadd.f32 %v670_v44, %v568_v0 }
  0xe4   : > { %790 = vst [vmem:[%s1429_s22 + $0x30] sm:$0xff] %v1189_v5  ;;  %1190 = vtanh.f32 %v714_v3 }
  0xe5   : > { %1192 = vtanh.f32 %v671_v6 }
  0xe7   : > { %v612_v7 = vpop.f32.mrf.mxu2 }
  0xe8   : > { %v613_v8 = vadd.f32 %v1412_v53, %v612_v7  ;;  %v570_v9 = vpop.f32.mrf.mxu0  ;;  %v725_v10 = vpop.f32.mrf.mxu3 }
  0xe9   : > { %v571_v11 = vadd.f32 %v1412_v53, %v570_v9  ;;  %v678_v13 = vpop.f32.mrf.mxu1 }
  0xea   : > { %v1191_v14 = vpop.eup %1190  ;;  %v716_v15 = vadd.f32 %v715_v32, %v613_v8 }
  0xeb   : > { %v1193_v16 = vpop.eup %1192  ;;  %808 = vst [vmem:[%s1429_s22 + $0xc0] sm:$0xff] %v1191_v14  ;;  %v674_v17 = vadd.f32 %v673_v55, %v571_v11 }
  0xec   : > { %791 = vst [vmem:[%s1429_s22 + $0x38] sm:$0xff] %v1193_v16  ;;  %1194 = vtanh.f32 %v716_v15 }
  0xed   : > { %1196 = vtanh.f32 %v674_v17 }
  0xef   : > { %v615_v18 = vpop.f32.mrf.mxu2 }
  0xf0   : > { %v616_v19 = vadd.f32 %v1412_v53, %v615_v18  ;;  %v572_v20 = vpop.f32.mrf.mxu0  ;;  %v728_v21 = vpop.f32.mrf.mxu3 }
  0xf1   : > { %v573_v22 = vadd.f32 %v1412_v53, %v572_v20  ;;  %v680_v23 = vpop.f32.mrf.mxu1 }
  0xf2   : > { %v1195_v24 = vpop.eup %1194  ;;  %v719_v25 = vadd.f32 %v718_v42, %v616_v19 }
  0xf3   : > { %v1197_v26 = vpop.eup %1196  ;;  %809 = vst [vmem:[%s1429_s22 + $0xc8] sm:$0xff] %v1195_v24  ;;  %v676_v27 = vadd.f32 %v675_v1, %v573_v22 }
  0xf4   : > { %792 = vst [vmem:[%s1429_s22 + $0x40] sm:$0xff] %v1197_v26  ;;  %1198 = vtanh.f32 %v719_v25 }
  0xf5   : > { %1200 = vtanh.f32 %v676_v27 }
  0xf7   : > { %v617_v28 = vpop.f32.mrf.mxu2 }
  0xf8   : > { %v618_v29 = vadd.f32 %v1412_v53, %v617_v28  ;;  %v575_v30 = vpop.f32.mrf.mxu0  ;;  %v730_v31 = vpop.f32.mrf.mxu3  ;;  %v596_v28 = vadd.f32 %v1412_v53, %v1422_v4 }
  0xf9   : > { %v576_v32 = vadd.f32 %v1412_v53, %v575_v30  ;;  %v683_v33 = vpop.f32.mrf.mxu1 }
  0xfa   : > { %v1199_v34 = vpop.eup %1198  ;;  %v721_v35 = vadd.f32 %v720_v52, %v618_v29 }
  0xfb   : > { %v1201_v36 = vpop.eup %1200  ;;  %810 = vst [vmem:[%s1429_s22 + $0xd0] sm:$0xff] %v1199_v34  ;;  %v679_v37 = vadd.f32 %v678_v13, %v576_v32 }
  0xfc   : > { %793 = vst [vmem:[%s1429_s22 + $0x48] sm:$0xff] %v1201_v36  ;;  %1202 = vtanh.f32 %v721_v35 }
  0xfd   : > { %1204 = vtanh.f32 %v679_v37 }
  0xff   : > { %v620_v38 = vpop.f32.mrf.mxu2 }
 0x100   : > { %v621_v39 = vadd.f32 %v1412_v53, %v620_v38  ;;  %v577_v40 = vpop.f32.mrf.mxu0  ;;  %v733_v41 = vpop.f32.mrf.mxu3 }
 0x101   : > { %v578_v42 = vadd.f32 %v1412_v53, %v577_v40  ;;  %v685_v43 = vpop.f32.mrf.mxu1 }
 0x102   : > { %v1203_v44 = vpop.eup %1202  ;;  %v724_v45 = vadd.f32 %v723_v63, %v621_v39  ;;  %v598_v39 = vadd.f32 %v1412_v53, %v1433_v12 }
 0x103   : > { %v1205_v46 = vpop.eup %1204  ;;  %811 = vst [vmem:[%s1429_s22 + $0xd8] sm:$0xff] %v1203_v44  ;;  %v681_v47 = vadd.f32 %v680_v23, %v578_v42 }
 0x104   : > { %794 = vst [vmem:[%s1429_s22 + $0x50] sm:$0xff] %v1205_v46  ;;  %1206 = vtanh.f32 %v724_v45 }
 0x105   : > { %1208 = vtanh.f32 %v681_v47 }
 0x107   : > { %v622_v48 = vpop.f32.mrf.mxu2 }
 0x108   : > { %v623_v49 = vadd.f32 %v1412_v53, %v622_v48  ;;  %v580_v50 = vpop.f32.mrf.mxu0  ;;  %v735_v51 = vpop.f32.mrf.mxu3 }
 0x109   : > { %v581_v52 = vadd.f32 %v1412_v53, %v580_v50  ;;  %v688_v54 = vpop.f32.mrf.mxu1 }
 0x10a   : > { %v1207_v55 = vpop.eup %1206  ;;  %v726_v56 = vadd.f32 %v725_v10, %v623_v49 }
 0x10b   : > { %v1209_v57 = vpop.eup %1208  ;;  %812 = vst [vmem:[%s1429_s22 + $0xe0] sm:$0xff] %v1207_v55  ;;  %v684_v58 = vadd.f32 %v683_v33, %v581_v52 }
 0x10c   : > { %795 = vst [vmem:[%s1429_s22 + $0x58] sm:$0xff] %v1209_v57  ;;  %1210 = vtanh.f32 %v726_v56 }
 0x10d   : > { %1212 = vtanh.f32 %v684_v58 }
 0x10f   : > { %v625_v59 = vpop.f32.mrf.mxu2 }
 0x110   : > { %v626_v60 = vadd.f32 %v1412_v53, %v625_v59  ;;  %v582_v61 = vpop.f32.mrf.mxu0  ;;  %v1477_v62 = vpop.f32.mrf.mxu3 }
 0x111   : > { %v583_v63 = vadd.f32 %v1412_v53, %v582_v61  ;;  %v690_v0 = vpop.f32.mrf.mxu1 }
 0x112   : > { %v1211_v1 = vpop.eup %1210  ;;  %v729_v2 = vadd.f32 %v728_v21, %v626_v60 }
 0x113   : > { %v1213_v3 = vpop.eup %1212  ;;  %813 = vst [vmem:[%s1429_s22 + $0xe8] sm:$0xff] %v1211_v1  ;;  %v686_v5 = vadd.f32 %v685_v43, %v583_v63 }
 0x114   : > { %796 = vst [vmem:[%s1429_s22 + $0x60] sm:$0xff] %v1213_v3  ;;  %1214 = vtanh.f32 %v729_v2 }
 0x115   : > { %1216 = vtanh.f32 %v686_v5 }
 0x117   : > { %v627_v6 = vpop.f32.mrf.mxu2 }
 0x118   : > { %v628_v7 = vadd.f32 %v1412_v53, %v627_v6  ;;  %v585_v8 = vpop.f32.mrf.mxu0  ;;  %v1483_v9 = vpop.f32.mrf.mxu3 }
 0x119   : > { %v586_v10 = vadd.f32 %v1412_v53, %v585_v8  ;;  %v693_v11 = vpop.f32.mrf.mxu1 }
 0x11a   : > { %v1215_v13 = vpop.eup %1214  ;;  %v731_v14 = vadd.f32 %v730_v31, %v628_v7 }
 0x11b   : > { %v1217_v15 = vpop.eup %1216  ;;  %814 = vst [vmem:[%s1429_s22 + $0xf0] sm:$0xff] %v1215_v13  ;;  %v689_v16 = vadd.f32 %v688_v54, %v586_v10 }
 0x11c   : > { %797 = vst [vmem:[%s1429_s22 + $0x68] sm:$0xff] %v1217_v15  ;;  %1218 = vtanh.f32 %v731_v14 }
 0x11d   : > { %1220 = vtanh.f32 %v689_v16 }
 0x11f   : > { %v630_v17 = vpop.f32.mrf.mxu2 }
 0x120   : > { %v631_v18 = vadd.f32 %v1412_v53, %v630_v17  ;;  %v587_v19 = vpop.f32.mrf.mxu0  ;;  %v743_v20 = vpop.f32.mrf.mxu3 }
 0x121   : > { %v588_v21 = vadd.f32 %v1412_v53, %v587_v19  ;;  %v695_v22 = vpop.f32.mrf.mxu1 }
 0x122   : > { %v1219_v23 = vpop.eup %1218  ;;  %v734_v24 = vadd.f32 %v733_v41, %v631_v18 }
 0x123   : > { %v1221_v25 = vpop.eup %1220  ;;  %815 = vst [vmem:[%s1429_s22 + $0xf8] sm:$0xff] %v1219_v23  ;;  %v691_v26 = vadd.f32 %v690_v0, %v588_v21 }
 0x124   : > { %798 = vst [vmem:[%s1429_s22 + $0x70] sm:$0xff] %v1221_v25  ;;  %1222 = vtanh.f32 %v734_v24 }
 0x125   : > { %1224 = vtanh.f32 %v691_v26 }
 0x127   : > { %v632_v27 = vpop.f32.mrf.mxu2 }
 0x128   : > { %v633_v29 = vadd.f32 %v1412_v53, %v632_v27  ;;  %v590_v30 = vpop.f32.mrf.mxu0  ;;  %v745_v31 = vpop.f32.mrf.mxu3 }
 0x129   : > { %v591_v32 = vadd.f32 %v1412_v53, %v590_v30  ;;  %v698_v33 = vpop.f32.mrf.mxu1 }
 0x12a   : > { %v1223_v34 = vpop.eup %1222  ;;  %v736_v35 = vadd.f32 %v735_v51, %v633_v29  ;;  %v699_v36 = vadd.f32 %v698_v33, %v596_v28 }
 0x12b   : > { %v1225_v37 = vpop.eup %1224  ;;  %816 = vst [vmem:[%s1429_s22 + $0x100] sm:$0xff] %v1223_v34  ;;  %v694_v38 = vadd.f32 %v693_v11, %v591_v32 }
 0x12c   : > { %799 = vst [vmem:[%s1429_s22 + $0x78] sm:$0xff] %v1225_v37  ;;  %1226 = vtanh.f32 %v736_v35 }
 0x12d   : > { %1228 = vtanh.f32 %v694_v38 }
 0x12e   : > { %1230 = vtanh.f32 %v699_v36 }
 0x12f   : > { %v635_v4 = vpop.f32.mrf.mxu2 }
 0x130   : > { %v636_v40 = vadd.f32 %v1412_v53, %v635_v4  ;;  %v592_v41 = vpop.f32.mrf.mxu0 }
 0x131   : > { %v593_v42 = vadd.f32 %v1412_v53, %v592_v41  ;;  %v700_v43 = vpop.f32.mrf.mxu1 }
 0x132   : > { %v1227_v44 = vpop.eup %1226  ;;  %v739_v45 = vadd.f32 %v1477_v62, %v636_v40  ;;  %v701_v46 = vadd.f32 %v700_v43, %v598_v39 }
 0x133   : > { %v1229_v47 = vpop.eup %1228  ;;  %817 = vst [vmem:[%s1429_s22 + $0x108] sm:$0xff] %v1227_v44  ;;  %v696_v48 = vadd.f32 %v695_v22, %v593_v42 }
 0x134   : > { %v1231_v49 = vpop.eup %1230  ;;  %800 = vst [vmem:[%s1429_s22 + $0x80] sm:$0xff] %v1229_v47  ;;  %1232 = vtanh.f32 %v739_v45 }
 0x135   : > { %802 = vst [vmem:[%s1429_s22 + $0x90] sm:$0xff] %v1231_v49  ;;  %1234 = vtanh.f32 %v696_v48 }
 0x136   : > { %1236 = vtanh.f32 %v701_v46 }
 0x137   : > { %v637_v12 = vpop.f32.mrf.mxu2 }
 0x138   : > { %v638_v50 = vadd.f32 %v1412_v53, %v637_v12 }
 0x13a   : > { %v1233_v51 = vpop.eup %1232  ;;  %v741_v52 = vadd.f32 %v1483_v9, %v638_v50 }
 0x13b   : > { %v1235_v54 = vpop.eup %1234  ;;  %818 = vst [vmem:[%s1429_s22 + $0x110] sm:$0xff] %v1233_v51 }
 0x13c   : > { %v1237_v55 = vpop.eup %1236  ;;  %801 = vst [vmem:[%s1429_s22 + $0x88] sm:$0xff] %v1235_v54  ;;  %1238 = vtanh.f32 %v741_v52 }
 0x13d   : > { %803 = vst [vmem:[%s1429_s22 + $0x98] sm:$0xff] %v1237_v55 }
 0x13f   : > { %v640_v56 = vpop.f32.mrf.mxu2 }
 0x140   : > { %v641_v57 = vadd.f32 %v1412_v53, %v640_v56 }
 0x142   : > { %v1239_v58 = vpop.eup %1238  ;;  %v744_v59 = vadd.f32 %v743_v20, %v641_v57 }
 0x143   : > { %819 = vst [vmem:[%s1429_s22 + $0x118] sm:$0xff] %v1239_v58 }
 0x144   : > { %1240 = vtanh.f32 %v744_v59 }
 0x147   : > { %v642_v60 = vpop.f32.mrf.mxu2 }
 0x14a   : > { %v1241_v61 = vpop.eup %1240 }
 0x14b   : > { %820 = vst [vmem:[%s1429_s22 + $0x120] sm:$0xff] %v1241_v61 }
 0x14c PF: > { %s13_s12 = sadd.s32 1, %s1248_s12  }
 0x14d   : > { %p10_p4 = scmp.ge.s32.totalorder %s13_s12, 4  }
 0x14f   :  { %12 = sbr.rel (!%p10_p4) target bundleno = 1 (0x1), region = 62 }

</bundles_post_ra>
